<compile_context>
chip_gen: v5e
topology: v5e:2x2
jax: 0.10.0
libtpu: 0.0.40
codegen_flags: <defaults>
</compile_context>

<pallas_src>
import jax
import jax.numpy as jnp
from jax.experimental import pallas as pl
from jax.experimental.pallas import tpu as pltpu


# ----------------------------------------------------------------------------
# Fused decoder kernel.  Per row tile of coarse pixels:
#   x_ref  : (tm, 256)        conv7 input channels
#   p4_ref : (tm, 4*C0)       pool4 skip, columns ordered (a1, b1, c)
#   p3_ref : (tm, 16*C1)      pool3 skip, columns ordered (a1, b1, a2, b2, c)
#   o_ref  : (tm, 64)  f32    columns ordered (a1, b1, a2, b2, a3, b3)
# Invariant: every output row depends ONLY on its own input row, so ragged
# final tiles (padded reads / masked writes) remain correct.
# ----------------------------------------------------------------------------
def _decoder_kernel(x_ref, p4_ref, p3_ref,
                    w7_ref, b7_ref, w1_ref, b1_ref, w2_ref, b2_ref,
                    w3m_ref, w3s_ref, b3_ref,
                    o_ref, cat_ref):
    f32, bf16 = jnp.float32, jnp.bfloat16

    # conv_7_table: 1x1 conv == per-pixel channel matmul.
    y0 = (jnp.dot(x_ref[...], w7_ref[...], preferred_element_type=f32)
          + b7_ref[...]).astype(bf16)

    # upsample_1_table (k=s=2 tconv == per-pixel matmul); columns (a1, b1, c).
    y1 = (jnp.dot(y0, w1_ref[...], preferred_element_type=f32)
          + b1_ref[...]).astype(bf16)

    c_up1 = w1_ref.shape[1] // 4           # 128
    c_p4 = p4_ref.shape[1] // 4            # channels[0]
    c_p3 = p3_ref.shape[1] // 4            # 4 * channels[1]

    for q1 in range(4):                    # q1 = 2*a1 + b1 (level-1 fine offset)
        # cat([up1 out, pool4], channels) fused into a single K=(128+C0) dot
        # via a small VMEM staging buffer (one MXU weight pass, not two).
        cat_ref[:, :c_up1] = y1[:, q1 * c_up1:(q1 + 1) * c_up1]
        cat_ref[:, c_up1:] = p4_ref[:, q1 * c_p4:(q1 + 1) * c_p4]
        y2 = (jnp.dot(cat_ref[...], w2_ref[...], preferred_element_type=f32)
              + b2_ref[...]).astype(bf16)            # (tm, 4*256) cols (a2,b2,c)

        # upsample_3_table: block-diagonal weights over (a2, b2) turn the 16
        # per-fine-pixel cout=1 matmuls into two wide MXU calls per q1.
        p3_s = p3_ref[:, q1 * c_p3:(q1 + 1) * c_p3]  # (tm, 4*C1) cols (a2,b2,c)
        o16 = (jnp.dot(y2, w3m_ref[...], preferred_element_type=f32)
               + jnp.dot(p3_s, w3s_ref[...], preferred_element_type=f32)
               + b3_ref[...])                        # (tm, 16) cols (a2,b2,a3,b3)
        o_ref[:, q1 * 16:(q1 + 1) * 16] = o16.astype(o_ref.dtype)


# ----------------------------------------------------------------------------
# Row-tile selection: multiple of 8, divides N when possible, prefers an even
# grid >= 2 so a v7x dual-TensorCore chip gets balanced "parallel" work.
# ----------------------------------------------------------------------------
def _pick_tm(n, cap=256):
    if n <= 8:
        return n
    hi = min(cap, n // 2)
    hi -= hi % 8
    if hi >= 8:
        for tm in range(hi, 7, -8):        # divisor, multiple of 8, even grid
            if n % tm == 0 and (n // tm) % 2 == 0:
                return tm
        for tm in range(hi, 7, -8):        # divisor, multiple of 8
            if n % tm == 0:
                return tm
        return hi                          # ragged last tile (rows independent)
    return n


# ----------------------------------------------------------------------------
# pallas_call wrapper
# ----------------------------------------------------------------------------
def _fused_decoder_call(xr, p4g, p3g, pp, *, tm_cap=256):
    n, cin = xr.shape
    tm = _pick_tm(n, tm_cap)
    c_up1 = pp["w1"].shape[1] // 4
    c_p4 = p4g.shape[1] // 4

    def row_spec(width):
        return pl.BlockSpec((tm, width), lambda i: (i, 0))

    def resident_spec(arr):                # weight/bias fully resident in VMEM
        return pl.BlockSpec(arr.shape, lambda i: (0, 0))

    return pl.pallas_call(
        _decoder_kernel,
        out_shape=jax.ShapeDtypeStruct((n, 64), jnp.float32),
        grid_spec=pltpu.PrefetchScalarGridSpec(
            num_scalar_prefetch=0,
            grid=(pl.cdiv(n, tm),),
            in_specs=[
                row_spec(cin),
                row_spec(p4g.shape[1]),
                row_spec(p3g.shape[1]),
                resident_spec(pp["w7"]), resident_spec(pp["b7"]),
                resident_spec(pp["w1"]), resident_spec(pp["b1"]),
                resident_spec(pp["w2"]), resident_spec(pp["b2"]),
                resident_spec(pp["w3m"]), resident_spec(pp["w3s"]),
                resident_spec(pp["b3"]),
            ],
            out_specs=pl.BlockSpec((tm, 64), lambda i: (i, 0)),
            scratch_shapes=[pltpu.VMEM((tm, c_up1 + c_p4), jnp.bfloat16)],
        ),
        compiler_params=pltpu.CompilerParams(
            dimension_semantics=("parallel",),
            vmem_limit_bytes=32 * 1024 * 1024,
        ),
    )(xr, p4g, p3g, pp["w7"], pp["b7"], pp["w1"], pp["b1"],
      pp["w2"], pp["b2"], pp["w3m"], pp["w3s"], pp["b3"])


# ----------------------------------------------------------------------------
# One-time weight pre-packing (PyTorch layout -> fused-matmul layout, bf16)
# ----------------------------------------------------------------------------
def prepare_params(raw, kernels):
    assert tuple(kernels[0]) == (1, 1), "conv_7_table must be a 1x1 conv"
    assert all(tuple(k) == (2, 2) for k in kernels[1:]), \
        "fused decoder assumes kernel == stride == 2 upsamples"
    bf16, f32 = jnp.bfloat16, jnp.float32

    def pack_tconv(w_iohw):        # (Cin, Cout, 2, 2) -> (Cin, 4*Cout), cols (a,b,c)
        cin, cout = w_iohw.shape[0], w_iohw.shape[1]
        return jnp.transpose(w_iohw, (0, 2, 3, 1)).reshape(cin, 4 * cout)

    pp = {}
    pp["w7"] = raw["conv7_w"][:, :, 0, 0].T.astype(bf16)                 # (256, 256)
    pp["b7"] = raw["conv7_b"].astype(f32).reshape(1, -1)

    pp["w1"] = pack_tconv(raw["up1_w"]).astype(bf16)                     # (256, 512)
    pp["b1"] = jnp.tile(raw["up1_b"], 4).reshape(1, -1).astype(f32)

    pp["w2"] = pack_tconv(raw["up2_w"]).astype(bf16)                     # (128+C0, 1024)
    pp["b2"] = jnp.tile(raw["up2_b"], 4).reshape(1, -1).astype(f32)

    # upsample_3_table: block-diagonal packing over the level-2 offset (a2,b2)
    # so its 16 cout=1 matmuls per coarse pixel become wide MXU calls.
    w3 = raw["up3_w"]                                                    # (256+C1, 1, 2, 2)
    c_up2 = 256
    c1 = w3.shape[0] - c_up2
    w3_main = w3[:c_up2, 0].reshape(c_up2, 4)                            # cols (a3, b3)
    w3_skip = w3[c_up2:, 0].reshape(c1, 4)
    w3m = jnp.zeros((4 * c_up2, 16), f32)
    w3s = jnp.zeros((4 * c1, 16), f32)
    for q in range(4):                                                   # q = 2*a2 + b2
        w3m = w3m.at[q * c_up2:(q + 1) * c_up2, q * 4:(q + 1) * 4].set(w3_main)
        w3s = w3s.at[q * c1:(q + 1) * c1, q * 4:(q + 1) * 4].set(w3_skip)
    pp["w3m"] = w3m.astype(bf16)
    pp["w3s"] = w3s.astype(bf16)
    pp["b3"] = jnp.full((1, 16), raw["up3_b"][0], f32)
    return pp


# ----------------------------------------------------------------------------
# TableDecoder forward (matches the PyTorch module semantics, NCHW in/out)
# ----------------------------------------------------------------------------
@jax.jit
def table_decoder_forward(pp, x, pool3_out, pool4_out):
    B, cin, H, W = x.shape
    C0 = pool4_out.shape[1]
    C1 = pool3_out.shape[1]
    bf16 = jnp.bfloat16

    # NCHW -> coarse-pixel rows (b, h, w); skip windows grouped into lanes.
    # These replace the old NCHW->NHWC transposes (same HBM cost) and make the
    # three pixel shuffles free inside the fused kernel.
    xr = jnp.transpose(x, (0, 2, 3, 1)).reshape(B * H * W, cin).astype(bf16)
    p4g = jnp.transpose(pool4_out.reshape(B, C0, H, 2, W, 2),
                        (0, 2, 4, 3, 5, 1)).reshape(B * H * W, 4 * C0).astype(bf16)
    p3g = jnp.transpose(pool3_out.reshape(B, C1, H, 2, 2, W, 2, 2),
                        (0, 2, 5, 3, 6, 4, 7, 1)).reshape(B * H * W, 16 * C1).astype(bf16)

    y = _fused_decoder_call(xr, p4g, p3g, pp)       # (B*H*W, 64)

    # Un-scramble each coarse pixel's 8x8 patch into the final image (small,
    # single XLA pass over the f32 output only).
    y = y.reshape(B, H, W, 2, 2, 2, 2, 2, 2)        # (B,h,w,a1,b1,a2,b2,a3,b3)
    y = jnp.transpose(y, (0, 1, 3, 5, 7, 2, 4, 6, 8))
    return y.reshape(B, 1, 8 * H, 8 * W)


# ----------------------------------------------------------------------------
# Deterministic parameter init (PyTorch-shaped f32 weights)
# ----------------------------------------------------------------------------
def init_params(key, channels, kernels):
    def uinit(key, shape, fan_in):
        bound = 1.0 / jnp.sqrt(jnp.float32(fan_in))
        return jax.random.uniform(key, shape, jnp.float32, -bound, bound)

    ks = jax.random.split(key, 8)
    p = {}
    kh, kw = kernels[0]
    p["conv7_w"] = uinit(ks[0], (256, 256, kh, kw), 256 * kh * kw)
    p["conv7_b"] = uinit(ks[1], (256,), 256 * kh * kw)
    kh, kw = kernels[1]
    p["up1_w"] = uinit(ks[2], (256, 128, kh, kw), 256 * kh * kw)
    p["up1_b"] = uinit(ks[3], (128,), 256 * kh * kw)
    kh, kw = kernels[2]
    cin2 = 128 + channels[0]
    p["up2_w"] = uinit(ks[4], (cin2, 256, kh, kw), cin2 * kh * kw)
    p["up2_b"] = uinit(ks[5], (256,), cin2 * kh * kw)
    kh, kw = kernels[3]
    cin3 = 256 + channels[1]
    p["up3_w"] = uinit(ks[6], (cin3, 1, kh, kw), cin3 * kh * kw)
    p["up3_b"] = uinit(ks[7], (1,), cin3 * kh * kw)
    return p


# ----------------------------------------------------------------------------
# Pure-JAX (XLA conv, f32) reference for correctness checking
# ----------------------------------------------------------------------------
def _ref_conv2d(x, w, b, stride):
    y = jax.lax.conv_general_dilated(
        x, w, window_strides=stride, padding="VALID",
        dimension_numbers=("NCHW", "OIHW", "NCHW"))
    return y + b[None, :, None, None]


def _ref_convtranspose2d(x, w, b, stride):
    kh, kw = w.shape[-2], w.shape[-1]
    wf = jnp.transpose(w, (1, 0, 2, 3))[:, :, ::-1, ::-1]
    y = jax.lax.conv_general_dilated(
        x, wf, window_strides=(1, 1),
        padding=[(kh - 1, kh - 1), (kw - 1, kw - 1)],
        lhs_dilation=stride,
        dimension_numbers=("NCHW", "OIHW", "NCHW"))
    return y + b[None, :, None, None]


def reference_forward(params, x, pool3_out, pool4_out, strides):
    y = _ref_conv2d(x, params["conv7_w"], params["conv7_b"], strides[0])
    y = _ref_convtranspose2d(y, params["up1_w"], params["up1_b"], strides[1])
    y = jnp.concatenate([y, pool4_out], axis=1)
    y = _ref_convtranspose2d(y, params["up2_w"], params["up2_b"], strides[2])
    y = jnp.concatenate([y, pool3_out], axis=1)
    y = _ref_convtranspose2d(y, params["up3_w"], params["up3_b"], strides[3])
    return y


# ----------------------------------------------------------------------------
if __name__ == "__main__":
    # Canonical-style TableNet config (small spatial size): kernel == stride.
    channels = [32, 16]                      # extra channels from pool4 / pool3
    kernels = ((1, 1), (2, 2), (2, 2), (2, 2))
    strides = [(1, 1), (2, 2), (2, 2), (2, 2)]

    key = jax.random.PRNGKey(0)
    kp, kx, k3, k4 = jax.random.split(key, 4)

    B, H, W = 2, 4, 4
    x = jax.random.normal(kx, (B, 256, H, W), jnp.float32)                 # NCHW
    pool4_out = jax.random.normal(k4, (B, channels[0], 2 * H, 2 * W), jnp.float32)
    pool3_out = jax.random.normal(k3, (B, channels[1], 4 * H, 4 * W), jnp.float32)

    raw_params = init_params(kp, channels, kernels)
    packed = prepare_params(raw_params, kernels)   # one-time weight pre-packing

    out = jax.block_until_ready(
        table_decoder_forward(packed, x, pool3_out, pool4_out))
    assert out.shape == (B, 1, 8 * H, 8 * W), out.shape

    ref = jax.block_until_ready(
        reference_forward(raw_params, x, pool3_out, pool4_out, strides))
    # bf16 operands / f32 accumulation vs the f32 XLA reference -> loose tol.
    max_err = float(jnp.max(jnp.abs(out - ref)))
    assert jnp.allclose(out, ref, rtol=5e-2, atol=5e-2), max_err

    print("KERNEL_OK")
</pallas_src>

<mosaic_0001>
module attributes {stable_mosaic.version = 11 : i64} {
  func.func @_decoder_kernel(%arg0: i32, %arg1: memref<16x256xbf16, #tpu.memory_space<vmem>>, %arg2: memref<16x128xbf16, #tpu.memory_space<vmem>>, %arg3: memref<16x256xbf16, #tpu.memory_space<vmem>>, %arg4: memref<256x256xbf16, #tpu.memory_space<vmem>>, %arg5: memref<1x256xf32, #tpu.memory_space<vmem>>, %arg6: memref<256x512xbf16, #tpu.memory_space<vmem>>, %arg7: memref<1x512xf32, #tpu.memory_space<vmem>>, %arg8: memref<160x1024xbf16, #tpu.memory_space<vmem>>, %arg9: memref<1x1024xf32, #tpu.memory_space<vmem>>, %arg10: memref<1024x16xbf16, #tpu.memory_space<vmem>>, %arg11: memref<64x16xbf16, #tpu.memory_space<vmem>>, %arg12: memref<1x16xf32, #tpu.memory_space<vmem>>, %arg13: memref<16x64xf32, #tpu.memory_space<vmem>>, %arg14: memref<16x160xbf16, #tpu.memory_space<vmem>>) attributes {dimension_semantics = [#tpu.dimension_semantics<parallel>], iteration_bounds = array<i64: 2>, scalar_prefetch = 0 : i64, scratch_operands = 1 : i64, tpu.core_type = #tpu.core_type<tc>, window_params = [{transform_indices = @transform_0, window_bounds = array<i64: 16, 256>}, {transform_indices = @transform_1, window_bounds = array<i64: 16, 128>}, {transform_indices = @transform_2, window_bounds = array<i64: 16, 256>}, {pipeline_mode = #tpu.pipeline_mode<synchronous>, transform_indices = @transform_3, window_bounds = array<i64: 256, 256>}, {pipeline_mode = #tpu.pipeline_mode<synchronous>, transform_indices = @transform_4, window_bounds = array<i64: 1, 256>}, {pipeline_mode = #tpu.pipeline_mode<synchronous>, transform_indices = @transform_5, window_bounds = array<i64: 256, 512>}, {pipeline_mode = #tpu.pipeline_mode<synchronous>, transform_indices = @transform_6, window_bounds = array<i64: 1, 512>}, {pipeline_mode = #tpu.pipeline_mode<synchronous>, transform_indices = @transform_7, window_bounds = array<i64: 160, 1024>}, {pipeline_mode = #tpu.pipeline_mode<synchronous>, transform_indices = @transform_8, window_bounds = array<i64: 1, 1024>}, {pipeline_mode = #tpu.pipeline_mode<synchronous>, transform_indices = @transform_9, window_bounds = array<i64: 1024, 16>}, {pipeline_mode = #tpu.pipeline_mode<synchronous>, transform_indices = @transform_10, window_bounds = array<i64: 64, 16>}, {pipeline_mode = #tpu.pipeline_mode<synchronous>, transform_indices = @transform_11, window_bounds = array<i64: 1, 16>}, {transform_indices = @transform_12, window_bounds = array<i64: 16, 64>}]} {
    %c0 = arith.constant 0 : index
    %c0_0 = arith.constant 0 : index
    %0 = vector.load %arg1[%c0, %c0_0] : memref<16x256xbf16, #tpu.memory_space<vmem>>, vector<16x256xbf16>
    %c0_1 = arith.constant 0 : index
    %c0_2 = arith.constant 0 : index
    %1 = vector.load %arg4[%c0_1, %c0_2] : memref<256x256xbf16, #tpu.memory_space<vmem>>, vector<256x256xbf16>
    %cst = arith.constant dense<0.000000e+00> : vector<16x256xf32>
    %2 = tpu.matmul %0, %1, %cst {dimension_numbers = #tpu.dot_dimension_numbers<[1], [0], [0], [1], [0, 0, 1, 1], [], []>} : vector<16x256xbf16>, vector<256x256xbf16>, vector<16x256xf32> -> vector<16x256xf32>
    %c0_3 = arith.constant 0 : index
    %c0_4 = arith.constant 0 : index
    %3 = vector.load %arg5[%c0_3, %c0_4] : memref<1x256xf32, #tpu.memory_space<vmem>>, vector<1x256xf32>
    %4 = vector.broadcast %3 : vector<1x256xf32> to vector<16x256xf32>
    %5 = arith.addf %2, %4 : vector<16x256xf32>
    %6 = arith.truncf %5 : vector<16x256xf32> to vector<16x256xbf16>
    %c0_5 = arith.constant 0 : index
    %c0_6 = arith.constant 0 : index
    %7 = vector.load %arg6[%c0_5, %c0_6] : memref<256x512xbf16, #tpu.memory_space<vmem>>, vector<256x512xbf16>
    %cst_7 = arith.constant dense<0.000000e+00> : vector<16x512xf32>
    %8 = tpu.matmul %6, %7, %cst_7 {dimension_numbers = #tpu.dot_dimension_numbers<[1], [0], [0], [1], [0, 0, 1, 1], [], []>} : vector<16x256xbf16>, vector<256x512xbf16>, vector<16x512xf32> -> vector<16x512xf32>
    %c0_8 = arith.constant 0 : index
    %c0_9 = arith.constant 0 : index
    %9 = vector.load %arg7[%c0_8, %c0_9] : memref<1x512xf32, #tpu.memory_space<vmem>>, vector<1x512xf32>
    %10 = vector.broadcast %9 : vector<1x512xf32> to vector<16x512xf32>
    %11 = arith.addf %8, %10 : vector<16x512xf32>
    %12 = arith.truncf %11 : vector<16x512xf32> to vector<16x512xbf16>
    %13 = vector.extract_strided_slice %12 {offsets = [0, 0], sizes = [16, 128], strides = [1, 1]} : vector<16x512xbf16> to vector<16x128xbf16>
    %c0_10 = arith.constant 0 : index
    %c0_11 = arith.constant 0 : index
    %14 = vector.load %arg14[%c0_10, %c0_11] : memref<16x160xbf16, #tpu.memory_space<vmem>>, vector<16x128xbf16>
    tpu.vector_store %arg14[%c0_10, %c0_11], %13 {strides = array<i32>} : memref<16x160xbf16, #tpu.memory_space<vmem>>, vector<16x128xbf16>,
    %c0_12 = arith.constant 0 : index
    %c0_13 = arith.constant 0 : index
    %15 = vector.load %arg2[%c0_12, %c0_13] : memref<16x128xbf16, #tpu.memory_space<vmem>>, vector<16x32xbf16>
    %c0_14 = arith.constant 0 : index
    %c128 = arith.constant 128 : index
    %16 = vector.load %arg14[%c0_14, %c128] : memref<16x160xbf16, #tpu.memory_space<vmem>>, vector<16x32xbf16>
    tpu.vector_store %arg14[%c0_14, %c128], %15 {strides = array<i32>} : memref<16x160xbf16, #tpu.memory_space<vmem>>, vector<16x32xbf16>,
    %c0_15 = arith.constant 0 : index
    %c0_16 = arith.constant 0 : index
    %17 = vector.load %arg14[%c0_15, %c0_16] : memref<16x160xbf16, #tpu.memory_space<vmem>>, vector<16x160xbf16>
    %c0_17 = arith.constant 0 : index
    %c0_18 = arith.constant 0 : index
    %18 = vector.load %arg8[%c0_17, %c0_18] : memref<160x1024xbf16, #tpu.memory_space<vmem>>, vector<160x1024xbf16>
    %cst_19 = arith.constant dense<0.000000e+00> : vector<16x1024xf32>
    %19 = tpu.matmul %17, %18, %cst_19 {dimension_numbers = #tpu.dot_dimension_numbers<[1], [0], [0], [1], [0, 0, 1, 1], [], []>} : vector<16x160xbf16>, vector<160x1024xbf16>, vector<16x1024xf32> -> vector<16x1024xf32>
    %c0_20 = arith.constant 0 : index
    %c0_21 = arith.constant 0 : index
    %20 = vector.load %arg9[%c0_20, %c0_21] : memref<1x1024xf32, #tpu.memory_space<vmem>>, vector<1x1024xf32>
    %21 = vector.broadcast %20 : vector<1x1024xf32> to vector<16x1024xf32>
    %22 = arith.addf %19, %21 : vector<16x1024xf32>
    %23 = arith.truncf %22 : vector<16x1024xf32> to vector<16x1024xbf16>
    %c0_22 = arith.constant 0 : index
    %c0_23 = arith.constant 0 : index
    %24 = vector.load %arg3[%c0_22, %c0_23] : memref<16x256xbf16, #tpu.memory_space<vmem>>, vector<16x64xbf16>
    %c0_24 = arith.constant 0 : index
    %c0_25 = arith.constant 0 : index
    %25 = vector.load %arg10[%c0_24, %c0_25] : memref<1024x16xbf16, #tpu.memory_space<vmem>>, vector<1024x16xbf16>
    %cst_26 = arith.constant dense<0.000000e+00> : vector<16x16xf32>
    %26 = tpu.matmul %23, %25, %cst_26 {dimension_numbers = #tpu.dot_dimension_numbers<[1], [0], [0], [1], [0, 0, 1, 1], [], []>} : vector<16x1024xbf16>, vector<1024x16xbf16>, vector<16x16xf32> -> vector<16x16xf32>
    %c0_27 = arith.constant 0 : index
    %c0_28 = arith.constant 0 : index
    %27 = vector.load %arg11[%c0_27, %c0_28] : memref<64x16xbf16, #tpu.memory_space<vmem>>, vector<64x16xbf16>
    %cst_29 = arith.constant dense<0.000000e+00> : vector<16x16xf32>
    %28 = tpu.matmul %24, %27, %cst_29 {dimension_numbers = #tpu.dot_dimension_numbers<[1], [0], [0], [1], [0, 0, 1, 1], [], []>} : vector<16x64xbf16>, vector<64x16xbf16>, vector<16x16xf32> -> vector<16x16xf32>
    %29 = arith.addf %26, %28 : vector<16x16xf32>
    %c0_30 = arith.constant 0 : index
    %c0_31 = arith.constant 0 : index
    %30 = vector.load %arg12[%c0_30, %c0_31] : memref<1x16xf32, #tpu.memory_space<vmem>>, vector<1x16xf32>
    %31 = vector.broadcast %30 : vector<1x16xf32> to vector<16x16xf32>
    %32 = arith.addf %29, %31 : vector<16x16xf32>
    %c0_32 = arith.constant 0 : index
    %c0_33 = arith.constant 0 : index
    %33 = vector.load %arg13[%c0_32, %c0_33] : memref<16x64xf32, #tpu.memory_space<vmem>>, vector<16x16xf32>
    tpu.vector_store %arg13[%c0_32, %c0_33], %32 {strides = array<i32>} : memref<16x64xf32, #tpu.memory_space<vmem>>, vector<16x16xf32>,
    %34 = vector.extract_strided_slice %12 {offsets = [0, 128], sizes = [16, 128], strides = [1, 1]} : vector<16x512xbf16> to vector<16x128xbf16>
    %c0_34 = arith.constant 0 : index
    %c0_35 = arith.constant 0 : index
    %35 = vector.load %arg14[%c0_34, %c0_35] : memref<16x160xbf16, #tpu.memory_space<vmem>>, vector<16x128xbf16>
    tpu.vector_store %arg14[%c0_34, %c0_35], %34 {strides = array<i32>} : memref<16x160xbf16, #tpu.memory_space<vmem>>, vector<16x128xbf16>,
    %c0_36 = arith.constant 0 : index
    %c32 = arith.constant 32 : index
    %36 = vector.load %arg2[%c0_36, %c32] : memref<16x128xbf16, #tpu.memory_space<vmem>>, vector<16x32xbf16>
    %c0_37 = arith.constant 0 : index
    %c128_38 = arith.constant 128 : index
    %37 = vector.load %arg14[%c0_37, %c128_38] : memref<16x160xbf16, #tpu.memory_space<vmem>>, vector<16x32xbf16>
    tpu.vector_store %arg14[%c0_37, %c128_38], %36 {strides = array<i32>} : memref<16x160xbf16, #tpu.memory_space<vmem>>, vector<16x32xbf16>,
    %c0_39 = arith.constant 0 : index
    %c0_40 = arith.constant 0 : index
    %38 = vector.load %arg14[%c0_39, %c0_40] : memref<16x160xbf16, #tpu.memory_space<vmem>>, vector<16x160xbf16>
    %c0_41 = arith.constant 0 : index
    %c0_42 = arith.constant 0 : index
    %39 = vector.load %arg8[%c0_41, %c0_42] : memref<160x1024xbf16, #tpu.memory_space<vmem>>, vector<160x1024xbf16>
    %cst_43 = arith.constant dense<0.000000e+00> : vector<16x1024xf32>
    %40 = tpu.matmul %38, %39, %cst_43 {dimension_numbers = #tpu.dot_dimension_numbers<[1], [0], [0], [1], [0, 0, 1, 1], [], []>} : vector<16x160xbf16>, vector<160x1024xbf16>, vector<16x1024xf32> -> vector<16x1024xf32>
    %c0_44 = arith.constant 0 : index
    %c0_45 = arith.constant 0 : index
    %41 = vector.load %arg9[%c0_44, %c0_45] : memref<1x1024xf32, #tpu.memory_space<vmem>>, vector<1x1024xf32>
    %42 = vector.broadcast %41 : vector<1x1024xf32> to vector<16x1024xf32>
    %43 = arith.addf %40, %42 : vector<16x1024xf32>
    %44 = arith.truncf %43 : vector<16x1024xf32> to vector<16x1024xbf16>
    %c0_46 = arith.constant 0 : index
    %c64 = arith.constant 64 : index
    %45 = vector.load %arg3[%c0_46, %c64] : memref<16x256xbf16, #tpu.memory_space<vmem>>, vector<16x64xbf16>
    %c0_47 = arith.constant 0 : index
    %c0_48 = arith.constant 0 : index
    %46 = vector.load %arg10[%c0_47, %c0_48] : memref<1024x16xbf16, #tpu.memory_space<vmem>>, vector<1024x16xbf16>
    %cst_49 = arith.constant dense<0.000000e+00> : vector<16x16xf32>
    %47 = tpu.matmul %44, %46, %cst_49 {dimension_numbers = #tpu.dot_dimension_numbers<[1], [0], [0], [1], [0, 0, 1, 1], [], []>} : vector<16x1024xbf16>, vector<1024x16xbf16>, vector<16x16xf32> -> vector<16x16xf32>
    %c0_50 = arith.constant 0 : index
    %c0_51 = arith.constant 0 : index
    %48 = vector.load %arg11[%c0_50, %c0_51] : memref<64x16xbf16, #tpu.memory_space<vmem>>, vector<64x16xbf16>
    %cst_52 = arith.constant dense<0.000000e+00> : vector<16x16xf32>
    %49 = tpu.matmul %45, %48, %cst_52 {dimension_numbers = #tpu.dot_dimension_numbers<[1], [0], [0], [1], [0, 0, 1, 1], [], []>} : vector<16x64xbf16>, vector<64x16xbf16>, vector<16x16xf32> -> vector<16x16xf32>
    %50 = arith.addf %47, %49 : vector<16x16xf32>
    %c0_53 = arith.constant 0 : index
    %c0_54 = arith.constant 0 : index
    %51 = vector.load %arg12[%c0_53, %c0_54] : memref<1x16xf32, #tpu.memory_space<vmem>>, vector<1x16xf32>
    %52 = vector.broadcast %51 : vector<1x16xf32> to vector<16x16xf32>
    %53 = arith.addf %50, %52 : vector<16x16xf32>
    %c0_55 = arith.constant 0 : index
    %c16 = arith.constant 16 : index
    %54 = vector.load %arg13[%c0_55, %c16] : memref<16x64xf32, #tpu.memory_space<vmem>>, vector<16x16xf32>
    tpu.vector_store %arg13[%c0_55, %c16], %53 {strides = array<i32>} : memref<16x64xf32, #tpu.memory_space<vmem>>, vector<16x16xf32>,
    %55 = vector.extract_strided_slice %12 {offsets = [0, 256], sizes = [16, 128], strides = [1, 1]} : vector<16x512xbf16> to vector<16x128xbf16>
    %c0_56 = arith.constant 0 : index
    %c0_57 = arith.constant 0 : index
    %56 = vector.load %arg14[%c0_56, %c0_57] : memref<16x160xbf16, #tpu.memory_space<vmem>>, vector<16x128xbf16>
    tpu.vector_store %arg14[%c0_56, %c0_57], %55 {strides = array<i32>} : memref<16x160xbf16, #tpu.memory_space<vmem>>, vector<16x128xbf16>,
    %c0_58 = arith.constant 0 : index
    %c64_59 = arith.constant 64 : index
    %57 = vector.load %arg2[%c0_58, %c64_59] : memref<16x128xbf16, #tpu.memory_space<vmem>>, vector<16x32xbf16>
    %c0_60 = arith.constant 0 : index
    %c128_61 = arith.constant 128 : index
    %58 = vector.load %arg14[%c0_60, %c128_61] : memref<16x160xbf16, #tpu.memory_space<vmem>>, vector<16x32xbf16>
    tpu.vector_store %arg14[%c0_60, %c128_61], %57 {strides = array<i32>} : memref<16x160xbf16, #tpu.memory_space<vmem>>, vector<16x32xbf16>,
    %c0_62 = arith.constant 0 : index
    %c0_63 = arith.constant 0 : index
    %59 = vector.load %arg14[%c0_62, %c0_63] : memref<16x160xbf16, #tpu.memory_space<vmem>>, vector<16x160xbf16>
    %c0_64 = arith.constant 0 : index
    %c0_65 = arith.constant 0 : index
    %60 = vector.load %arg8[%c0_64, %c0_65] : memref<160x1024xbf16, #tpu.memory_space<vmem>>, vector<160x1024xbf16>
    %cst_66 = arith.constant dense<0.000000e+00> : vector<16x1024xf32>
    %61 = tpu.matmul %59, %60, %cst_66 {dimension_numbers = #tpu.dot_dimension_numbers<[1], [0], [0], [1], [0, 0, 1, 1], [], []>} : vector<16x160xbf16>, vector<160x1024xbf16>, vector<16x1024xf32> -> vector<16x1024xf32>
    %c0_67 = arith.constant 0 : index
    %c0_68 = arith.constant 0 : index
    %62 = vector.load %arg9[%c0_67, %c0_68] : memref<1x1024xf32, #tpu.memory_space<vmem>>, vector<1x1024xf32>
    %63 = vector.broadcast %62 : vector<1x1024xf32> to vector<16x1024xf32>
    %64 = arith.addf %61, %63 : vector<16x1024xf32>
    %65 = arith.truncf %64 : vector<16x1024xf32> to vector<16x1024xbf16>
    %c0_69 = arith.constant 0 : index
    %c128_70 = arith.constant 128 : index
    %66 = vector.load %arg3[%c0_69, %c128_70] : memref<16x256xbf16, #tpu.memory_space<vmem>>, vector<16x64xbf16>
    %c0_71 = arith.constant 0 : index
    %c0_72 = arith.constant 0 : index
    %67 = vector.load %arg10[%c0_71, %c0_72] : memref<1024x16xbf16, #tpu.memory_space<vmem>>, vector<1024x16xbf16>
    %cst_73 = arith.constant dense<0.000000e+00> : vector<16x16xf32>
    %68 = tpu.matmul %65, %67, %cst_73 {dimension_numbers = #tpu.dot_dimension_numbers<[1], [0], [0], [1], [0, 0, 1, 1], [], []>} : vector<16x1024xbf16>, vector<1024x16xbf16>, vector<16x16xf32> -> vector<16x16xf32>
    %c0_74 = arith.constant 0 : index
    %c0_75 = arith.constant 0 : index
    %69 = vector.load %arg11[%c0_74, %c0_75] : memref<64x16xbf16, #tpu.memory_space<vmem>>, vector<64x16xbf16>
    %cst_76 = arith.constant dense<0.000000e+00> : vector<16x16xf32>
    %70 = tpu.matmul %66, %69, %cst_76 {dimension_numbers = #tpu.dot_dimension_numbers<[1], [0], [0], [1], [0, 0, 1, 1], [], []>} : vector<16x64xbf16>, vector<64x16xbf16>, vector<16x16xf32> -> vector<16x16xf32>
    %71 = arith.addf %68, %70 : vector<16x16xf32>
    %c0_77 = arith.constant 0 : index
    %c0_78 = arith.constant 0 : index
    %72 = vector.load %arg12[%c0_77, %c0_78] : memref<1x16xf32, #tpu.memory_space<vmem>>, vector<1x16xf32>
    %73 = vector.broadcast %72 : vector<1x16xf32> to vector<16x16xf32>
    %74 = arith.addf %71, %73 : vector<16x16xf32>
    %c0_79 = arith.constant 0 : index
    %c32_80 = arith.constant 32 : index
    %75 = vector.load %arg13[%c0_79, %c32_80] : memref<16x64xf32, #tpu.memory_space<vmem>>, vector<16x16xf32>
    tpu.vector_store %arg13[%c0_79, %c32_80], %74 {strides = array<i32>} : memref<16x64xf32, #tpu.memory_space<vmem>>, vector<16x16xf32>,
    %76 = vector.extract_strided_slice %12 {offsets = [0, 384], sizes = [16, 128], strides = [1, 1]} : vector<16x512xbf16> to vector<16x128xbf16>
    %c0_81 = arith.constant 0 : index
    %c0_82 = arith.constant 0 : index
    %77 = vector.load %arg14[%c0_81, %c0_82] : memref<16x160xbf16, #tpu.memory_space<vmem>>, vector<16x128xbf16>
    tpu.vector_store %arg14[%c0_81, %c0_82], %76 {strides = array<i32>} : memref<16x160xbf16, #tpu.memory_space<vmem>>, vector<16x128xbf16>,
    %c0_83 = arith.constant 0 : index
    %c96 = arith.constant 96 : index
    %78 = vector.load %arg2[%c0_83, %c96] : memref<16x128xbf16, #tpu.memory_space<vmem>>, vector<16x32xbf16>
    %c0_84 = arith.constant 0 : index
    %c128_85 = arith.constant 128 : index
    %79 = vector.load %arg14[%c0_84, %c128_85] : memref<16x160xbf16, #tpu.memory_space<vmem>>, vector<16x32xbf16>
    tpu.vector_store %arg14[%c0_84, %c128_85], %78 {strides = array<i32>} : memref<16x160xbf16, #tpu.memory_space<vmem>>, vector<16x32xbf16>,
    %c0_86 = arith.constant 0 : index
    %c0_87 = arith.constant 0 : index
    %80 = vector.load %arg14[%c0_86, %c0_87] : memref<16x160xbf16, #tpu.memory_space<vmem>>, vector<16x160xbf16>
    %c0_88 = arith.constant 0 : index
    %c0_89 = arith.constant 0 : index
    %81 = vector.load %arg8[%c0_88, %c0_89] : memref<160x1024xbf16, #tpu.memory_space<vmem>>, vector<160x1024xbf16>
    %cst_90 = arith.constant dense<0.000000e+00> : vector<16x1024xf32>
    %82 = tpu.matmul %80, %81, %cst_90 {dimension_numbers = #tpu.dot_dimension_numbers<[1], [0], [0], [1], [0, 0, 1, 1], [], []>} : vector<16x160xbf16>, vector<160x1024xbf16>, vector<16x1024xf32> -> vector<16x1024xf32>
    %c0_91 = arith.constant 0 : index
    %c0_92 = arith.constant 0 : index
    %83 = vector.load %arg9[%c0_91, %c0_92] : memref<1x1024xf32, #tpu.memory_space<vmem>>, vector<1x1024xf32>
    %84 = vector.broadcast %83 : vector<1x1024xf32> to vector<16x1024xf32>
    %85 = arith.addf %82, %84 : vector<16x1024xf32>
    %86 = arith.truncf %85 : vector<16x1024xf32> to vector<16x1024xbf16>
    %c0_93 = arith.constant 0 : index
    %c192 = arith.constant 192 : index
    %87 = vector.load %arg3[%c0_93, %c192] : memref<16x256xbf16, #tpu.memory_space<vmem>>, vector<16x64xbf16>
    %c0_94 = arith.constant 0 : index
    %c0_95 = arith.constant 0 : index
    %88 = vector.load %arg10[%c0_94, %c0_95] : memref<1024x16xbf16, #tpu.memory_space<vmem>>, vector<1024x16xbf16>
    %cst_96 = arith.constant dense<0.000000e+00> : vector<16x16xf32>
    %89 = tpu.matmul %86, %88, %cst_96 {dimension_numbers = #tpu.dot_dimension_numbers<[1], [0], [0], [1], [0, 0, 1, 1], [], []>} : vector<16x1024xbf16>, vector<1024x16xbf16>, vector<16x16xf32> -> vector<16x16xf32>
    %c0_97 = arith.constant 0 : index
    %c0_98 = arith.constant 0 : index
    %90 = vector.load %arg11[%c0_97, %c0_98] : memref<64x16xbf16, #tpu.memory_space<vmem>>, vector<64x16xbf16>
    %cst_99 = arith.constant dense<0.000000e+00> : vector<16x16xf32>
    %91 = tpu.matmul %87, %90, %cst_99 {dimension_numbers = #tpu.dot_dimension_numbers<[1], [0], [0], [1], [0, 0, 1, 1], [], []>} : vector<16x64xbf16>, vector<64x16xbf16>, vector<16x16xf32> -> vector<16x16xf32>
    %92 = arith.addf %89, %91 : vector<16x16xf32>
    %c0_100 = arith.constant 0 : index
    %c0_101 = arith.constant 0 : index
    %93 = vector.load %arg12[%c0_100, %c0_101] : memref<1x16xf32, #tpu.memory_space<vmem>>, vector<1x16xf32>
    %94 = vector.broadcast %93 : vector<1x16xf32> to vector<16x16xf32>
    %95 = arith.addf %92, %94 : vector<16x16xf32>
    %c0_102 = arith.constant 0 : index
    %c48 = arith.constant 48 : index
    %96 = vector.load %arg13[%c0_102, %c48] : memref<16x64xf32, #tpu.memory_space<vmem>>, vector<16x16xf32>
    tpu.vector_store %arg13[%c0_102, %c48], %95 {strides = array<i32>} : memref<16x64xf32, #tpu.memory_space<vmem>>, vector<16x16xf32>,
    return
  }
  func.func @transform_0(%arg0: i32) -> (i32, i32) {
    %c0_i32 = arith.constant 0 : i32
    %c0_i32_0 = arith.constant 0 : i32
    return %arg0, %c0_i32 : i32, i32
  }
  func.func @transform_1(%arg0: i32) -> (i32, i32) {
    %c0_i32 = arith.constant 0 : i32
    %c0_i32_0 = arith.constant 0 : i32
    return %arg0, %c0_i32 : i32, i32
  }
  func.func @transform_2(%arg0: i32) -> (i32, i32) {
    %c0_i32 = arith.constant 0 : i32
    %c0_i32_0 = arith.constant 0 : i32
    return %arg0, %c0_i32 : i32, i32
  }
  func.func @transform_3(%arg0: i32) -> (i32, i32) {
    %c0_i32 = arith.constant 0 : i32
    %c0_i32_0 = arith.constant 0 : i32
    %c0_i32_1 = arith.constant 0 : i32
    return %c0_i32, %c0_i32_0 : i32, i32
  }
  func.func @transform_4(%arg0: i32) -> (i32, i32) {
    %c0_i32 = arith.constant 0 : i32
    %c0_i32_0 = arith.constant 0 : i32
    %c0_i32_1 = arith.constant 0 : i32
    return %c0_i32, %c0_i32_0 : i32, i32
  }
  func.func @transform_5(%arg0: i32) -> (i32, i32) {
    %c0_i32 = arith.constant 0 : i32
    %c0_i32_0 = arith.constant 0 : i32
    %c0_i32_1 = arith.constant 0 : i32
    return %c0_i32, %c0_i32_0 : i32, i32
  }
  func.func @transform_6(%arg0: i32) -> (i32, i32) {
    %c0_i32 = arith.constant 0 : i32
    %c0_i32_0 = arith.constant 0 : i32
    %c0_i32_1 = arith.constant 0 : i32
    return %c0_i32, %c0_i32_0 : i32, i32
  }
  func.func @transform_7(%arg0: i32) -> (i32, i32) {
    %c0_i32 = arith.constant 0 : i32
    %c0_i32_0 = arith.constant 0 : i32
    %c0_i32_1 = arith.constant 0 : i32
    return %c0_i32, %c0_i32_0 : i32, i32
  }
  func.func @transform_8(%arg0: i32) -> (i32, i32) {
    %c0_i32 = arith.constant 0 : i32
    %c0_i32_0 = arith.constant 0 : i32
    %c0_i32_1 = arith.constant 0 : i32
    return %c0_i32, %c0_i32_0 : i32, i32
  }
  func.func @transform_9(%arg0: i32) -> (i32, i32) {
    %c0_i32 = arith.constant 0 : i32
    %c0_i32_0 = arith.constant 0 : i32
    %c0_i32_1 = arith.constant 0 : i32
    return %c0_i32, %c0_i32_0 : i32, i32
  }
  func.func @transform_10(%arg0: i32) -> (i32, i32) {
    %c0_i32 = arith.constant 0 : i32
    %c0_i32_0 = arith.constant 0 : i32
    %c0_i32_1 = arith.constant 0 : i32
    return %c0_i32, %c0_i32_0 : i32, i32
  }
  func.func @transform_11(%arg0: i32) -> (i32, i32) {
    %c0_i32 = arith.constant 0 : i32
    %c0_i32_0 = arith.constant 0 : i32
    %c0_i32_1 = arith.constant 0 : i32
    return %c0_i32, %c0_i32_0 : i32, i32
  }
  func.func @transform_12(%arg0: i32) -> (i32, i32) {
    %c0_i32 = arith.constant 0 : i32
    %c0_i32_0 = arith.constant 0 : i32
    return %arg0, %c0_i32 : i32, i32
  }
}

</mosaic_0001>

<bundles_post_ra>
// kernel: table_decoder_forward.1
= control target key start
LH: loop header
LB: loop body
LE: loop exit
PB: predicated region body
PF: predicated region fallthrough
CT: control target
= control target key end

     0   :  { %s10809_s21 = smov 0   ;;  %s14464_s0 = inlined_call_operand.vmem [shape: bf16[32,256], index: 0, kind: input, shape index: {}]   ;;  %s14465_s1 = inlined_call_operand.vmem [shape: bf16[32,128], index: 1, kind: input, shape index: {}]   ;;  %s14466_s2 = inlined_call_operand.vmem [shape: bf16[32,256], index: 2, kind: input, shape index: {}]   ;;  %s14467_s3 = inlined_call_operand.vmem [shape: bf16[256,256], index: 3, kind: input, shape index: {}]   ;;  %s14468_s4 = inlined_call_operand.vmem [shape: f32[1,256], index: 4, kind: input, shape index: {}]   ;;  %s14469_s5 = inlined_call_operand.vmem [shape: bf16[256,512], index: 5, kind: input, shape index: {}]   ;;  %s14470_s6 = inlined_call_operand.vmem [shape: f32[1,512], index: 6, kind: input, shape index: {}]   ;;  %s14471_s7 = inlined_call_operand.vmem [shape: bf16[160,1024], index: 7, kind: input, shape index: {}]   ;;  %s14472_s8 = inlined_call_operand.vmem [shape: f32[1,1024], index: 8, kind: input, shape index: {}]   ;;  %s14473_s9 = inlined_call_operand.vmem [shape: bf16[1024,16], index: 9, kind: input, shape index: {}]   ;;  %s14474_s10 = inlined_call_operand.vmem [shape: bf16[64,16], index: 10, kind: input, shape index: {}]   ;;  %s14475_s11 = inlined_call_operand.vmem [shape: f32[1,16], index: 11, kind: input, shape index: {}]   ;;  %s14476_s12 = inlined_call_operand.vmem [shape: f32[32,64], index: 12, kind: output, shape index: {}]  }
   0x1 LB: > { %s7149_s22 = sadd.s32 4294967295, %s10737_s21   ;;  %p7153_p0 = scmp.ge.s32.totalorder %s10737_s21, 1  ;;  %s10737_s21 = sphi %s10809_s21, %s22_s21  }
   0x2   : > { %p387_p1 = scmp.lt.s32.totalorder %s10737_s21, 3 }
   0x4   : > { %p388_p2 = pnand %p7153_p0, %p387_p1 }
   0x5   : > { %s7154_s23 = sshll.u32 (!%p388_p2), %s7149_s22, 1  ;;  %s10739_s19 = smov (!%p388_p2), 96  }
   0x6   : > { %391 = sbr.rel (%p388_p2) target bundleno = 1418 (0x58a), region = 68  ;;  %p442_p3 = scmp.lt.s32.totalorder (!%p388_p2), %s7154_s23, 3 }
   0x7   : > { %s10741_s30 = smov (!%p388_p2), 32   ;;  %s10742_s14 = smov (!%p388_p2), 16  }
   0x8   : > { %s10743_s28 = smov (!%p388_p2), 48  }
   0xb   : > { %v7230_v0 = vld [vmem:[%s14467_s3 + $0x70] sm:$0xf]  ;;  %v10029_v1 = vld [vmem:[%s14467_s3 + $0x74] sm:$0xf0]  ;;  %v10028_v5 = vld [vmem:[%s14467_s3 + $0x74] sm:$0xf] }
   0xc   : > { %v7294_v2 = vld [vmem:[%s14467_s3 + $0xf0] sm:$0xf]  ;;  %v7231_v3 = vor.u32 %v10029_v1, %v7230_v0  ;;  %v10045_v4 = vld [vmem:[%s14467_s3 + $0xf4] sm:$0xf0]  ;;  %v7232_v6 = vld [vmem:[%s14467_s3 + $0x78] sm:$0xf0] }
   0xd   : > { %v7295_v7 = vor.u32 %v10045_v4, %v7294_v2  ;;  %v7235_v8 = vor.u32 %v10028_v5, %v7232_v6  ;;  %v10044_v9 = vld [vmem:[%s14467_s3 + $0xf4] sm:$0xf]  ;;  %v7296_v10 = vld [vmem:[%s14467_s3 + $0xf8] sm:$0xf0]  ;;  %v7222_v11 = vld [vmem:[%s14467_s3 + $0x60] sm:$0xf] }
   0xe   : > { %678 = vmatpush.bf16.msra.mxu0 %v7231_v3  ;;  %v7299_v12 = vor.u32 %v10044_v9, %v7296_v10  ;;  %v10027_v13 = vld [vmem:[%s14467_s3 + $0x64] sm:$0xf0]  ;;  %v7286_v14 = vld [vmem:[%s14467_s3 + $0xe0] sm:$0xf]  ;;  %v10026_v18 = vld [vmem:[%s14467_s3 + $0x64] sm:$0xf] }
   0xf   : > { %v10043_v15 = vld [vmem:[%s14467_s3 + $0xe4] sm:$0xf0]  ;;  %692 = vmatpush.bf16.msra.mxu1 %v7295_v7  ;;  %706 = vmatpush.bf16.msra.mxu2 %v7235_v8  ;;  %v7223_v16 = vor.u32 %v10027_v13, %v7222_v11  ;;  %v7224_v19 = vld [vmem:[%s14467_s3 + $0x68] sm:$0xf0]  ;;  %v10042_v20 = vld [vmem:[%s14467_s3 + $0xe4] sm:$0xf] }
  0x10   : > { %v7287_v17 = vor.u32 %v10043_v15, %v7286_v14  ;;  %720 = vmatpush.bf16.msra.mxu3 %v7299_v12  ;;  %v7227_v21 = vor.u32 %v10026_v18, %v7224_v19  ;;  %v7288_v22 = vld [vmem:[%s14467_s3 + $0xe8] sm:$0xf0]  ;;  %v7214_v23 = vld [vmem:[%s14467_s3 + $0x50] sm:$0xf]  ;;  %v10025_v24 = vld [vmem:[%s14467_s3 + $0x54] sm:$0xf0] }
  0x11   : > { %v7291_v25 = vor.u32 %v10042_v20, %v7288_v22  ;;  %v7278_v26 = vld [vmem:[%s14467_s3 + $0xd0] sm:$0xf]  ;;  %v10041_v27 = vld [vmem:[%s14467_s3 + $0xd4] sm:$0xf0]  ;;  %v10024_v28 = vld [vmem:[%s14467_s3 + $0x54] sm:$0xf]  ;;  %v7215_v29 = vor.u32 %v10025_v24, %v7214_v23 }
  0x12   : > { %679 = vmatpush.bf16.msra.mxu0 %v7223_v16  ;;  %v7216_v30 = vld [vmem:[%s14467_s3 + $0x58] sm:$0xf0]  ;;  %v10040_v31 = vld [vmem:[%s14467_s3 + $0xd4] sm:$0xf]  ;;  %v7279_v33 = vor.u32 %v10041_v27, %v7278_v26  ;;  %v7206_v35 = vld [vmem:[%s14467_s3 + $0x40] sm:$0xf] }
  0x13   : > { %v7280_v32 = vld [vmem:[%s14467_s3 + $0xd8] sm:$0xf0]  ;;  %693 = vmatpush.bf16.msra.mxu1 %v7287_v17  ;;  %707 = vmatpush.bf16.msra.mxu2 %v7227_v21  ;;  %v7219_v34 = vor.u32 %v10024_v28, %v7216_v30  ;;  %v10023_v36 = vld [vmem:[%s14467_s3 + $0x44] sm:$0xf0]  ;;  %v7270_v37 = vld [vmem:[%s14467_s3 + $0xc0] sm:$0xf] }
  0x14   : > { %721 = vmatpush.bf16.msra.mxu3 %v7291_v25  ;;  %v7283_v38 = vor.u32 %v10040_v31, %v7280_v32  ;;  %v10039_v39 = vld [vmem:[%s14467_s3 + $0xc4] sm:$0xf0]  ;;  %v10022_v40 = vld [vmem:[%s14467_s3 + $0x44] sm:$0xf]  ;;  %v7208_v41 = vld [vmem:[%s14467_s3 + $0x48] sm:$0xf0]  ;;  %v7207_v44 = vor.u32 %v10023_v36, %v7206_v35 }
  0x15   : > { %v10038_v42 = vld [vmem:[%s14467_s3 + $0xc4] sm:$0xf]  ;;  %v7272_v43 = vld [vmem:[%s14467_s3 + $0xc8] sm:$0xf0]  ;;  %v7271_v45 = vor.u32 %v10039_v39, %v7270_v37  ;;  %v7211_v46 = vor.u32 %v10022_v40, %v7208_v41  ;;  %v7198_v47 = vld [vmem:[%s14467_s3 + $0x30] sm:$0xf] }
  0x16   : > { %680 = vmatpush.bf16.msra.mxu0 %v7215_v29  ;;  %v10021_v48 = vld [vmem:[%s14467_s3 + $0x34] sm:$0xf0]  ;;  %v7262_v49 = vld [vmem:[%s14467_s3 + $0xb0] sm:$0xf]  ;;  %v7275_v50 = vor.u32 %v10038_v42, %v7272_v43  ;;  %v10020_v52 = vld [vmem:[%s14467_s3 + $0x34] sm:$0xf] }
  0x17   : > { %694 = vmatpush.bf16.msra.mxu1 %v7279_v33  ;;  %708 = vmatpush.bf16.msra.mxu2 %v7219_v34  ;;  %v10037_v51 = vld [vmem:[%s14467_s3 + $0xb4] sm:$0xf0]  ;;  %v7200_v53 = vld [vmem:[%s14467_s3 + $0x38] sm:$0xf0]  ;;  %v10036_v54 = vld [vmem:[%s14467_s3 + $0xb4] sm:$0xf]  ;;  %v7199_v56 = vor.u32 %v10021_v48, %v7198_v47 }
  0x18   : > { %722 = vmatpush.bf16.msra.mxu3 %v7283_v38  ;;  %v7264_v55 = vld [vmem:[%s14467_s3 + $0xb8] sm:$0xf0]  ;;  %v7263_v57 = vor.u32 %v10037_v51, %v7262_v49  ;;  %v7203_v58 = vor.u32 %v10020_v52, %v7200_v53  ;;  %v7190_v59 = vld [vmem:[%s14467_s3 + $0x20] sm:$0xf]  ;;  %v10019_v60 = vld [vmem:[%s14467_s3 + $0x24] sm:$0xf0] }
  0x19   : > { %v7254_v61 = vld [vmem:[%s14467_s3 + $0xa0] sm:$0xf]  ;;  %v7267_v62 = vor.u32 %v10036_v54, %v7264_v55  ;;  %v10035_v63 = vld [vmem:[%s14467_s3 + $0xa4] sm:$0xf0]  ;;  %v10018_v0 = vld [vmem:[%s14467_s3 + $0x24] sm:$0xf]  ;;  %v7191_v4 = vor.u32 %v10019_v60, %v7190_v59 }
  0x1a   : > { %681 = vmatpush.bf16.msra.mxu0 %v7207_v44  ;;  %v7192_v1 = vld [vmem:[%s14467_s3 + $0x28] sm:$0xf0]  ;;  %v10034_v2 = vld [vmem:[%s14467_s3 + $0xa4] sm:$0xf]  ;;  %v7182_v5 = vld [vmem:[%s14467_s3 + $0x10] sm:$0xf]  ;;  %v7255_v8 = vor.u32 %v10035_v63, %v7254_v61 }
  0x1b   : > { %695 = vmatpush.bf16.msra.mxu1 %v7271_v45  ;;  %709 = vmatpush.bf16.msra.mxu2 %v7211_v46  ;;  %v7256_v3 = vld [vmem:[%s14467_s3 + $0xa8] sm:$0xf0]  ;;  %v10017_v6 = vld [vmem:[%s14467_s3 + $0x14] sm:$0xf0]  ;;  %v7246_v7 = vld [vmem:[%s14467_s3 + $0x90] sm:$0xf]  ;;  %v7195_v9 = vor.u32 %v10018_v0, %v7192_v1 }
  0x1c   : > { %723 = vmatpush.bf16.msra.mxu3 %v7275_v50  ;;  %v10033_v10 = vld [vmem:[%s14467_s3 + $0x94] sm:$0xf0]  ;;  %v10016_v11 = vld [vmem:[%s14467_s3 + $0x14] sm:$0xf]  ;;  %v7184_v12 = vld [vmem:[%s14467_s3 + $0x18] sm:$0xf0]  ;;  %v7259_v13 = vor.u32 %v10034_v2, %v7256_v3  ;;  %v7183_v18 = vor.u32 %v10017_v6, %v7182_v5 }
  0x1d   : > { %v10032_v14 = vld [vmem:[%s14467_s3 + $0x94] sm:$0xf]  ;;  %v7248_v15 = vld [vmem:[%s14467_s3 + $0x98] sm:$0xf0]  ;;  %v7174_v16 = vld [vmem:[%s14467_s3] sm:$0xf]  ;;  %v7247_v22 = vor.u32 %v10033_v10, %v7246_v7  ;;  %v7187_v23 = vor.u32 %v10016_v11, %v7184_v12 }
  0x1e   : > { %682 = vmatpush.bf16.msra.mxu0 %v7199_v56  ;;  %v10015_v17 = vld [vmem:[%s14467_s3 + $0x4] sm:$0xf0]  ;;  %v7238_v19 = vld [vmem:[%s14467_s3 + $0x80] sm:$0xf]  ;;  %v10014_v21 = vld [vmem:[%s14467_s3 + $0x4] sm:$0xf]  ;;  %v7251_v26 = vor.u32 %v10032_v14, %v7248_v15 }
  0x1f   : > { %696 = vmatpush.bf16.msra.mxu1 %v7263_v57  ;;  %710 = vmatpush.bf16.msra.mxu2 %v7203_v58  ;;  %v10031_v20 = vld [vmem:[%s14467_s3 + $0x84] sm:$0xf0]  ;;  %v7176_v24 = vld [vmem:[%s14467_s3 + $0x8] sm:$0xf0]  ;;  %v10030_v25 = vld [vmem:[%s14467_s3 + $0x84] sm:$0xf]  ;;  %v7175_v31 = vor.u32 %v10015_v17, %v7174_v16 }
  0x20   : > { %724 = vmatpush.bf16.msra.mxu3 %v7267_v62  ;;  %s14478_s23 = smov (!%p442_p3, %s7154_s23), 3  ;;  %v7240_v27 = vld [vmem:[%s14467_s3 + $0x88] sm:$0xf0]  ;;  %vm1250_vm0 = vcmask 257024   ;;  %v7414_v28 = vld [vmem:[%s14469_s5 + $0xe0] sm:$0xf]  ;;  %v7239_v35 = vor.u32 %v10031_v20, %v7238_v19  ;;  %v7179_v36 = vor.u32 %v10014_v21, %v7176_v24 }
  0x21   : > { %s11014_s26 = sshll.u32 %s14478_s23, 3  ;;  %s7158_s27 = sshll.u32 %s14478_s23, 2  ;;  %v10076_v29 = vld [vmem:[%s14469_s5 + $0xec] sm:$0xf0]  ;;  %v10074_v30 = vld [vmem:[%s14469_s5 + $0xe4] sm:$0xf]  ;;  %v7243_v43 = vor.u32 %v10030_v25, %v7240_v27 }
  0x22   : > { %683 = vmatpush.bf16.msra.mxu0 %v7191_v4  ;;  %s446_s15 = scalar_lea.vmem %s14464_s0, %s11014_s26  ;;  %s11029_s18 = scalar_lea.vmem %s14465_s1, %s7158_s27  ;;  %v7416_v32 = vld [vmem:[%s14469_s5 + $0xf0] sm:$0xf0]  ;;  %v7542_v33 = vld [vmem:[%s14469_s5 + $0x1e0] sm:$0xf]  ;;  %v10108_v34 = vld [vmem:[%s14469_s5 + $0x1ec] sm:$0xf0]  ;;  %v7415_v46 = vor.u32 %v10076_v29, %v7414_v28 }
  0x23   : > { %697 = vmatpush.bf16.msra.mxu1 %v7255_v8  ;;  %711 = vmatpush.bf16.msra.mxu2 %v7195_v9  ;;  %v7166_v37 = vld [vmem:[%s446_s15] sm:$0xf]  ;;  %v10013_v38 = vld [vmem:[%s446_s15 + $0x4] sm:$0xf0]  ;;  %v10072_v41 = vld [vmem:[%s14469_s5 + $0xcc] sm:$0xf0]  ;;  %v7419_v49 = vor.u32 %v10074_v30, %v7416_v32  ;;  %v7543_v54 = vor.u32 %v10108_v34, %v7542_v33  ;;  %s12008_s29 = scalar_lea.vmem %s14466_s2, %s11014_s26  ;;  %s12869_s24 = scalar_lea.vmem %s14476_s12, %s11014_s26 }
  0x24   : > { %725 = vmatpush.bf16.msra.mxu3 %v7259_v13  ;;  %v1248_v39 = vld [vmem:[%s11029_s18] sm:$0xf]  ;;  %v10106_v42 = vld [vmem:[%s14469_s5 + $0x1e4] sm:$0xf]  ;;  %v7167_v47 = vor.u32 %v10013_v38, %v7166_v37  ;;  %v7168_v48 = vld [vmem:[%s446_s15 + $0x8] sm:$0xf0] }
  0x25   : > { %v7398_v40 = vld [vmem:[%s14469_s5 + $0xc0] sm:$0xf]  ;;  %v1249_v44 = vld [vmem:[%s11029_s18 + $0x4] sm:$0xf]  ;;  %1251 = vst.msk [vmem:[#allocation2 + $0x4] sm:$0xf] %vm1250_vm0, %v1248_v39 }
  0x26   : > { %684 = vmatpush.bf16.msra.mxu0 %v7183_v18  ;;  %v10012_v45 = vld [vmem:[%s446_s15 + $0x4] sm:$0xf]  ;;  %1252 = vst.msk [vmem:[#allocation2 + $0xc] sm:$0xf] %vm1250_vm0, %v1249_v44  ;;  %v7544_v50 = vld [vmem:[%s14469_s5 + $0x1f0] sm:$0xf0]  ;;  %v7399_v55 = vor.u32 %v10072_v41, %v7398_v40 }
  0x27   : > { %698 = vmatpush.bf16.msra.mxu1 %v7247_v22  ;;  %712 = vmatpush.bf16.msra.mxu2 %v7187_v23  ;;  %v7171_v51 = vor.u32 %v10012_v45, %v7168_v48  ;;  %v10070_v52 = vld [vmem:[%s14469_s5 + $0xc4] sm:$0xf]  ;;  %v7400_v53 = vld [vmem:[%s14469_s5 + $0xd0] sm:$0xf0]  ;;  %v7547_v56 = vor.u32 %v10106_v42, %v7544_v50  ;;  %v7382_v57 = vld [vmem:[%s14469_s5 + $0xa0] sm:$0xf] }
  0x28   : > { %726 = vmatpush.bf16.msra.mxu3 %v7251_v26  ;;  %v7526_v58 = vld [vmem:[%s14469_s5 + $0x1c0] sm:$0xf]  ;;  %v10104_v59 = vld [vmem:[%s14469_s5 + $0x1cc] sm:$0xf0]  ;;  %v7403_v60 = vor.u32 %v10070_v52, %v7400_v53  ;;  %v10102_v62 = vld [vmem:[%s14469_s5 + $0x1c4] sm:$0xf] }
  0x29   : > { %v10068_v61 = vld [vmem:[%s14469_s5 + $0xac] sm:$0xf0]  ;;  %v7528_v63 = vld [vmem:[%s14469_s5 + $0x1d0] sm:$0xf0]  ;;  %v10066_v0 = vld [vmem:[%s14469_s5 + $0xa4] sm:$0xf]  ;;  %v7527_v2 = vor.u32 %v10104_v59, %v7526_v58 }
  0x2a   : > { %685 = vmatpush.bf16.msra.mxu0 %v7175_v31  ;;  %v7384_v1 = vld [vmem:[%s14469_s5 + $0xb0] sm:$0xf0]  ;;  %v7383_v3 = vor.u32 %v10068_v61, %v7382_v57  ;;  %v7531_v4 = vor.u32 %v10102_v62, %v7528_v63  ;;  %v7366_v5 = vld [vmem:[%s14469_s5 + $0x80] sm:$0xf]  ;;  %v10100_v7 = vld [vmem:[%s14469_s5 + $0x1ac] sm:$0xf0] }
  0x2b   : > { %699 = vmatpush.bf16.msra.mxu1 %v7239_v35  ;;  %713 = vmatpush.bf16.msra.mxu2 %v7179_v36  ;;  %v7510_v6 = vld [vmem:[%s14469_s5 + $0x1a0] sm:$0xf]  ;;  %v7387_v8 = vor.u32 %v10066_v0, %v7384_v1  ;;  %v10064_v9 = vld [vmem:[%s14469_s5 + $0x8c] sm:$0xf0]  ;;  %v10098_v10 = vld [vmem:[%s14469_s5 + $0x1a4] sm:$0xf] }
  0x2c   : > { %727 = vmatpush.bf16.msra.mxu3 %v7243_v43  ;;  %v7512_v11 = vld [vmem:[%s14469_s5 + $0x1b0] sm:$0xf0]  ;;  %v10062_v12 = vld [vmem:[%s14469_s5 + $0x84] sm:$0xf]  ;;  %v7511_v14 = vor.u32 %v10100_v7, %v7510_v6  ;;  %v7367_v15 = vor.u32 %v10064_v9, %v7366_v5  ;;  %v7350_v17 = vld [vmem:[%s14469_s5 + $0x60] sm:$0xf] }
  0x2d   : > { %686 = vmatmul.bf16.vlgmr.msra.gmra.mxu0 %v7167_v47  ;;  %v7368_v13 = vld [vmem:[%s14469_s5 + $0x90] sm:$0xf0]  ;;  %v7515_v16 = vor.u32 %v10098_v10, %v7512_v11  ;;  %v7494_v18 = vld [vmem:[%s14469_s5 + $0x180] sm:$0xf]  ;;  %v10096_v19 = vld [vmem:[%s14469_s5 + $0x18c] sm:$0xf0] }
  0x2e   : > { %1130 = vmatpush.bf16.msrb.mxu0 %v7415_v46  ;;  %700 = vmatmul.bf16.vlgmr.msra.gmra.mxu1 %v7171_v51  ;;  %v7371_v20 = vor.u32 %v10062_v12, %v7368_v13  ;;  %v10060_v21 = vld [vmem:[%s14469_s5 + $0x6c] sm:$0xf0]  ;;  %v10094_v22 = vld [vmem:[%s14469_s5 + $0x184] sm:$0xf]  ;;  %v7496_v23 = vld [vmem:[%s14469_s5 + $0x190] sm:$0xf0]  ;;  %v7495_v26 = vor.u32 %v10096_v19, %v7494_v18 }
  0x2f   : > { %1158 = vmatpush.bf16.msrb.mxu2 %v7419_v49  ;;  %728 = vmatmul.bf16.vlgmr.msra.gmra.mxu3 %v7171_v51  ;;  %v10058_v24 = vld [vmem:[%s14469_s5 + $0x64] sm:$0xf]  ;;  %v7352_v25 = vld [vmem:[%s14469_s5 + $0x70] sm:$0xf0]  ;;  %v7334_v27 = vld [vmem:[%s14469_s5 + $0x40] sm:$0xf]  ;;  %v7351_v29 = vor.u32 %v10060_v21, %v7350_v17  ;;  %v7499_v30 = vor.u32 %v10094_v22, %v7496_v23 }
  0x30   : > { %714 = vmatmul.bf16.vlgmr.msra.gmra.mxu2 %v7167_v47  ;;  %1144 = vmatpush.bf16.msrb.mxu1 %v7543_v54  ;;  %v7478_v28 = vld [vmem:[%s14469_s5 + $0x160] sm:$0xf]  ;;  %v10092_v31 = vld [vmem:[%s14469_s5 + $0x16c] sm:$0xf0]  ;;  %v7355_v32 = vor.u32 %v10058_v24, %v7352_v25  ;;  %v10090_v34 = vld [vmem:[%s14469_s5 + $0x164] sm:$0xf] }
  0x31   : > { %1172 = vmatpush.bf16.msrb.mxu3 %v7547_v56  ;;  %v10056_v33 = vld [vmem:[%s14469_s5 + $0x4c] sm:$0xf0]  ;;  %v7480_v35 = vld [vmem:[%s14469_s5 + $0x170] sm:$0xf0]  ;;  %v10054_v36 = vld [vmem:[%s14469_s5 + $0x44] sm:$0xf]  ;;  %v7479_v38 = vor.u32 %v10092_v31, %v7478_v28 }
  0x32   : > { %1131 = vmatpush.bf16.msrb.mxu0 %v7399_v55  ;;  %v7336_v37 = vld [vmem:[%s14469_s5 + $0x50] sm:$0xf0]  ;;  %v7335_v39 = vor.u32 %v10056_v33, %v7334_v27  ;;  %v7483_v40 = vor.u32 %v10090_v34, %v7480_v35  ;;  %v7318_v41 = vld [vmem:[%s14469_s5 + $0x20] sm:$0xf]  ;;  %v10088_v43 = vld [vmem:[%s14469_s5 + $0x14c] sm:$0xf0] }
  0x33   : > { %1159 = vmatpush.bf16.msrb.mxu2 %v7403_v60  ;;  %v7462_v42 = vld [vmem:[%s14469_s5 + $0x140] sm:$0xf]  ;;  %v7339_v44 = vor.u32 %v10054_v36, %v7336_v37  ;;  %v10052_v45 = vld [vmem:[%s14469_s5 + $0x2c] sm:$0xf0]  ;;  %v10086_v46 = vld [vmem:[%s14469_s5 + $0x144] sm:$0xf] }
  0x34   : > { %1145 = vmatpush.bf16.msrb.mxu1 %v7527_v2  ;;  %v7464_v47 = vld [vmem:[%s14469_s5 + $0x150] sm:$0xf0]  ;;  %v10050_v48 = vld [vmem:[%s14469_s5 + $0x24] sm:$0xf]  ;;  %v7463_v50 = vor.u32 %v10088_v43, %v7462_v42  ;;  %v7319_v51 = vor.u32 %v10052_v45, %v7318_v41  ;;  %v7302_v54 = vld [vmem:[%s14469_s5] sm:$0xf] }
  0x35   : > { %1173 = vmatpush.bf16.msrb.mxu3 %v7531_v4  ;;  %v7320_v49 = vld [vmem:[%s14469_s5 + $0x30] sm:$0xf0]  ;;  %v7467_v52 = vor.u32 %v10086_v46, %v7464_v47  ;;  %v10048_v55 = vld [vmem:[%s14469_s5 + $0xc] sm:$0xf0]  ;;  %v10046_v56 = vld [vmem:[%s14469_s5 + $0x4] sm:$0xf] }
  0x36   : > { %1132 = vmatpush.bf16.msrb.mxu0 %v7383_v3  ;;  %v7323_v53 = vor.u32 %v10050_v48, %v7320_v49  ;;  %v7304_v57 = vld [vmem:[%s14469_s5 + $0x10] sm:$0xf0]  ;;  %v7303_v58 = vor.u32 %v10048_v55, %v7302_v54  ;;  %v7422_v60 = vld [vmem:[%s14469_s5 + $0xe8] sm:$0xf]  ;;  %v10077_v61 = vld [vmem:[%s14469_s5 + $0xf4] sm:$0xf0] }
  0x37   : > { %1160 = vmatpush.bf16.msrb.mxu2 %v7387_v8  ;;  %v7307_v59 = vor.u32 %v10046_v56, %v7304_v57  ;;  %v10075_v62 = vld [vmem:[%s14469_s5 + $0xec] sm:$0xf]  ;;  %v7423_v63 = vor.u32 %v10077_v61, %v7422_v60  ;;  %v7424_v0 = vld [vmem:[%s14469_s5 + $0xf8] sm:$0xf0]  ;;  %v7446_v1 = vld [vmem:[%s14469_s5 + $0x120] sm:$0xf] }
  0x38   : > { %1146 = vmatpush.bf16.msrb.mxu1 %v7511_v14  ;;  %v10084_v2 = vld [vmem:[%s14469_s5 + $0x12c] sm:$0xf0]  ;;  %v7427_v3 = vor.u32 %v10075_v62, %v7424_v0  ;;  %v10082_v5 = vld [vmem:[%s14469_s5 + $0x124] sm:$0xf]  ;;  %v7448_v6 = vld [vmem:[%s14469_s5 + $0x130] sm:$0xf0] }
  0x39   : > { %1174 = vmatpush.bf16.msrb.mxu3 %v7515_v16  ;;  %v7447_v4 = vor.u32 %v10084_v2, %v7446_v1  ;;  %v7451_v7 = vor.u32 %v10082_v5, %v7448_v6  ;;  %v7406_v8 = vld [vmem:[%s14469_s5 + $0xc8] sm:$0xf]  ;;  %v10073_v9 = vld [vmem:[%s14469_s5 + $0xd4] sm:$0xf0]  ;;  %v10071_v10 = vld [vmem:[%s14469_s5 + $0xcc] sm:$0xf] }
  0x3a   : > { %1133 = vmatpush.bf16.msrb.mxu0 %v7367_v15  ;;  %v7407_v11 = vor.u32 %v10073_v9, %v7406_v8  ;;  %v7408_v12 = vld [vmem:[%s14469_s5 + $0xd8] sm:$0xf0]  ;;  %v7430_v13 = vld [vmem:[%s14469_s5 + $0x100] sm:$0xf]  ;;  %v10080_v14 = vld [vmem:[%s14469_s5 + $0x10c] sm:$0xf0] }
  0x3b   : > { %1161 = vmatpush.bf16.msrb.mxu2 %v7371_v20  ;;  %v7411_v15 = vor.u32 %v10071_v10, %v7408_v12  ;;  %v7431_v16 = vor.u32 %v10080_v14, %v7430_v13  ;;  %v10078_v17 = vld [vmem:[%s14469_s5 + $0x104] sm:$0xf]  ;;  %v7432_v18 = vld [vmem:[%s14469_s5 + $0x110] sm:$0xf0]  ;;  %v7550_v20 = vld [vmem:[%s14469_s5 + $0x1e8] sm:$0xf] }
  0x3c   : > { %1147 = vmatpush.bf16.msrb.mxu1 %v7495_v26  ;;  %v7435_v19 = vor.u32 %v10078_v17, %v7432_v18  ;;  %v10109_v21 = vld [vmem:[%s14469_s5 + $0x1f4] sm:$0xf0]  ;;  %v10107_v22 = vld [vmem:[%s14469_s5 + $0x1ec] sm:$0xf]  ;;  %v7552_v24 = vld [vmem:[%s14469_s5 + $0x1f8] sm:$0xf0] }
  0x3d   : > { %1175 = vmatpush.bf16.msrb.mxu3 %v7499_v30  ;;  %v7551_v23 = vor.u32 %v10109_v21, %v7550_v20  ;;  %v7390_v25 = vld [vmem:[%s14469_s5 + $0xa8] sm:$0xf]  ;;  %v10069_v26 = vld [vmem:[%s14469_s5 + $0xb4] sm:$0xf0]  ;;  %v7555_v27 = vor.u32 %v10107_v22, %v7552_v24  ;;  %v7392_v30 = vld [vmem:[%s14469_s5 + $0xb8] sm:$0xf0] }
  0x3e   : > { %1134 = vmatpush.bf16.msrb.mxu0 %v7351_v29  ;;  %v7391_v28 = vor.u32 %v10069_v26, %v7390_v25  ;;  %v10067_v29 = vld [vmem:[%s14469_s5 + $0xac] sm:$0xf]  ;;  %v10105_v33 = vld [vmem:[%s14469_s5 + $0x1d4] sm:$0xf0]  ;;  %v7536_v36 = vld [vmem:[%s14469_s5 + $0x1d8] sm:$0xf0] }
  0x3f   : > { %1162 = vmatpush.bf16.msrb.mxu2 %v7355_v32  ;;  %v7395_v31 = vor.u32 %v10067_v29, %v7392_v30  ;;  %v7534_v32 = vld [vmem:[%s14469_s5 + $0x1c8] sm:$0xf]  ;;  %v10103_v34 = vld [vmem:[%s14469_s5 + $0x1cc] sm:$0xf]  ;;  %v7376_v42 = vld [vmem:[%s14469_s5 + $0x98] sm:$0xf0] }
  0x40   : > { %1148 = vmatpush.bf16.msrb.mxu1 %v7479_v38  ;;  %v7535_v35 = vor.u32 %v10105_v33, %v7534_v32  ;;  %v7539_v37 = vor.u32 %v10103_v34, %v7536_v36  ;;  %v7374_v38 = vld [vmem:[%s14469_s5 + $0x88] sm:$0xf]  ;;  %v10101_v45 = vld [vmem:[%s14469_s5 + $0x1b4] sm:$0xf0]  ;;  %v10099_v46 = vld [vmem:[%s14469_s5 + $0x1ac] sm:$0xf] }
  0x41   : > { %1176 = vmatpush.bf16.msrb.mxu3 %v7483_v40  ;;  %v10063_v40 = vld [vmem:[%s14469_s5 + $0x8c] sm:$0xf]  ;;  %v7520_v48 = vld [vmem:[%s14469_s5 + $0x1b8] sm:$0xf0]  ;;  %v7502_v56 = vld [vmem:[%s14469_s5 + $0x188] sm:$0xf] }
  0x42   : > { %1135 = vmatpush.bf16.msrb.mxu0 %v7335_v39  ;;  %v10065_v39 = vld [vmem:[%s14469_s5 + $0x94] sm:$0xf0]  ;;  %v7379_v43 = vor.u32 %v10063_v40, %v7376_v42  ;;  %v7523_v49 = vor.u32 %v10099_v46, %v7520_v48  ;;  %v7360_v54 = vld [vmem:[%s14469_s5 + $0x78] sm:$0xf0]  ;;  %v7342_v62 = vld [vmem:[%s14469_s5 + $0x48] sm:$0xf] }
  0x43   : > { %1163 = vmatpush.bf16.msrb.mxu2 %v7339_v44  ;;  %v7375_v41 = vor.u32 %v10065_v39, %v7374_v38  ;;  %v7518_v44 = vld [vmem:[%s14469_s5 + $0x1a8] sm:$0xf]  ;;  %v10097_v57 = vld [vmem:[%s14469_s5 + $0x194] sm:$0xf0]  ;;  %v7504_v60 = vld [vmem:[%s14469_s5 + $0x198] sm:$0xf0] }
  0x44   : > { %1149 = vmatpush.bf16.msrb.mxu1 %v7463_v50  ;;  %v7519_v47 = vor.u32 %v10101_v45, %v7518_v44  ;;  %v7358_v50 = vld [vmem:[%s14469_s5 + $0x68] sm:$0xf]  ;;  %v10055_v0 = vld [vmem:[%s14469_s5 + $0x4c] sm:$0xf]  ;;  %v7344_v2 = vld [vmem:[%s14469_s5 + $0x58] sm:$0xf0] }
  0x45   : > { %1177 = vmatpush.bf16.msrb.mxu3 %v7467_v52  ;;  %v10059_v52 = vld [vmem:[%s14469_s5 + $0x6c] sm:$0xf]  ;;  %v10093_v5 = vld [vmem:[%s14469_s5 + $0x174] sm:$0xf0]  ;;  %v7488_v8 = vld [vmem:[%s14469_s5 + $0x178] sm:$0xf0] }
  0x46   : > { %1136 = vmatpush.bf16.msrb.mxu0 %v7319_v51  ;;  %v10061_v51 = vld [vmem:[%s14469_s5 + $0x74] sm:$0xf0]  ;;  %v7363_v55 = vor.u32 %v10059_v52, %v7360_v54  ;;  %v10091_v6 = vld [vmem:[%s14469_s5 + $0x16c] sm:$0xf]  ;;  %v7326_v9 = vld [vmem:[%s14469_s5 + $0x28] sm:$0xf] }
  0x47   : > { %1164 = vmatpush.bf16.msrb.mxu2 %v7323_v53  ;;  %v7359_v53 = vor.u32 %v10061_v51, %v7358_v50  ;;  %v10053_v10 = vld [vmem:[%s14469_s5 + $0x34] sm:$0xf0]  ;;  %v10051_v13 = vld [vmem:[%s14469_s5 + $0x2c] sm:$0xf]  ;;  %v7328_v14 = vld [vmem:[%s14469_s5 + $0x38] sm:$0xf0] }
  0x48   : > { %1150 = vmatpush.bf16.msrb.mxu1 %v7447_v4  ;;  %v7486_v4 = vld [vmem:[%s14469_s5 + $0x168] sm:$0xf]  ;;  %v7327_v12 = vor.u32 %v10053_v10, %v7326_v9  ;;  %v10089_v17 = vld [vmem:[%s14469_s5 + $0x154] sm:$0xf0]  ;;  %v10087_v18 = vld [vmem:[%s14469_s5 + $0x14c] sm:$0xf] }
  0x49   : > { %1178 = vmatpush.bf16.msrb.mxu3 %v7451_v7  ;;  %v7487_v7 = vor.u32 %v10093_v5, %v7486_v4  ;;  %v7310_v21 = vld [vmem:[%s14469_s5 + $0x8] sm:$0xf]  ;;  %v10049_v22 = vld [vmem:[%s14469_s5 + $0x14] sm:$0xf0]  ;;  %v7312_v26 = vld [vmem:[%s14469_s5 + $0x18] sm:$0xf0] }
  0x4a   : > { %1137 = vmatpush.bf16.msrb.mxu0 %v7303_v58  ;;  %v10095_v58 = vld [vmem:[%s14469_s5 + $0x18c] sm:$0xf]  ;;  %v7311_v25 = vor.u32 %v10049_v22, %v7310_v21  ;;  %v7438_v34 = vld [vmem:[%s14469_s5 + $0x108] sm:$0xf]  ;;  %v7440_v39 = vld [vmem:[%s14469_s5 + $0x118] sm:$0xf0] }
  0x4b   : > { %1165 = vmatpush.bf16.msrb.mxu2 %v7307_v59  ;;  %v7503_v59 = vor.u32 %v10097_v57, %v7502_v56  ;;  %v7507_v61 = vor.u32 %v10095_v58, %v7504_v60  ;;  %v10083_v30 = vld [vmem:[%s14469_s5 + $0x12c] sm:$0xf]  ;;  %v10172_v50 = vld [vmem:[%s14471_s7 + $0x1dc] sm:$0xf0]  ;;  %vm1762_vm1 = vcmask 261120   ;;  %vm2165_vm2 = vcmask 523264  }
  0x4c   : > { %1151 = vmatpush.bf16.msrb.mxu1 %v7431_v16  ;;  %v7331_v16 = vor.u32 %v10051_v13, %v7328_v14  ;;  %v10079_v36 = vld [vmem:[%s14469_s5 + $0x10c] sm:$0xf]  ;;  %v7758_v57 = vld [vmem:[%s14471_s7 + $0x180] sm:$0xf]  ;;  %v7824_v13 = vld [vmem:[%s14471_s7 + $0x220] sm:$0xf0] }
  0x4d   : > { %1179 = vmatpush.bf16.msrb.mxu3 %v7435_v19  ;;  %v7472_v19 = vld [vmem:[%s14469_s5 + $0x158] sm:$0xf0]  ;;  %v7443_v42 = vor.u32 %v10079_v36, %v7440_v39  ;;  %v10164_v58 = vld [vmem:[%s14471_s7 + $0x19c] sm:$0xf0]  ;;  %v10174_v36 = vld [vmem:[%s14471_s7 + $0x1ec] sm:$0xf0] }
  0x4e   : > { %1186 = vmatpush.bf16.msra.mxu0 %v7423_v63  ;;  %v10057_v63 = vld [vmem:[%s14469_s5 + $0x54] sm:$0xf0]  ;;  %v7475_v24 = vor.u32 %v10087_v18, %v7472_v19  ;;  %v7726_v4 = vld [vmem:[%s14471_s7 + $0x140] sm:$0xf]  ;;  %s10740_s23 = smov 64   ;;  %vm2685_vm3 = vcmask 130048  }
  0x4f   : > { %1214 = vmatpush.bf16.msra.mxu2 %v7427_v3  ;;  %v7343_v1 = vor.u32 %v10057_v63, %v7342_v62  ;;  %v7347_v3 = vor.u32 %v10055_v0, %v7344_v2  ;;  %v7759_v63 = vor.u32 %v10164_v58, %v7758_v57  ;;  %v7856_v0 = vld [vmem:[%s14471_s7 + $0x260] sm:$0xf0]  ;;  %v10188_v2 = vld [vmem:[%s14471_s7 + $0x25c] sm:$0xf0]  ;;  %v10157_v58 = vld [vmem:[%s14471_s7 + $0x164] sm:$0xf0] }
  0x50   : > { %1200 = vmatpush.bf16.msra.mxu1 %v7551_v23  ;;  %v10047_v23 = vld [vmem:[%s14469_s5 + $0xc] sm:$0xf]  ;;  %v10156_v5 = vld [vmem:[%s14471_s7 + $0x15c] sm:$0xf0]  ;;  %vm4148_vm4 = vcmask 261248   ;;  %vm5603_vm5 = vcmask 392448  }
  0x51   : > { %1228 = vmatpush.bf16.msra.mxu3 %v7555_v27  ;;  %v7454_v27 = vld [vmem:[%s14469_s5 + $0x128] sm:$0xf]  ;;  %v7315_v29 = vor.u32 %v10047_v23, %v7312_v26  ;;  %v7694_v18 = vld [vmem:[%s14471_s7 + $0x100] sm:$0xf]  ;;  %v10168_v23 = vld [vmem:[%s14471_s7 + $0x1c4] sm:$0xf] }
  0x52   : > { %1187 = vmatpush.bf16.msra.mxu0 %v7407_v11  ;;  %v7491_v11 = vor.u32 %v10091_v6, %v7488_v8  ;;  %v10148_v19 = vld [vmem:[%s14471_s7 + $0x11c] sm:$0xf0]  ;;  %vm7066_vm6 = vcmask 523648  }
  0x53   : > { %1215 = vmatpush.bf16.msra.mxu2 %v7411_v15  ;;  %v7470_v15 = vld [vmem:[%s14469_s5 + $0x148] sm:$0xf]  ;;  %v7695_v21 = vor.u32 %v10148_v19, %v7694_v18  ;;  %v10180_v22 = vld [vmem:[%s14471_s7 + $0x21c] sm:$0xf0]  ;;  %v10169_v19 = vld [vmem:[%s14471_s7 + $0x1cc] sm:$0xf] }
  0x54   : > { %1201 = vmatpush.bf16.msra.mxu1 %v7535_v35  ;;  %v7471_v20 = vor.u32 %v10089_v17, %v7470_v15  ;;  %v10081_v35 = vld [vmem:[%s14469_s5 + $0x114] sm:$0xf0]  ;;  %v7862_v15 = vld [vmem:[%s14471_s7 + $0x248] sm:$0xf]  ;;  %v7662_v39 = vld [vmem:[%s14471_s7 + $0xc0] sm:$0xf] }
  0x55   : > { %1229 = vmatpush.bf16.msra.mxu3 %v7539_v37  ;;  %v502_v37 = vld [vmem:[%s14468_s4] sm:$0x3]  ;;  %v10141_v18 = vld [vmem:[%s14471_s7 + $0xe4] sm:$0xf0] }
  0x56   : > { %1188 = vmatpush.bf16.msra.mxu0 %v7391_v28  ;;  %v10085_v28 = vld [vmem:[%s14469_s5 + $0x134] sm:$0xf0]  ;;  %v505_v51 = vperm.slane %v502_v37, 1 }
  0x57   : > { %1216 = vmatpush.bf16.msra.mxu2 %v7395_v31  ;;  %v7456_v31 = vld [vmem:[%s14469_s5 + $0x138] sm:$0xf0]  ;;  %v7455_v32 = vor.u32 %v10085_v28, %v7454_v27  ;;  %v7798_v27 = vld [vmem:[%s14471_s7 + $0x1c8] sm:$0xf] }
  0x58   : > { %1202 = vmatpush.bf16.msra.mxu1 %v7519_v47  ;;  %v7459_v33 = vor.u32 %v10083_v30, %v7456_v31  ;;  %v10173_v28 = vld [vmem:[%s14471_s7 + $0x1e4] sm:$0xf0]  ;;  %v7560_v31 = vld [vmem:[#allocation2 + $0x8] sm:$0xf0] }
  0x59   : > { %1230 = vmatpush.bf16.msra.mxu3 %v7523_v49  ;;  %v7790_v49 = vld [vmem:[%s14471_s7 + $0x1c0] sm:$0xf]  ;;  %v7799_v30 = vor.u32 %v10173_v28, %v7798_v27  ;;  %v7632_v27 = vld [vmem:[%s14471_s7 + $0xa0] sm:$0xf0]  ;;  %v7638_v28 = vld [vmem:[%s14471_s7 + $0x88] sm:$0xf] }
  0x5a   : > { %1189 = vmatpush.bf16.msra.mxu0 %v7375_v41  ;;  %v7439_v41 = vor.u32 %v10081_v35, %v7438_v34  ;;  %v10181_v34 = vld [vmem:[%s14471_s7 + $0x224] sm:$0xf0]  ;;  %v7806_v35 = vld [vmem:[%s14471_s7 + $0x1d0] sm:$0xf] }
  0x5b   : > { %1217 = vmatpush.bf16.msra.mxu2 %v7379_v43  ;;  %v504_v43 = vperm.slane %v502_v37, 0 }
  0x5c   : > { %1203 = vmatpush.bf16.msra.mxu1 %v7503_v59 }
  0x5d   : > { %1231 = vmatpush.bf16.msra.mxu3 %v7507_v61  ;;  %v10184_v61 = vld [vmem:[%s14471_s7 + $0x244] sm:$0xf] }
  0x5e   : > { %1190 = vmatpush.bf16.msra.mxu0 %v7359_v53  ;;  %v7859_v8 = vor.u32 %v10184_v61, %v7856_v0  ;;  %v10158_v61 = vld [vmem:[%s14471_s7 + $0x16c] sm:$0xf0]  ;;  %v10124_v0 = vld [vmem:[%s14471_s7 + $0x5c] sm:$0xf0] }
  0x5f   : > { %1218 = vmatpush.bf16.msra.mxu2 %v7363_v55  ;;  %v7791_v55 = vor.u32 %v10172_v50, %v7790_v49  ;;  %v10166_v49 = vld [vmem:[%s14471_s7 + $0x1ac] sm:$0xf0] }
  0x60   : > { %1204 = vmatpush.bf16.msra.mxu1 %v7487_v7 }
  0x61   : > { %1232 = vmatpush.bf16.msra.mxu3 %v7491_v11  ;;  %v7727_v11 = vor.u32 %v10156_v5, %v7726_v4  ;;  %v7702_v4 = vld [vmem:[%s14471_s7 + $0x108] sm:$0xf] }
  0x62   : > { %1191 = vmatpush.bf16.msra.mxu0 %v7343_v1  ;;  %v7854_v1 = vld [vmem:[%s14471_s7 + $0x240] sm:$0xf] }
  0x63   : > { %1219 = vmatpush.bf16.msra.mxu2 %v7347_v3  ;;  %v7855_v9 = vor.u32 %v10188_v2, %v7854_v1  ;;  %v10144_v2 = vld [vmem:[%s14471_s7 + $0x104] sm:$0xf] }
  0x64   : > { %1205 = vmatpush.bf16.msra.mxu1 %v7471_v20  ;;  %v7822_v20 = vld [vmem:[%s14471_s7 + $0x200] sm:$0xf] }
  0x65   : > { %1233 = vmatpush.bf16.msra.mxu3 %v7475_v24  ;;  %v7792_v24 = vld [vmem:[%s14471_s7 + $0x1e0] sm:$0xf0] }
  0x66   : > { %1192 = vmatpush.bf16.msra.mxu0 %v7327_v12  ;;  %v10176_v12 = vld [vmem:[%s14471_s7 + $0x204] sm:$0xf]  ;;  %v7795_v26 = vor.u32 %v10168_v23, %v7792_v24  ;;  %v10142_v23 = vld [vmem:[%s14471_s7 + $0xec] sm:$0xf0] }
  0x67   : > { %1220 = vmatpush.bf16.msra.mxu2 %v7331_v16  ;;  %v7827_v14 = vor.u32 %v10176_v12, %v7824_v13  ;;  %v10189_v16 = vld [vmem:[%s14471_s7 + $0x264] sm:$0xf0]  ;;  %v10116_v12 = vld [vmem:[%s14471_s7 + $0x1c] sm:$0xf0] }
  0x68   : > { %1206 = vmatpush.bf16.msra.mxu1 %v7455_v32  ;;  %v7863_v17 = vor.u32 %v10189_v16, %v7862_v15  ;;  %v7830_v32 = vld [vmem:[%s14471_s7 + $0x208] sm:$0xf]  ;;  %v7664_v15 = vld [vmem:[%s14471_s7 + $0xe0] sm:$0xf0] }
  0x69   : > { %1234 = vmatpush.bf16.msra.mxu3 %v7459_v33  ;;  %v7831_v37 = vor.u32 %v10181_v34, %v7830_v32  ;;  %v7768_v32 = vld [vmem:[%s14471_s7 + $0x1a8] sm:$0xf0] }
  0x6a   : > { %1193 = vmatpush.bf16.msra.mxu0 %v7311_v25  ;;  %v7823_v25 = vor.u32 %v10180_v22, %v7822_v20  ;;  %v7678_v22 = vld [vmem:[%s14471_s7 + $0xd0] sm:$0xf] }
  0x6b   : > { %1221 = vmatpush.bf16.msra.mxu2 %v7315_v29  ;;  %v10110_v29 = vld [vmem:[#allocation2 + $0x4] sm:$0xf] }
  0x6c   : > { %1207 = vmatpush.bf16.msra.mxu1 %v7439_v41  ;;  %v11482_v33 = vor.u32 %v10110_v29, %v7560_v31  ;;  %v10160_v41 = vld [vmem:[%s14471_s7 + $0x184] sm:$0xf]  ;;  %v10161_v31 = vld [vmem:[%s14471_s7 + $0x18c] sm:$0xf] }
  0x6d   : > { %1235 = vmatpush.bf16.msra.mxu3 %v7443_v42 }
  0xaa   : > { %v687_v38 = vpop.f32.mrf.mxu0 }
  0xab   : > { %v701_v40 = vpop.f32.mrf.mxu1  ;;  %v688_v44 = vadd.f32 %v687_v38, %v504_v43  ;;  %v7807_v38 = vor.u32 %v10174_v36, %v7806_v35  ;;  %v7771_v35 = vor.u32 %v10161_v31, %v7768_v32  ;;  %v7646_v36 = vld [vmem:[%s14471_s7 + $0x90] sm:$0xf] }
  0xad   : > { %v702_v53 = vadd.f32 %v701_v40, %v688_v44  ;;  %v10140_v40 = vld [vmem:[%s14471_s7 + $0xdc] sm:$0xf0]  ;;  %v7766_v44 = vld [vmem:[%s14471_s7 + $0x188] sm:$0xf] }
  0xae   : > { %v7663_v42 = vor.u32 %v10140_v40, %v7662_v39  ;;  %v10120_v39 = vld [vmem:[%s14471_s7 + $0x44] sm:$0xf] }
  0xaf   : > { %v7600_v40 = vld [vmem:[%s14471_s7 + $0x60] sm:$0xf0] }
  0xb2   : > { %v729_v46 = vpop.f32.mrf.mxu3  ;;  %v689_v47 = vpop.f32.mrf.mxu0 }
  0xb3   : > { %v715_v45 = vpop.f32.mrf.mxu2  ;;  %v690_v48 = vadd.f32 %v689_v47, %v504_v43  ;;  %v703_v52 = vpop.f32.mrf.mxu1  ;;  %v7760_v43 = vld [vmem:[%s14471_s7 + $0x1a0] sm:$0xf0] }
  0xb4   : > { %v716_v59 = vadd.f32 %v715_v45, %v505_v51  ;;  %v10165_v45 = vld [vmem:[%s14471_s7 + $0x1a4] sm:$0xf0] }
  0xb5   : > { %v704_v54 = vadd.f32 %v703_v52, %v690_v48  ;;  %v7767_v47 = vor.u32 %v10165_v45, %v7766_v44  ;;  %v7774_v48 = vld [vmem:[%s14471_s7 + $0x190] sm:$0xf]  ;;  %v10132_v52 = vld [vmem:[%s14471_s7 + $0x9c] sm:$0xf0]  ;;  %v10153_v44 = vld [vmem:[%s14471_s7 + $0x14c] sm:$0xf] }
  0xb6   : > { %v730_v6 = vadd.f32 %v729_v46, %v716_v59  ;;  %v7763_v46 = vor.u32 %v10160_v41, %v7760_v43  ;;  %v7775_v50 = vor.u32 %v10166_v49, %v7774_v48  ;;  %v7606_v41 = vld [vmem:[%s14471_s7 + $0x48] sm:$0xf]  ;;  %v7736_v45 = vld [vmem:[%s14471_s7 + $0x168] sm:$0xf0]  ;;  %v7614_v48 = vld [vmem:[%s14471_s7 + $0x50] sm:$0xf] }
  0xb7   : > { %v734_v56 = vpack.c.bf16 %v704_v54, %v702_v53  ;;  %v10152_v54 = vld [vmem:[%s14471_s7 + $0x144] sm:$0xf]  ;;  %v10125_v43 = vld [vmem:[%s14471_s7 + $0x64] sm:$0xf0]  ;;  %v10126_v49 = vld [vmem:[%s14471_s7 + $0x6c] sm:$0xf0] }
  0xb9   : > { %1138 = vmatmul.bf16.vlgmr.msrb.gmra.mxu0 %v734_v56  ;;  %1166 = vmatmul.bf16.vlgmr.msrb.gmra.mxu2 %v734_v56 }
  0xba   : > { %1766 = vmatpush.bf16.msrb.mxu0 %v7791_v55  ;;  %v731_v3 = vpop.f32.mrf.mxu3  ;;  %1794 = vmatpush.bf16.msrb.mxu2 %v7795_v26  ;;  %v7728_v55 = vld [vmem:[%s14471_s7 + $0x160] sm:$0xf0] }
  0xbb   : > { %v717_v60 = vpop.f32.mrf.mxu2  ;;  %v7731_v57 = vor.u32 %v10152_v54, %v7728_v55  ;;  %v10128_v26 = vld [vmem:[%s14471_s7 + $0x84] sm:$0xf]  ;;  %v10117_v55 = vld [vmem:[%s14471_s7 + $0x24] sm:$0xf0] }
  0xbc   : > { %v718_v62 = vadd.f32 %v717_v60, %v505_v51  ;;  %v7630_v51 = vld [vmem:[%s14471_s7 + $0x80] sm:$0xf]  ;;  %v7742_v60 = vld [vmem:[%s14471_s7 + $0x150] sm:$0xf]  ;;  %v7635_v29 = vor.u32 %v10128_v26, %v7632_v27 }
  0xbd   : > { %v7631_v53 = vor.u32 %v10132_v52, %v7630_v51  ;;  %v10112_v51 = vld [vmem:[%s14471_s7 + $0x4] sm:$0xf] }
  0xbe   : > { %v732_v7 = vadd.f32 %v731_v3, %v718_v62  ;;  %1767 = vmatpush.bf16.msrb.mxu0 %v7759_v63  ;;  %1795 = vmatpush.bf16.msrb.mxu2 %v7763_v46  ;;  %v7743_v62 = vor.u32 %v10158_v61, %v7742_v60  ;;  %v7598_v63 = vld [vmem:[%s14471_s7 + $0x40] sm:$0xf]  ;;  %v7696_v3 = vld [vmem:[%s14471_s7 + $0x120] sm:$0xf0]  ;;  %v7607_v46 = vor.u32 %v10125_v43, %v7606_v41  ;;  %v10185_v60 = vld [vmem:[%s14471_s7 + $0x24c] sm:$0xf] }
  0xbf   : > { %v7599_v1 = vor.u32 %v10124_v0, %v7598_v63  ;;  %v7699_v5 = vor.u32 %v10144_v2, %v7696_v3  ;;  %v7568_v52 = vld [vmem:[%s14471_s7 + $0x20] sm:$0xf0]  ;;  %v7864_v61 = vld [vmem:[%s14471_s7 + $0x268] sm:$0xf0]  ;;  %v10190_v0 = vld [vmem:[%s14471_s7 + $0x26c] sm:$0xf0] }
  0xc0   : > { %v735_v10 = vpack.c.bf16 %v732_v7, %v730_v6  ;;  %v10149_v6 = vld [vmem:[%s14471_s7 + $0x124] sm:$0xf0]  ;;  %v7571_v54 = vor.u32 %v10112_v51, %v7568_v52  ;;  %v7867_v63 = vor.u32 %v10185_v60, %v7864_v61  ;;  %v10118_v2 = vld [vmem:[%s14471_s7 + $0x2c] sm:$0xf0] }
  0xc1   : > { %v7703_v7 = vor.u32 %v10149_v6, %v7702_v4  ;;  %v7672_v6 = vld [vmem:[%s14471_s7 + $0xe8] sm:$0xf0] }
  0xc2   : > { %1152 = vmatmul.bf16.vlgmr.msrb.gmra.mxu1 %v735_v10  ;;  %1180 = vmatmul.bf16.vlgmr.msrb.gmra.mxu3 %v735_v10 }
  0xc3   : > { %1814 = vmatpush.bf16.msrb.mxu3 %v7859_v8  ;;  %1786 = vmatpush.bf16.msrb.mxu1 %v7855_v9  ;;  %v7710_v8 = vld [vmem:[%s14471_s7 + $0x110] sm:$0xf] }
  0xc4   : > { %1768 = vmatpush.bf16.msrb.mxu0 %v7727_v11  ;;  %1796 = vmatpush.bf16.msrb.mxu2 %v7731_v57  ;;  %v10150_v9 = vld [vmem:[%s14471_s7 + $0x12c] sm:$0xf0]  ;;  %v7566_v11 = vld [vmem:[%s14471_s7] sm:$0xf]  ;;  %v7704_v57 = vld [vmem:[%s14471_s7 + $0x128] sm:$0xf0] }
  0xc5   : > { %v7567_v13 = vor.u32 %v10116_v12, %v7566_v11  ;;  %v7838_v11 = vld [vmem:[%s14471_s7 + $0x210] sm:$0xf] }
  0xc7   : > { %1815 = vmatpush.bf16.msrb.mxu3 %v7827_v14  ;;  %1787 = vmatpush.bf16.msrb.mxu1 %v7823_v25  ;;  %v10136_v14 = vld [vmem:[%s14471_s7 + $0xc4] sm:$0xf]  ;;  %v7679_v25 = vor.u32 %v10142_v23, %v7678_v22  ;;  %v10121_v23 = vld [vmem:[%s14471_s7 + $0x4c] sm:$0xf] }
  0xc8   : > { %1769 = vmatpush.bf16.msrb.mxu0 %v7695_v21  ;;  %1797 = vmatpush.bf16.msrb.mxu2 %v7699_v5  ;;  %v7667_v16 = vor.u32 %v10136_v14, %v7664_v15  ;;  %v7800_v21 = vld [vmem:[%s14471_s7 + $0x1e8] sm:$0xf0]  ;;  %v11706_v14 = vld [vmem:[%s14470_s6] sm:$0xf] }
  0xc9   : > { %1194 = vmatmul.bf16.vlgmr.msra.gmra.mxu0 %v734_v56  ;;  %1222 = vmatmul.bf16.vlgmr.msra.gmra.mxu2 %v734_v56  ;;  %v7734_v56 = vld [vmem:[%s14471_s7 + $0x148] sm:$0xf]  ;;  %v7803_v24 = vor.u32 %v10169_v19, %v7800_v21  ;;  %v10137_v5 = vld [vmem:[%s14471_s7 + $0xcc] sm:$0xf]  ;;  %v802_v21 = vperm.slane %v11706_v14, 0  ;;  %v803_v22 = vperm.slane %v11706_v14, 1 }
  0xca   : > { %v7735_v59 = vor.u32 %v10157_v58, %v7734_v56  ;;  %v10145_v56 = vld [vmem:[%s14471_s7 + $0x10c] sm:$0xf] }
  0xcc   : > { %1770 = vmatpush.bf16.msrb.mxu0 %v7663_v42  ;;  %1798 = vmatpush.bf16.msrb.mxu2 %v7667_v16  ;;  %v7603_v42 = vor.u32 %v10120_v39, %v7600_v40 }
  0xd0   : > { %1771 = vmatpush.bf16.msrb.mxu0 %v7631_v53  ;;  %1799 = vmatpush.bf16.msrb.mxu2 %v7635_v29  ;;  %v7574_v53 = vld [vmem:[%s14471_s7 + $0x8] sm:$0xf] }
  0xd1   : > { %v7575_v58 = vor.u32 %v10117_v55, %v7574_v53  ;;  %v10191_v53 = vld [vmem:[%s14471_s7 + $0x274] sm:$0xf0] }
  0xd2   : > { %1208 = vmatmul.bf16.vlgmr.msra.gmra.mxu1 %v735_v10  ;;  %1236 = vmatmul.bf16.vlgmr.msra.gmra.mxu3 %v735_v10  ;;  %v7711_v10 = vor.u32 %v10150_v9, %v7710_v8  ;;  %v10177_v9 = vld [vmem:[%s14471_s7 + $0x20c] sm:$0xf] }
  0xd3   : > { %1842 = vmatpush.bf16.msra.mxu3 %v7863_v17  ;;  %1822 = vmatpush.bf16.msra.mxu1 %v7799_v30  ;;  %v7670_v17 = vld [vmem:[%s14471_s7 + $0xc8] sm:$0xf] }
  0xd4   : > { %1772 = vmatpush.bf16.msrb.mxu0 %v7599_v1  ;;  %v7671_v20 = vor.u32 %v10141_v18, %v7670_v17  ;;  %v10133_v30 = vld [vmem:[%s14471_s7 + $0xa4] sm:$0xf0]  ;;  %1800 = vmatpush.bf16.msrb.mxu2 %v7603_v42  ;;  %v7582_v1 = vld [vmem:[%s14471_s7 + $0x10] sm:$0xf]  ;;  %v10129_v17 = vld [vmem:[%s14471_s7 + $0x8c] sm:$0xf] }
  0xd5   : > { %v7639_v34 = vor.u32 %v10133_v30, %v7638_v28  ;;  %v7583_v4 = vor.u32 %v10118_v2, %v7582_v1  ;;  %v7640_v18 = vld [vmem:[%s14471_s7 + $0xa8] sm:$0xf0]  ;;  %v7814_v2 = vld [vmem:[%s14471_s7 + $0x1d8] sm:$0xf] }
  0xd7   : > { %1843 = vmatpush.bf16.msra.mxu3 %v7831_v37  ;;  %1823 = vmatpush.bf16.msra.mxu1 %v7767_v47  ;;  %v10134_v37 = vld [vmem:[%s14471_s7 + $0xac] sm:$0xf0]  ;;  %v7739_v47 = vor.u32 %v10153_v44, %v7736_v45 }
  0xd8   : > { %1773 = vmatpush.bf16.msrb.mxu0 %v7567_v13  ;;  %1801 = vmatpush.bf16.msrb.mxu2 %v7571_v54  ;;  %v10182_v13 = vld [vmem:[%s14471_s7 + $0x22c] sm:$0xf0] }
  0xd9   : > { %v7839_v15 = vor.u32 %v10182_v13, %v7838_v11 }
  0xdb   : > { %1824 = vmatpush.bf16.msra.mxu1 %v7735_v59  ;;  %v7707_v59 = vor.u32 %v10145_v56, %v7704_v57  ;;  %v7846_v57 = vld [vmem:[%s14471_s7 + $0x218] sm:$0xf] }
  0xdc   : > { %1850 = vmatpush.bf16.msra.mxu0 %v7803_v24  ;;  %1870 = vmatpush.bf16.msra.mxu2 %v7867_v63  ;;  %v7608_v24 = vld [vmem:[%s14471_s7 + $0x68] sm:$0xf0]  ;;  %v10170_v63 = vld [vmem:[%s14471_s7 + $0x1d4] sm:$0xf] }
  0xdf   : > { %1825 = vmatpush.bf16.msra.mxu1 %v7703_v7  ;;  %v7675_v7 = vor.u32 %v10137_v5, %v7672_v6 }
  0xe0   : > { %1851 = vmatpush.bf16.msra.mxu0 %v7771_v35  ;;  %v7576_v35 = vld [vmem:[%s14471_s7 + $0x28] sm:$0xf0] }
  0xe2   : > { %7885 = vmatmul.msk.bf16.vlgmr.msrb.gmra.mxu3 %vm1762_vm1, %v11482_v33  ;;  %7884 = vmatmul.msk.bf16.vlgmr.msrb.gmra.mxu1 %vm1762_vm1, %v11482_v33 }
  0xe3   : > { %1878 = vmatpush.bf16.msrb.mxu3 %v7807_v38  ;;  %1826 = vmatpush.bf16.msra.mxu1 %v7671_v20  ;;  %v7647_v38 = vor.u32 %v10134_v37, %v7646_v36  ;;  %v7643_v20 = vor.u32 %v10129_v17, %v7640_v18  ;;  %v7776_v18 = vld [vmem:[%s14471_s7 + $0x1b0] sm:$0xf0] }
  0xe4   : > { %1852 = vmatpush.bf16.msra.mxu0 %v7739_v47  ;;  %v804_v47 = vperm.slane %v11706_v14, 2 }
  0xe7   : > { %1879 = vmatpush.bf16.msrb.mxu3 %v7775_v50  ;;  %1827 = vmatpush.bf16.msra.mxu1 %v7639_v34  ;;  %v7615_v50 = vor.u32 %v10126_v49, %v7614_v48  ;;  %v10113_v34 = vld [vmem:[%s14471_s7 + $0xc] sm:$0xf]  ;;  %v805_v49 = vperm.slane %v11706_v14, 3 }
  0xe8   : > { %1853 = vmatpush.bf16.msra.mxu0 %v7707_v59  ;;  %v7579_v37 = vor.u32 %v10113_v34, %v7576_v35  ;;  %v10183_v59 = vld [vmem:[%s14471_s7 + $0x234] sm:$0xf0] }
  0xe9   : > { %v7750_v34 = vld [vmem:[%s14471_s7 + $0x158] sm:$0xf] }
  0xea   : > { %v10159_v35 = vld [vmem:[%s14471_s7 + $0x174] sm:$0xf0] }
  0xeb   : > { %1880 = vmatpush.bf16.msrb.mxu3 %v7743_v62  ;;  %1828 = vmatpush.bf16.msra.mxu1 %v7607_v46  ;;  %v7870_v62 = vld [vmem:[%s14471_s7 + $0x250] sm:$0xf] }
  0xec   : > { %v7871_v3 = vor.u32 %v10190_v0, %v7870_v62  ;;  %1854 = vmatpush.bf16.msra.mxu0 %v7675_v7  ;;  %v7847_v62 = vor.u32 %v10183_v59, %v7846_v57  ;;  %v7808_v0 = vld [vmem:[%s14471_s7 + $0x1f0] sm:$0xf0] }
  0xed   : > { %v7811_v13 = vor.u32 %v10170_v63, %v7808_v0  ;;  %v10130_v57 = vld [vmem:[%s14471_s7 + $0x94] sm:$0xf]  ;;  %v7654_v0 = vld [vmem:[%s14471_s7 + $0x98] sm:$0xf] }
  0xee   : > { %v7648_v63 = vld [vmem:[%s14471_s7 + $0xb0] sm:$0xf0] }
  0xef   : > { %1881 = vmatpush.bf16.msrb.mxu3 %v7711_v10  ;;  %1829 = vmatpush.bf16.msra.mxu1 %v7575_v58  ;;  %v7832_v10 = vld [vmem:[%s14471_s7 + $0x228] sm:$0xf0] }
  0xf0   : > { %v7835_v12 = vor.u32 %v10177_v9, %v7832_v10  ;;  %1855 = vmatpush.bf16.msra.mxu0 %v7643_v20  ;;  %v7872_v9 = vld [vmem:[%s14471_s7 + $0x270] sm:$0xf0]  ;;  %v10167_v20 = vld [vmem:[%s14471_s7 + $0x1b4] sm:$0xf0] }
  0xf2   : > { %7886 = vmatmul.msk.bf16.vlgmr.msra.gmra.mxu3 %vm1762_vm1, %v11482_v33  ;;  %1871 = vmatpush.bf16.msra.mxu2 %v7835_v12 }
  0xf3   : > { %1882 = vmatpush.bf16.msrb.mxu3 %v7679_v25  ;;  %1898 = vmatpush.bf16.msrb.mxu1 %v7871_v3  ;;  %v7611_v25 = vor.u32 %v10121_v23, %v7608_v24  ;;  %v10175_v3 = vld [vmem:[%s14471_s7 + $0x1f4] sm:$0xf0]  ;;  %v10178_v23 = vld [vmem:[%s14471_s7 + $0x214] sm:$0xf] }
  0xf4   : > { %v7815_v14 = vor.u32 %v10175_v3, %v7814_v2  ;;  %v7840_v24 = vld [vmem:[%s14471_s7 + $0x230] sm:$0xf0] }
  0xf5   : > { %1856 = vmatpush.bf16.msra.mxu0 %v7611_v25  ;;  %v10122_v3 = vld [vmem:[%s14471_s7 + $0x54] sm:$0xf] }
  0xf7   : > { %1883 = vmatpush.bf16.msrb.mxu3 %v7647_v38  ;;  %1899 = vmatpush.bf16.msrb.mxu1 %v7839_v15  ;;  %v10162_v15 = vld [vmem:[%s14471_s7 + $0x194] sm:$0xf] }
  0xf9   : > { %1857 = vmatpush.bf16.msra.mxu0 %v7579_v37 }
  0xfb   : > { %1884 = vmatpush.bf16.msrb.mxu3 %v7615_v50  ;;  %v7878_v50 = vld [vmem:[%s14471_s7 + $0x258] sm:$0xf] }
  0xfc   : > { %v7879_v54 = vor.u32 %v10191_v53, %v7878_v50  ;;  %v7816_v50 = vld [vmem:[%s14471_s7 + $0x1f8] sm:$0xf0]  ;;  %v10143_v53 = vld [vmem:[%s14471_s7 + $0xf4] sm:$0xf0] }
  0xff   : > { %1885 = vmatpush.bf16.msrb.mxu3 %v7583_v4  ;;  %v10186_v4 = vld [vmem:[%s14471_s7 + $0x254] sm:$0xf] }
 0x103   : > { %1954 = vmatpush.bf16.msra.mxu3 %v7879_v54 }
 0x107   : > { %1955 = vmatpush.bf16.msra.mxu3 %v7847_v62  ;;  %v7784_v62 = vld [vmem:[%s14471_s7 + $0x1b8] sm:$0xf0] }
 0x136   : > { %v1139_v8 = vpop.f32.mrf.mxu0 }
 0x137   : > { %v1140_v26 = vadd.f32 %v1139_v8, %v802_v21 }
 0x13c   : > { %v1167_v16 = vpop.f32.mrf.mxu2 }
 0x13d   : > { %v1168_v27 = vadd.f32 %v1167_v16, %v803_v22 }
 0x13e   : > { %v1141_v28 = vpop.f32.mrf.mxu0 }
 0x13f   : > { %v1153_v19 = vpop.f32.mrf.mxu1  ;;  %v1142_v39 = vadd.f32 %v1141_v28, %v802_v21  ;;  %v7875_v21 = vor.u32 %v10186_v4, %v7872_v9  ;;  %v2696_v4 = vld [vmem:[%s11029_s18] sm:$0xf]  ;;  %v10260_v9 = vld [vmem:[%s14474_s10 + $0x18] sm:$0xff] }
 0x140   : > { %v1154_v30 = vadd.f32 %v1153_v19, %v1140_v26  ;;  %v7782_v19 = vld [vmem:[%s14471_s7 + $0x198] sm:$0xf]  ;;  %2700 = vrot.lane.b32.xlu0 %v2696_v4, %s10739_s19  ;;  %v10206_v4 = vld [vmem:[%s14473_s9 + $0x68] sm:$0xff] }
 0x141   : > { %v7783_v28 = vor.u32 %v10167_v20, %v7782_v19  ;;  %v7584_v19 = vld [vmem:[%s14471_s7 + $0x30] sm:$0xf0]  ;;  %v10147_v20 = vld [vmem:[%s14471_s7 + $0x11c] sm:$0xf] }
 0x144   : > { %v1169_v32 = vpop.f32.mrf.mxu2 }
 0x145   : > { %v1181_v29 = vpop.f32.mrf.mxu3  ;;  %v1170_v40 = vadd.f32 %v1169_v32, %v803_v22 }
 0x146   : > { %v1182_v31 = vadd.f32 %v1181_v29, %v1168_v27  ;;  %v1195_v44 = vpop.f32.mrf.mxu0  ;;  %v7779_v27 = vor.u32 %v10162_v15, %v7776_v18  ;;  %v10154_v29 = vld [vmem:[%s14471_s7 + $0x154] sm:$0xf] }
 0x147   : > { %v1155_v36 = vpop.f32.mrf.mxu1  ;;  %v1196_v55 = vadd.f32 %v1195_v44, %v804_v47  ;;  %v7718_v44 = vld [vmem:[%s14471_s7 + $0x118] sm:$0xf] }
 0x148   : > { %v1242_v38 = vpack.c.bf16 %v1182_v31, %v1154_v30  ;;  %v1156_v42 = vadd.f32 %v1155_v36, %v1142_v39  ;;  %v7744_v30 = vld [vmem:[%s14471_s7 + $0x170] sm:$0xf0]  ;;  %v7843_v36 = vor.u32 %v10178_v23, %v7840_v24  ;;  %v10119_v23 = vld [vmem:[%s14471_s7 + $0x34] sm:$0xf0]  ;;  %v10187_v24 = vld [vmem:[%s14471_s7 + $0x25c] sm:$0xf] }
 0x14a   : > { %1246 = vst [vmem:[#allocation2] sm:$0xf] %v1242_v38  ;;  %v2690_v46 = vrot.slane %v1242_v38, 4 }
 0x14c   : > { %v1223_v45 = vpop.f32.mrf.mxu2 }
 0x14d   : > { %v1183_v41 = vpop.f32.mrf.mxu3  ;;  %v1224_v56 = vadd.f32 %v1223_v45, %v805_v49  ;;  %v10151_v45 = vld [vmem:[%s14471_s7 + $0x134] sm:$0xf0] }
 0x14e   : > { %v1184_v43 = vadd.f32 %v1183_v41, %v1170_v40  ;;  %v1197_v6 = vpop.f32.mrf.mxu0  ;;  %v7747_v40 = vor.u32 %v10154_v29, %v7744_v30  ;;  %v7751_v41 = vor.u32 %v10159_v35, %v7750_v34  ;;  %v7688_v34 = vld [vmem:[%s14471_s7 + $0xf8] sm:$0xf0] }
 0x14f   : > { %v1209_v52 = vpop.f32.mrf.mxu1  ;;  %v1198_v16 = vadd.f32 %v1197_v6, %v804_v47  ;;  %v7719_v47 = vor.u32 %v10151_v45, %v7718_v44  ;;  %v10200_v35 = vld [vmem:[%s14473_s9 + $0x38] sm:$0xff]  ;;  %v10199_v45 = vld [vmem:[%s14473_s9 + $0x30] sm:$0xff] }
 0x150   : > { %v1244_v48 = vpack.c.bf16 %v1184_v43, %v1156_v42  ;;  %v1210_v60 = vadd.f32 %v1209_v52, %v1196_v55  ;;  %v10146_v42 = vld [vmem:[%s14471_s7 + $0x114] sm:$0xf]  ;;  %v7686_v52 = vld [vmem:[%s14471_s7 + $0xd8] sm:$0xf] }
 0x151   : > { %v7558_v51 = vld [vmem:[#allocation2] sm:$0xf]  ;;  %v7712_v43 = vld [vmem:[%s14471_s7 + $0x130] sm:$0xf0] }
 0x152   : > { %2694 = vst [vmem:[#allocation2] sm:$0xf] %v2690_v46  ;;  %v2691_v5 = vrot.slane %v1244_v48, 4  ;;  %v7715_v46 = vor.u32 %v10146_v42, %v7712_v43  ;;  %v10131_v42 = vld [vmem:[%s14471_s7 + $0x9c] sm:$0xf] }
 0x153   : > { %1247 = vst [vmem:[#allocation2 + $0x8] sm:$0xf] %v1244_v48  ;;  %v10138_v48 = vld [vmem:[%s14471_s7 + $0xd4] sm:$0xf]  ;;  %v7656_v43 = vld [vmem:[%s14471_s7 + $0xb8] sm:$0xf0] }
 0x154   : > { %v1225_v8 = vpop.f32.mrf.mxu2 }
 0x155   : > { %v1237_v58 = vpop.f32.mrf.mxu3  ;;  %v1226_v17 = vadd.f32 %v1225_v8, %v805_v49  ;;  %v10171_v49 = vld [vmem:[%s14471_s7 + $0x1dc] sm:$0xf] }
 0x156   : > { %v1238_v61 = vadd.f32 %v1237_v58, %v1224_v56  ;;  %v7819_v56 = vor.u32 %v10171_v49, %v7816_v50  ;;  %v7752_v8 = vld [vmem:[%s14471_s7 + $0x178] sm:$0xf0]  ;;  %v10198_v49 = vld [vmem:[%s14473_s9 + $0x28] sm:$0xff]  ;;  %v10215_v50 = vld [vmem:[%s14473_s9 + $0xb0] sm:$0xff] }
 0x157   : > { %v1211_v12 = vpop.f32.mrf.mxu1 }
 0x158   : > { %v1243_v1 = vpack.c.bf16 %v1238_v61, %v1210_v60  ;;  %v1212_v25 = vadd.f32 %v1211_v12, %v1198_v16  ;;  %v7687_v60 = vor.u32 %v10143_v53, %v7686_v52  ;;  %v10163_v61 = vld [vmem:[%s14471_s7 + $0x19c] sm:$0xf]  ;;  %v7622_v12 = vld [vmem:[%s14471_s7 + $0x58] sm:$0xf]  ;;  %v10114_v16 = vld [vmem:[%s14471_s7 + $0x14] sm:$0xf] }
 0x159   : > { %v8171_v7 = vld [vmem:[#allocation2] sm:$0xf]  ;;  %v7787_v2 = vor.u32 %v10163_v61, %v7784_v62  ;;  %v7587_v29 = vor.u32 %v10114_v16, %v7584_v19  ;;  %v10214_v52 = vld [vmem:[%s14473_s9 + $0xa8] sm:$0xff]  ;;  %v10115_v53 = vld [vmem:[%s14471_s7 + $0x1c] sm:$0xf] }
 0x15a   : > { %v10111_v10 = vld [vmem:[#allocation2 + $0x4] sm:$0xf0]  ;;  %4151 = vst [vmem:[#allocation2] sm:$0xf] %v1243_v1  ;;  %v5608_v31 = vrot.slane %v1243_v1, 4  ;;  %v10195_v61 = vld [vmem:[%s14473_s9 + $0x10] sm:$0xff] }
 0x15b   : > { %v11760_v11 = vor.u32 %v10111_v10, %v7558_v51  ;;  %2695 = vst [vmem:[#allocation2 + $0x8] sm:$0xf] %v2691_v5  ;;  %v7680_v51 = vld [vmem:[%s14471_s7 + $0xf0] sm:$0xf0]  ;;  %v10135_v1 = vld [vmem:[%s14471_s7 + $0xb4] sm:$0xf0]  ;;  %v7651_v5 = vor.u32 %v10130_v57, %v7648_v63 }
 0x15c   : > { %v7683_v59 = vor.u32 %v10138_v48, %v7680_v51  ;;  %v7655_v6 = vor.u32 %v10135_v1, %v7654_v0  ;;  %v7616_v10 = vld [vmem:[%s14471_s7 + $0x70] sm:$0xf0]  ;;  %v7624_v48 = vld [vmem:[%s14471_s7 + $0x78] sm:$0xf0]  ;;  %v10194_v62 = vld [vmem:[%s14473_s9 + $0x8] sm:$0xff] }
 0x15d   : > { %1774 = vmatmul.bf16.vlgmr.msrb.gmra.mxu0 %v11760_v11  ;;  %1802 = vmatmul.bf16.vlgmr.msrb.gmra.mxu2 %v11760_v11  ;;  %v1239_v22 = vpop.f32.mrf.mxu3  ;;  %v10196_v57 = vld [vmem:[%s14473_s9 + $0x18] sm:$0xff]  ;;  %v10211_v0 = vld [vmem:[%s14473_s9 + $0x90] sm:$0xff]  ;;  %v10193_v1 = vld [vmem:[%s14473_s9] sm:$0xff] }
 0x15e   : > { %1830 = vmatmul.bf16.vlgmr.msra.gmra.mxu1 %v11760_v11  ;;  %1886 = vmatmul.bf16.vlgmr.msrb.gmra.mxu3 %v11760_v11  ;;  %v1240_v26 = vadd.f32 %v1239_v22, %v1226_v17  ;;  %v7619_v17 = vor.u32 %v10122_v3, %v7616_v10  ;;  %v7590_v22 = vld [vmem:[%s14471_s7 + $0x18] sm:$0xf]  ;;  %v10231_v3 = vld [vmem:[%s14473_s9 + $0x130] sm:$0xff]  ;;  %v10209_v10 = vld [vmem:[%s14473_s9 + $0x80] sm:$0xff] }
 0x15f   : > { %1906 = vmatpush.bf16.msrb.mxu2 %v7811_v13  ;;  %1934 = vmatpush.bf16.msra.mxu1 %v7815_v14  ;;  %v10127_v13 = vld [vmem:[%s14471_s7 + $0x74] sm:$0xf0]  ;;  %v10259_v14 = vld [vmem:[%s14474_s10 + $0x10] sm:$0xff]  ;;  %v7591_v30 = vor.u32 %v10119_v23, %v7590_v22  ;;  %v10226_v23 = vld [vmem:[%s14473_s9 + $0x108] sm:$0xff] }
 0x160   : > { %v1245_v32 = vpack.c.bf16 %v1240_v26, %v1212_v25  ;;  %1926 = vmatpush.bf16.msrb.mxu0 %v7875_v21  ;;  %2173 = vmatpush.bf16.msrb.mxu3 %v10260_v9  ;;  %v7623_v18 = vor.u32 %v10127_v13, %v7622_v12  ;;  %v7720_v21 = vld [vmem:[%s14471_s7 + $0x138] sm:$0xf0]  ;;  %v2697_v26 = vld [vmem:[%s11029_s18 + $0x4] sm:$0xf]  ;;  %v10227_v19 = vld [vmem:[%s14473_s9 + $0x110] sm:$0xff] }
 0x161   : > { %v8784_v37 = vld [vmem:[#allocation2] sm:$0xf]  ;;  %v7880_v25 = vld [vmem:[%s14471_s7 + $0x278] sm:$0xf0]  ;;  %2702 = vrot.lane.b32.xlu0 %v2697_v26, %s10739_s19  ;;  %v10203_v22 = vld [vmem:[%s14473_s9 + $0x50] sm:$0xff] }
 0x162   : > { %5612 = vst [vmem:[#allocation2] sm:$0xf] %v5608_v31  ;;  %v10262_v38 = vld [vmem:[#allocation2 + $0x4] sm:$0xf0]  ;;  %v5609_v54 = vrot.slane %v1245_v32, 4  ;;  %v7883_v31 = vor.u32 %v10187_v24, %v7880_v25  ;;  %v10208_v63 = vld [vmem:[%s14473_s9 + $0x78] sm:$0xff] }
 0x163   : > { %v11796_v39 = vor.u32 %v10262_v38, %v8171_v7  ;;  %4152 = vst [vmem:[#allocation2 + $0x8] sm:$0xf] %v1245_v32  ;;  %1907 = vmatpush.bf16.msrb.mxu2 %v7779_v27  ;;  %1935 = vmatpush.bf16.msra.mxu1 %v7783_v28  ;;  %v10155_v7 = vld [vmem:[%s14471_s7 + $0x15c] sm:$0xf]  ;;  %v10258_v27 = vld [vmem:[%s14474_s10 + $0x8] sm:$0xff]  ;;  %v7723_v28 = vor.u32 %v10147_v20, %v7720_v21  ;;  %v10257_v38 = vld [vmem:[%s14474_s10] sm:$0xff] }
 0x164   : > { %1927 = vmatpush.bf16.msrb.mxu0 %v7843_v36  ;;  %v7755_v15 = vor.u32 %v10155_v7, %v7752_v8  ;;  %2174 = vmatpush.bf16.msrb.mxu3 %v10259_v14  ;;  %v10139_v32 = vld [vmem:[%s14471_s7 + $0xdc] sm:$0xf]  ;;  %v10230_v8 = vld [vmem:[%s14473_s9 + $0x128] sm:$0xff]  ;;  %v10229_v9 = vld [vmem:[%s14473_s9 + $0x120] sm:$0xff] }
 0x165   : > { %v10179_v36 = vld [vmem:[%s14471_s7 + $0x21c] sm:$0xf]  ;;  %v10205_v13 = vld [vmem:[%s14473_s9 + $0x60] sm:$0xff]  ;;  %v10223_v20 = vld [vmem:[%s14473_s9 + $0xf0] sm:$0xff] }
 0x166   : > { %v10248_v12 = vld [vmem:[%s14473_s9 + $0x1b8] sm:$0xff]  ;;  %v10246_v21 = vld [vmem:[%s14473_s9 + $0x1a8] sm:$0xff]  ;;  %v10245_v25 = vld [vmem:[%s14473_s9 + $0x1a0] sm:$0xff] }
 0x167   : > { %1908 = vmatpush.bf16.msrb.mxu2 %v7747_v40  ;;  %1936 = vmatpush.bf16.msra.mxu1 %v7751_v41  ;;  %v7691_v40 = vor.u32 %v10139_v32, %v7688_v34  ;;  %v10216_v41 = vld [vmem:[%s14473_s9 + $0xb8] sm:$0xff]  ;;  %v10222_v24 = vld [vmem:[%s14473_s9 + $0xe8] sm:$0xff]  ;;  %v10201_v32 = vld [vmem:[%s14473_s9 + $0x40] sm:$0xff] }
 0x168   : > { %2175 = vmatpush.bf16.msrb.mxu3 %v10258_v27  ;;  %v10228_v14 = vld [vmem:[%s14473_s9 + $0x118] sm:$0xff]  ;;  %v12071_v27 = vpop.f32.mrf.mxu1 }
 0x169   : > { %v10224_v16 = vld [vmem:[%s14473_s9 + $0xf8] sm:$0xff] }
 0x16a   : > { %v10413_v55 = vld [vmem:[#allocation2 + $0x4] sm:$0xf0]  ;;  %v10240_v34 = vld [vmem:[%s14473_s9 + $0x178] sm:$0xff] }
 0x16b   : > { %v11831_v58 = vor.u32 %v10413_v55, %v8784_v37  ;;  %5613 = vst [vmem:[#allocation2 + $0x8] sm:$0xf] %v5609_v54  ;;  %1909 = vmatpush.bf16.msrb.mxu2 %v7715_v46  ;;  %1937 = vmatpush.bf16.msra.mxu1 %v7719_v47  ;;  %v7848_v37 = vld [vmem:[%s14471_s7 + $0x238] sm:$0xf0]  ;;  %v7659_v46 = vor.u32 %v10131_v42, %v7656_v43  ;;  %v10197_v55 = vld [vmem:[%s14473_s9 + $0x20] sm:$0xff]  ;;  %v10242_v42 = vld [vmem:[%s14473_s9 + $0x188] sm:$0xff] }
 0x16c   : > { %v7851_v44 = vor.u32 %v10179_v36, %v7848_v37  ;;  %2176 = vmatpush.bf16.msrb.mxu3 %v10257_v38  ;;  %v10123_v47 = vld [vmem:[%s14471_s7 + $0x5c] sm:$0xf]  ;;  %v10243_v36 = vld [vmem:[%s14473_s9 + $0x190] sm:$0xff]  ;;  %v10238_v43 = vld [vmem:[%s14473_s9 + $0x168] sm:$0xff] }
 0x16d   : > { %1858 = vmatmul.bf16.vlgmr.msra.gmra.mxu0 %v11760_v11  ;;  %7887 = vmatmul.msk.bf16.vlgmr.msra.gmra.mxu2 %vm1762_vm1, %v11482_v33  ;;  %v7627_v51 = vor.u32 %v10123_v47, %v7624_v48  ;;  %v7592_v54 = vld [vmem:[%s14471_s7 + $0x38] sm:$0xf0]  ;;  %v10239_v37 = vld [vmem:[%s14473_s9 + $0x170] sm:$0xff]  ;;  %v10217_v47 = vld [vmem:[%s14473_s9 + $0xc0] sm:$0xff] }
 0x16e   : > { %7888 = vmatmul.msk.bf16.vlgmr.msrb.gmra.mxu1 %vm1762_vm1, %v11482_v33  ;;  %1962 = vmatpush.bf16.msra.mxu0 %v7819_v56  ;;  %v7595_v56 = vor.u32 %v10115_v53, %v7592_v54  ;;  %v12124_v48 = vld [vmem:[%s14472_s8] sm:$0xff]  ;;  %v10256_v54 = vld [vmem:[%s14473_s9 + $0x1f8] sm:$0xff] }
 0x16f   : > { %1910 = vmatpush.bf16.msrb.mxu2 %v7683_v59  ;;  %1938 = vmatpush.bf16.msra.mxu1 %v7687_v60  ;;  %v10213_v59 = vld [vmem:[%s14473_s9 + $0xa0] sm:$0xff]  ;;  %v10212_v60 = vld [vmem:[%s14473_s9 + $0x98] sm:$0xff]  ;;  %v1337_v53 = vperm.slane %v12124_v48, 0 }
 0x170   : > { %7890 = vmatmul.msk.bf16.vlgmr.msra.gmra.mxu3 %vm1762_vm1, %v11482_v33 }
 0x171   : > { %2595 = vmatpush.bf16.msra.mxu3 %v10216_v41  ;;  %v10219_v41 = vld [vmem:[%s14473_s9 + $0xd0] sm:$0xff] }
 0x172   : > { %1963 = vmatpush.bf16.msra.mxu0 %v7787_v2  ;;  %v10232_v2 = vld [vmem:[%s14473_s9 + $0x138] sm:$0xff] }
 0x173   : > { %1911 = vmatpush.bf16.msrb.mxu2 %v7651_v5  ;;  %1939 = vmatpush.bf16.msra.mxu1 %v7655_v6  ;;  %v7894_v5 = vld [vmem:[%s12008_s29] sm:$0xf]  ;;  %v10192_v6 = vld [vmem:[%s12008_s29 + $0x4] sm:$0xf0] }
 0x174   : > { %v7895_v7 = vor.u32 %v10192_v6, %v7894_v5  ;;  %v10234_v5 = vld [vmem:[%s14473_s9 + $0x148] sm:$0xff] }
 0x175   : > { %2596 = vmatpush.bf16.msra.mxu3 %v10215_v50 }
 0x176   : > { %1964 = vmatpush.bf16.msra.mxu0 %v7755_v15  ;;  %v12037_v15 = vpop.f32.mrf.mxu3 }
 0x177   : > { %1912 = vmatpush.bf16.msrb.mxu2 %v7619_v17  ;;  %1940 = vmatpush.bf16.msra.mxu1 %v7623_v18  ;;  %v10247_v17 = vld [vmem:[%s14473_s9 + $0x1b0] sm:$0xff]  ;;  %v10204_v18 = vld [vmem:[%s14473_s9 + $0x58] sm:$0xff] }
 0x179   : > { %2597 = vmatpush.bf16.msra.mxu3 %v10214_v52  ;;  %v10236_v52 = vld [vmem:[%s14473_s9 + $0x158] sm:$0xff] }
 0x17a   : > { %1965 = vmatpush.bf16.msra.mxu0 %v7723_v28  ;;  %v10202_v28 = vld [vmem:[%s14473_s9 + $0x48] sm:$0xff] }
 0x17b   : > { %1913 = vmatpush.bf16.msrb.mxu2 %v7587_v29  ;;  %1941 = vmatpush.bf16.msra.mxu1 %v7591_v30  ;;  %v10225_v29 = vld [vmem:[%s14473_s9 + $0x100] sm:$0xff] }
 0x17c   : > { %v10221_v30 = vld [vmem:[%s14473_s9 + $0xe0] sm:$0xff] }
 0x17d   : > { %7889 = vmatmul.msk.bf16.vlgmr.msrb.gmra.mxu0 %vm1762_vm1, %v11482_v33  ;;  %2598 = vmatpush.bf16.msra.mxu3 %v10213_v59 }
 0x17e   : > { %1914 = vmatmul.bf16.vlgmr.msrb.gmra.mxu2 %v11760_v11  ;;  %1942 = vmatmul.bf16.vlgmr.msra.gmra.mxu1 %v11760_v11  ;;  %v12069_v26 = vpop.f32.mrf.mxu3 }
 0x17f   : > { %1982 = vmatpush.bf16.msra.mxu2 %v7883_v31  ;;  %2567 = vmatpush.bf16.msrb.mxu1 %v10200_v35  ;;  %v10244_v31 = vld [vmem:[%s14473_s9 + $0x198] sm:$0xff] }
 0x180   : > { %1966 = vmatpush.bf16.msra.mxu0 %v7691_v40  ;;  %7912 = vmatmul.msk.bf16.vlgmr.msrb.gmra.mxu3 %vm2165_vm2, %v7895_v7  ;;  %v10220_v35 = vld [vmem:[%s14473_s9 + $0xd8] sm:$0xff]  ;;  %v1791_v40 = vpop.f32.mrf.mxu1 }
 0x181   : > { %2599 = vmatpush.bf16.msra.mxu3 %v10212_v60  ;;  %v10255_v60 = vld [vmem:[%s14473_s9 + $0x1f0] sm:$0xff] }
 0x183   : > { %1983 = vmatpush.bf16.msra.mxu2 %v7851_v44  ;;  %2568 = vmatpush.bf16.msrb.mxu1 %v10199_v45  ;;  %v10218_v44 = vld [vmem:[%s14473_s9 + $0xc8] sm:$0xff]  ;;  %v10241_v45 = vld [vmem:[%s14473_s9 + $0x180] sm:$0xff] }
 0x184   : > { %1967 = vmatpush.bf16.msra.mxu0 %v7659_v46  ;;  %v10237_v46 = vld [vmem:[%s14473_s9 + $0x160] sm:$0xff] }
 0x185   : > { %2600 = vmatpush.bf16.msra.mxu3 %v10211_v0 }
 0x186   : > { %v1845_v38 = vpop.f32.mrf.mxu3 }
 0x187   : > { %2569 = vmatpush.bf16.msrb.mxu1 %v10198_v49  ;;  %2581 = vmatpush.bf16.msrb.mxu2 %v10208_v63  ;;  %v1338_v63 = vperm.slane %v12124_v48, 1 }
 0x188   : > { %1968 = vmatpush.bf16.msra.mxu0 %v7627_v51 }
 0x18b   : > { %2570 = vmatpush.bf16.msrb.mxu1 %v10197_v55  ;;  %v1339_v55 = vperm.slane %v12124_v48, 2 }
 0x18c   : > { %1969 = vmatpush.bf16.msra.mxu0 %v7595_v56 }
 0x18e   : > { %7891 = vmatmul.msk.bf16.vlgmr.msra.gmra.mxu2 %vm1762_vm1, %v11482_v33  ;;  %v10207_v33 = vld [vmem:[%s14473_s9 + $0x70] sm:$0xff]  ;;  %v1847_v50 = vpop.f32.mrf.mxu3 }
 0x18f   : > { %2571 = vmatpush.bf16.msrb.mxu1 %v10196_v57  ;;  %1970 = vmatmul.bf16.vlgmr.msra.gmra.mxu0 %v11760_v11  ;;  %v10210_v11 = vld [vmem:[%s14473_s9 + $0x88] sm:$0xff]  ;;  %v10235_v57 = vld [vmem:[%s14473_s9 + $0x150] sm:$0xff] }
 0x190   : > { %2582 = vmatpush.bf16.msrb.mxu2 %v10207_v33  ;;  %2601 = vmatpush.bf16.msra.mxu3 %v10210_v11  ;;  %v8403_v11 = vld [vmem:[%s14471_s7 + $0x1c0] sm:$0xf] }
 0x191   : > { %2609 = vmatpush.bf16.msrb.mxu0 %v10224_v16 }
 0x193   : > { %2572 = vmatpush.bf16.msrb.mxu1 %v10195_v61 }
 0x194   : > { %2583 = vmatpush.bf16.msrb.mxu2 %v10206_v4  ;;  %2602 = vmatpush.bf16.msra.mxu3 %v10209_v10  ;;  %v8405_v4 = vld [vmem:[%s14471_s7 + $0x1e0] sm:$0xf0] }
 0x195   : > { %2610 = vmatpush.bf16.msrb.mxu0 %v10223_v20 }
 0x197   : > { %2573 = vmatpush.bf16.msrb.mxu1 %v10194_v62 }
 0x198   : > { %2651 = vmatpush.bf16.msrb.mxu3 %v10248_v12  ;;  %2584 = vmatpush.bf16.msrb.mxu2 %v10205_v13 }
 0x199   : > { %2611 = vmatpush.bf16.msrb.mxu0 %v10222_v24  ;;  %v10233_v24 = vld [vmem:[%s14473_s9 + $0x140] sm:$0xff] }
 0x19b   : > { %2574 = vmatpush.bf16.msrb.mxu1 %v10193_v1  ;;  %v10323_v1 = vld [vmem:[%s14471_s7 + $0x1dc] sm:$0xf0] }
 0x19c   : > { %2652 = vmatpush.bf16.msrb.mxu3 %v10247_v17  ;;  %2585 = vmatpush.bf16.msrb.mxu2 %v10204_v18  ;;  %v8404_v13 = vor.u32 %v10323_v1, %v8403_v11  ;;  %v8371_v17 = vld [vmem:[%s14471_s7 + $0x180] sm:$0xf] }
 0x19d   : > { %2612 = vmatpush.bf16.msrb.mxu0 %v10221_v30  ;;  %v10315_v18 = vld [vmem:[%s14471_s7 + $0x19c] sm:$0xf0] }
 0x19e   : > { %v10291_v11 = vld [vmem:[%s14471_s7 + $0xdc] sm:$0xf0] }
 0x19f   : > { %2623 = vmatpush.bf16.msra.mxu1 %v10232_v2 }
 0x1a0   : > { %2653 = vmatpush.bf16.msrb.mxu3 %v10246_v21  ;;  %2586 = vmatpush.bf16.msrb.mxu2 %v10203_v22  ;;  %v10311_v22 = vld [vmem:[%s14471_s7 + $0x184] sm:$0xf] }
 0x1a1   : > { %2613 = vmatpush.bf16.msrb.mxu0 %v10220_v35 }
 0x1a3   : > { %2624 = vmatpush.bf16.msra.mxu1 %v10231_v3  ;;  %v10319_v3 = vld [vmem:[%s14471_s7 + $0x1c4] sm:$0xf] }
 0x1a4   : > { %2654 = vmatpush.bf16.msrb.mxu3 %v10245_v25  ;;  %2587 = vmatpush.bf16.msrb.mxu2 %v10202_v28  ;;  %v8467_v28 = vld [vmem:[%s14471_s7 + $0x240] sm:$0xf] }
 0x1a5   : > { %2614 = vmatpush.bf16.msrb.mxu0 %v10219_v41  ;;  %v10303_v41 = vld [vmem:[%s14471_s7 + $0x144] sm:$0xf] }
 0x1a7   : > { %2625 = vmatpush.bf16.msra.mxu1 %v10230_v8 }
 0x1a8   : > { %2655 = vmatpush.bf16.msrb.mxu3 %v10244_v31  ;;  %2588 = vmatpush.bf16.msrb.mxu2 %v10201_v32  ;;  %v8372_v31 = vor.u32 %v10315_v18, %v8371_v17  ;;  %v10279_v18 = vld [vmem:[%s14471_s7 + $0x84] sm:$0xf] }
 0x1a9   : > { %2615 = vmatpush.bf16.msrb.mxu0 %v10218_v44  ;;  %v8435_v44 = vld [vmem:[%s14471_s7 + $0x200] sm:$0xf] }
 0x1ab   : > { %2626 = vmatpush.bf16.msra.mxu1 %v10229_v9  ;;  %v10254_v9 = vld [vmem:[%s14473_s9 + $0x1e8] sm:$0xff] }
 0x1ac   : > { %2637 = vmatpush.bf16.msra.mxu2 %v10240_v34  ;;  %2656 = vmatpush.bf16.msrb.mxu3 %v10243_v36  ;;  %v8339_v36 = vld [vmem:[%s14471_s7 + $0x140] sm:$0xf] }
 0x1ad   : > { %2616 = vmatpush.bf16.msrb.mxu0 %v10217_v47  ;;  %v1341_v47 = vperm.slane %v12124_v48, 4 }
 0x1af   : > { %2627 = vmatpush.bf16.msra.mxu1 %v10228_v14 }
 0x1b0   : > { %2638 = vmatpush.bf16.msra.mxu2 %v10239_v37  ;;  %2657 = vmatpush.bf16.msrb.mxu3 %v10242_v42  ;;  %v10307_v37 = vld [vmem:[%s14471_s7 + $0x15c] sm:$0xf0] }
 0x1b1   : > { %2665 = vmatpush.bf16.msra.mxu0 %v10256_v54  ;;  %v10295_v54 = vld [vmem:[%s14471_s7 + $0x104] sm:$0xf] }
 0x1b3   : > { %2628 = vmatpush.bf16.msra.mxu1 %v10227_v19  ;;  %v8408_v19 = vor.u32 %v10319_v3, %v8405_v4  ;;  %v10287_v3 = vld [vmem:[%s14471_s7 + $0xc4] sm:$0xf] }
 0x1b4   : > { %2639 = vmatpush.bf16.msra.mxu2 %v10238_v43  ;;  %2658 = vmatpush.bf16.msrb.mxu3 %v10241_v45  ;;  %v10252_v43 = vld [vmem:[%s14473_s9 + $0x1d8] sm:$0xff]  ;;  %v10331_v45 = vld [vmem:[%s14471_s7 + $0x21c] sm:$0xf0]  ;;  %v8277_v4 = vld [vmem:[%s14471_s7 + $0xe0] sm:$0xf0] }
 0x1b5   : > { %2666 = vmatpush.bf16.msra.mxu0 %v10255_v60 }
 0x1b7   : > { %2629 = vmatpush.bf16.msra.mxu1 %v10226_v23  ;;  %v8373_v23 = vld [vmem:[%s14471_s7 + $0x1a0] sm:$0xf0] }
 0x1b8   : > { %2640 = vmatpush.bf16.msra.mxu2 %v10237_v46  ;;  %v8340_v46 = vor.u32 %v10307_v37, %v8339_v36  ;;  %v10335_v37 = vld [vmem:[%s14471_s7 + $0x244] sm:$0xf] }
 0x1b9   : > { %2667 = vmatpush.bf16.msra.mxu0 %v10254_v9 }
 0x1bb   : > { %2630 = vmatpush.bf16.msra.mxu1 %v10225_v29  ;;  %v10339_v29 = vld [vmem:[%s14471_s7 + $0x25c] sm:$0xf0] }
 0x1bc   : > { %2641 = vmatpush.bf16.msra.mxu2 %v10236_v52 }
 0x1c0   : > { %2642 = vmatpush.bf16.msra.mxu2 %v10235_v57 }
 0x1c4   : > { %2643 = vmatpush.bf16.msra.mxu2 %v10234_v5 }
 0x1c8   : > { %2644 = vmatpush.bf16.msra.mxu2 %v10233_v24 }
 0x1da   : > { %v1775_v49 = vpop.f32.mrf.mxu0 }
 0x1db   : > { %v1831_v51 = vpop.f32.mrf.mxu1  ;;  %v1776_v59 = vadd.f32 %v1775_v49, %v1337_v53 }
 0x1dc   : > { %v1832_v61 = vadd.f32 %v1831_v51, %v1339_v55  ;;  %v10299_v51 = vld [vmem:[%s14471_s7 + $0x11c] sm:$0xf0] }
 0x1dd   : > { %v1790_v6 = vadd.f32 %v12071_v27, %v1776_v59  ;;  %v10253_v27 = vld [vmem:[%s14473_s9 + $0x1e0] sm:$0xff] }
 0x1de   : > { %v1846_v10 = vadd.f32 %v1845_v38, %v1832_v61  ;;  %v8376_v38 = vor.u32 %v10311_v22, %v8373_v23  ;;  %2668 = vmatpush.bf16.msra.mxu0 %v10253_v27  ;;  %v10251_v61 = vld [vmem:[%s14473_s9 + $0x1d0] sm:$0xff] }
 0x1e0   : > { %v1803_v56 = vpop.f32.mrf.mxu2 }
 0x1e1   : > { %v12157_v7 = vpop.f32.mrf.mxu3  ;;  %v1804_v14 = vadd.f32 %v1803_v56, %v1338_v63  ;;  %v8436_v56 = vor.u32 %v10331_v45, %v8435_v44  ;;  %v10263_v44 = vld [vmem:[%s14471_s7 + $0x4] sm:$0xf] }
 0x1e2   : > { %v1777_v62 = vpop.f32.mrf.mxu0  ;;  %2669 = vmatpush.bf16.msra.mxu0 %v10252_v43  ;;  %v8413_v43 = vld [vmem:[%s14471_s7 + $0x1e8] sm:$0xf0]  ;;  %v8181_v45 = vld [vmem:[%s14471_s7 + $0x20] sm:$0xf0] }
 0x1e3   : > { %v1778_v0 = vadd.f32 %v1777_v62, %v1337_v53  ;;  %v1833_v33 = vpop.f32.mrf.mxu1  ;;  %v1818_v32 = vadd.f32 %v12037_v15, %v1804_v14  ;;  %v8341_v15 = vld [vmem:[%s14471_s7 + $0x160] sm:$0xf0]  ;;  %v1888_v62 = vadd.f32 %v12157_v7, %v1341_v47  ;;  %v10250_v7 = vld [vmem:[%s14473_s9 + $0x1c8] sm:$0xff]  ;;  %v10283_v14 = vld [vmem:[%s14471_s7 + $0x9c] sm:$0xf0] }
 0x1e4   : > { %v1834_v2 = vadd.f32 %v1833_v33, %v1339_v55  ;;  %v8344_v52 = vor.u32 %v10303_v41, %v8341_v15  ;;  %v8309_v55 = vld [vmem:[%s14471_s7 + $0x120] sm:$0xf0]  ;;  %v8275_v33 = vld [vmem:[%s14471_s7 + $0xc0] sm:$0xf]  ;;  %v10320_v15 = vld [vmem:[%s14471_s7 + $0x1cc] sm:$0xf] }
 0x1e5   : > { %v1792_v8 = vadd.f32 %v1791_v40, %v1778_v0  ;;  %v2701_v40 = vpop.permute.xlu0 %2700  ;;  %v8312_v1 = vor.u32 %v10295_v54, %v8309_v55  ;;  %v10267_v41 = vld [vmem:[%s14471_s7 + $0x1c] sm:$0xf0]  ;;  %v8416_v54 = vor.u32 %v10320_v15, %v8413_v43  ;;  %v10312_v55 = vld [vmem:[%s14471_s7 + $0x18c] sm:$0xf] }
 0x1e6   : > { %v1848_v12 = vadd.f32 %v1847_v50, %v1834_v2  ;;  %2706 = vst.msk [vmem:[#allocation2 + $0x4] sm:$0xf] %vm1250_vm0, %v2701_v40  ;;  %v8307_v50 = vld [vmem:[%s14471_s7 + $0x100] sm:$0xf]  ;;  %2670 = vmatpush.bf16.msra.mxu0 %v10251_v61  ;;  %v8477_v61 = vld [vmem:[%s14471_s7 + $0x268] sm:$0xf0] }
 0x1e7   : > { %v1990_v16 = vpack.c.bf16 %v1792_v8, %v1790_v6  ;;  %v8308_v60 = vor.u32 %v10299_v51, %v8307_v50  ;;  %v8276_v8 = vor.u32 %v10291_v11, %v8275_v33  ;;  %v8179_v40 = vld [vmem:[%s14471_s7] sm:$0xf]  ;;  %v1342_v51 = vperm.slane %v12124_v48, 5 }
 0x1e8   : > { %v1992_v20 = vpack.c.bf16 %v1848_v12, %v1846_v10  ;;  %v1805_v21 = vpop.f32.mrf.mxu2  ;;  %v8180_v50 = vor.u32 %v10267_v41, %v8179_v40  ;;  %v10321_v40 = vld [vmem:[%s14471_s7 + $0x1d4] sm:$0xf] }
 0x1e9   : > { %v1806_v25 = vadd.f32 %v1805_v21, %v1338_v63  ;;  %2575 = vmatmul.bf16.vlgmr.msrb.gmra.mxu1 %v1990_v16  ;;  %v1889_v49 = vpop.f32.mrf.mxu3  ;;  %v1340_v63 = vperm.slane %v12124_v48, 3  ;;  %v8280_v16 = vor.u32 %v10287_v3, %v8277_v4  ;;  %v8421_v41 = vld [vmem:[%s14471_s7 + $0x1f0] sm:$0xf0] }
 0x1ea   : > { %2603 = vmatmul.bf16.vlgmr.msra.gmra.mxu3 %v1992_v20  ;;  %3220 = vmatpush.bf16.msrb.mxu1 %v8404_v13  ;;  %v1859_v30 = vpop.f32.mrf.mxu0  ;;  %v1890_v57 = vadd.f32 %v1889_v49, %v1341_v47  ;;  %v8243_v13 = vld [vmem:[%s14471_s7 + $0x80] sm:$0xf] }
 0x1eb   : > { %v1820_v34 = vadd.f32 %v12069_v26, %v1806_v25  ;;  %v1901_v35 = vpop.f32.mrf.mxu1  ;;  %3248 = vmatpush.bf16.msra.mxu3 %v8408_v19  ;;  %v8468_v26 = vor.u32 %v10339_v29, %v8467_v28  ;;  %v1860_v9 = vadd.f32 %v1859_v30, %v1340_v63  ;;  %v8245_v19 = vld [vmem:[%s14471_s7 + $0xa0] sm:$0xf0]  ;;  %2671 = vmatpush.bf16.msra.mxu0 %v10250_v7  ;;  %v8211_v29 = vld [vmem:[%s14471_s7 + $0x40] sm:$0xf]  ;;  %v10328_v7 = vld [vmem:[%s14471_s7 + $0x20c] sm:$0xf] }
 0x1ec   : > { %v1902_v6 = vadd.f32 %v1901_v35, %v1888_v62  ;;  %v8244_v24 = vor.u32 %v10283_v14, %v8243_v13  ;;  %v10249_v25 = vld [vmem:[%s14473_s9 + $0x1c0] sm:$0xff]  ;;  %v1343_v35 = vperm.slane %v12124_v48, 6  ;;  %v10324_v13 = vld [vmem:[%s14471_s7 + $0x1e4] sm:$0xf0] }
 0x1ed   : > { %v1991_v42 = vpack.c.bf16 %v1820_v34, %v1818_v32  ;;  %v2703_v5 = vpop.permute.xlu0 %2702  ;;  %v10275_v30 = vld [vmem:[%s14471_s7 + $0x5c] sm:$0xf0]  ;;  %v10271_v32 = vld [vmem:[%s14471_s7 + $0x44] sm:$0xf] }
 0x1ee   : > { %3221 = vmatpush.bf16.msrb.mxu1 %v8372_v31  ;;  %2707 = vst.msk [vmem:[#allocation2 + $0xc] sm:$0xf] %vm1250_vm0, %v2703_v5  ;;  %v8248_v31 = vor.u32 %v10279_v18, %v8245_v19  ;;  %v8213_v34 = vld [vmem:[%s14471_s7 + $0x60] sm:$0xf0]  ;;  %v8212_v36 = vor.u32 %v10275_v30, %v8211_v29  ;;  %v8285_v29 = vld [vmem:[%s14471_s7 + $0xe8] sm:$0xf0] }
 0x1ef   : > { %2589 = vmatmul.bf16.vlgmr.msrb.gmra.mxu2 %v1991_v42  ;;  %3249 = vmatpush.bf16.msra.mxu3 %v8376_v38  ;;  %v8469_v38 = vld [vmem:[%s14471_s7 + $0x260] sm:$0xf0] }
 0x1f0   : > { %v1873_v53 = vpop.f32.mrf.mxu2  ;;  %3240 = vmatpush.bf16.msrb.mxu2 %v8468_v26  ;;  %2672 = vmatpush.bf16.msra.mxu0 %v10249_v25  ;;  %v8216_v26 = vor.u32 %v10271_v32, %v8213_v34  ;;  %v8472_v42 = vor.u32 %v10335_v37, %v8469_v38  ;;  %v10327_v62 = vld [vmem:[%s14471_s7 + $0x204] sm:$0xf]  ;;  %v8379_v25 = vld [vmem:[%s14471_s7 + $0x188] sm:$0xf]  ;;  %v10280_v37 = vld [vmem:[%s14471_s7 + $0x8c] sm:$0xf] }
 0x1f1   : > { %v1874_v20 = vadd.f32 %v1873_v53, %v1860_v9  ;;  %v8347_v32 = vld [vmem:[%s14471_s7 + $0x148] sm:$0xf]  ;;  %v8253_v38 = vld [vmem:[%s14471_s7 + $0xa8] sm:$0xf0] }
 0x1f2   : > { %3222 = vmatpush.bf16.msrb.mxu1 %v8340_v46  ;;  %v1861_v59 = vpop.f32.mrf.mxu0  ;;  %v10308_v34 = vld [vmem:[%s14471_s7 + $0x164] sm:$0xf0]  ;;  %v8256_v43 = vor.u32 %v10280_v37, %v8253_v38 }
 0x1f3   : > { %v1903_v0 = vpop.f32.mrf.mxu1  ;;  %3250 = vmatpush.bf16.msra.mxu3 %v8344_v52  ;;  %v1862_v10 = vadd.f32 %v1861_v59, %v1340_v63  ;;  %v1957_v22 = vpop.f32.mrf.mxu3  ;;  %v8381_v59 = vld [vmem:[%s14471_s7 + $0x1a8] sm:$0xf0]  ;;  %v8437_v63 = vld [vmem:[%s14471_s7 + $0x220] sm:$0xf0] }
 0x1f4   : > { %v1904_v2 = vadd.f32 %v1903_v0, %v1890_v57  ;;  %3241 = vmatpush.bf16.msrb.mxu2 %v8436_v56  ;;  %v8184_v56 = vor.u32 %v10263_v44, %v8181_v45  ;;  %v8440_v11 = vor.u32 %v10327_v62, %v8437_v63  ;;  %v8424_v44 = vor.u32 %v10321_v40, %v8421_v41  ;;  %v10272_v45 = vld [vmem:[%s14471_s7 + $0x4c] sm:$0xf]  ;;  %v10292_v62 = vld [vmem:[%s14471_s7 + $0xe4] sm:$0xf0] }
 0x1f5   : > { %v10264_v63 = vld [vmem:[%s14471_s7 + $0xc] sm:$0xf]  ;;  %v8187_v40 = vld [vmem:[%s14471_s7 + $0x8] sm:$0xf] }
 0x1f6   : > { %3223 = vmatpush.bf16.msrb.mxu1 %v8308_v60  ;;  %v1994_v12 = vpack.c.bf16 %v1904_v2, %v1902_v6  ;;  %v10336_v60 = vld [vmem:[%s14471_s7 + $0x24c] sm:$0xf]  ;;  %v10268_v41 = vld [vmem:[%s14471_s7 + $0x24] sm:$0xf0] }
 0x1f7   : > { %3251 = vmatpush.bf16.msra.mxu3 %v8312_v1  ;;  %v8384_v1 = vor.u32 %v10312_v55, %v8381_v59  ;;  %v10304_v2 = vld [vmem:[%s14471_s7 + $0x14c] sm:$0xf]  ;;  %v8480_v3 = vor.u32 %v10336_v60, %v8477_v61  ;;  %v8283_v61 = vld [vmem:[%s14471_s7 + $0xc8] sm:$0xf] }
 0x1f8   : > { %v1875_v17 = vpop.f32.mrf.mxu2  ;;  %v8349_v6 = vld [vmem:[%s14471_s7 + $0x168] sm:$0xf0] }
 0x1f9   : > { %v1876_v21 = vadd.f32 %v1875_v17, %v1862_v10  ;;  %2631 = vmatmul.bf16.vlgmr.msra.gmra.mxu1 %v1994_v12  ;;  %v8411_v12 = vld [vmem:[%s14471_s7 + $0x1c8] sm:$0xf]  ;;  %v8173_v55 = vld [vmem:[#allocation2 + $0x8] sm:$0xf0] }
 0x1fa   : > { %3224 = vmatpush.bf16.msrb.mxu1 %v8276_v8  ;;  %v12256_v23 = vpop.f32.mrf.mxu0  ;;  %v8445_v8 = vld [vmem:[%s14471_s7 + $0x228] sm:$0xf0] }
 0x1fb   : > { %v1993_v27 = vpack.c.bf16 %v1876_v21, %v1874_v20  ;;  %v1943_v28 = vpop.f32.mrf.mxu1  ;;  %3252 = vmatpush.bf16.msra.mxu3 %v8280_v16  ;;  %v1959_v53 = vpop.f32.mrf.mxu3  ;;  %v8352_v16 = vor.u32 %v10304_v2, %v8349_v6  ;;  %v8448_v17 = vor.u32 %v10328_v7, %v8445_v8  ;;  %v10296_v20 = vld [vmem:[%s14471_s7 + $0x10c] sm:$0xf]  ;;  %v8357_v2 = vld [vmem:[%s14471_s7 + $0x170] sm:$0xf0]  ;;  %v8443_v7 = vld [vmem:[%s14471_s7 + $0x208] sm:$0xf]  ;;  %v8284_v8 = vor.u32 %v10292_v62, %v8283_v61 }
 0x1fc   : > { %v1944_v47 = vadd.f32 %v1943_v28, %v1343_v35  ;;  %v8317_v21 = vld [vmem:[%s14471_s7 + $0x128] sm:$0xf0]  ;;  %v8387_v61 = vld [vmem:[%s14471_s7 + $0x190] sm:$0xf] }
 0x1fd   : > { %2617 = vmatmul.bf16.vlgmr.msrb.gmra.mxu0 %v1993_v27  ;;  %v10316_v27 = vld [vmem:[%s14471_s7 + $0x1a4] sm:$0xf0]  ;;  %v10288_v28 = vld [vmem:[%s14471_s7 + $0xcc] sm:$0xf]  ;;  %v10317_v62 = vld [vmem:[%s14471_s7 + $0x1ac] sm:$0xf0] }
 0x1fe   : > { %3225 = vmatpush.bf16.msrb.mxu1 %v8244_v24  ;;  %3268 = vmatpush.bf16.msrb.mxu0 %v8472_v42  ;;  %v1958_v0 = vadd.f32 %v1957_v22, %v1944_v47  ;;  %v8412_v22 = vor.u32 %v10324_v13, %v8411_v12  ;;  %v10300_v42 = vld [vmem:[%s14471_s7 + $0x124] sm:$0xf0] }
 0x1ff   : > { %3253 = vmatpush.bf16.msra.mxu3 %v8248_v31  ;;  %v8380_v31 = vor.u32 %v10316_v27, %v8379_v25  ;;  %v10343_v12 = vld [vmem:[%s12008_s29 + $0x4] sm:$0xf0] }
 0x200   : > { %v8219_v27 = vld [vmem:[%s14471_s7 + $0x48] sm:$0xf] }
 0x201   : > { %v1915_v46 = vpop.f32.mrf.mxu2 }
 0x202   : > { %3226 = vmatpush.bf16.msrb.mxu1 %v8212_v36  ;;  %v1931_v49 = vpop.f32.mrf.mxu0  ;;  %v1916_v4 = vadd.f32 %v1915_v46, %v1342_v51  ;;  %3269 = vmatpush.bf16.msrb.mxu0 %v8440_v11  ;;  %v8288_v36 = vor.u32 %v10288_v28, %v8285_v29  ;;  %v8189_v11 = vld [vmem:[%s14471_s7 + $0x28] sm:$0xf0]  ;;  %v8453_v28 = vld [vmem:[%s14471_s7 + $0x230] sm:$0xf0]  ;;  %v10276_v29 = vld [vmem:[%s14471_s7 + $0x64] sm:$0xf0] }
 0x203   : > { %v1945_v52 = vpop.f32.mrf.mxu1  ;;  %3254 = vmatpush.bf16.msra.mxu3 %v8216_v26  ;;  %v8315_v26 = vld [vmem:[%s14471_s7 + $0x108] sm:$0xf]  ;;  %v8220_v37 = vor.u32 %v10276_v29, %v8219_v27  ;;  %v10282_v29 = vld [vmem:[%s14471_s7 + $0x9c] sm:$0xf] }
 0x204   : > { %v1946_v57 = vadd.f32 %v1945_v52, %v1343_v35  ;;  %v1930_v18 = vadd.f32 %v12256_v23, %v1916_v4  ;;  %v8320_v23 = vor.u32 %v10296_v20, %v8317_v21  ;;  %v1344_v35 = vperm.slane %v12124_v48, 7  ;;  %v10337_v4 = vld [vmem:[%s14471_s7 + $0x254] sm:$0xf] }
 0x205   : > { %v8348_v48 = vor.u32 %v10308_v34, %v8347_v32  ;;  %v10297_v21 = vld [vmem:[%s14471_s7 + $0x114] sm:$0xf] }
 0x206   : > { %v1960_v33 = vadd.f32 %v1959_v53, %v1946_v57  ;;  %3227 = vmatpush.bf16.msrb.mxu1 %v8180_v50  ;;  %v10313_v50 = vld [vmem:[%s14471_s7 + $0x194] sm:$0xf]  ;;  %v8316_v53 = vor.u32 %v10300_v42, %v8315_v26  ;;  %v10340_v57 = vld [vmem:[%s14471_s7 + $0x264] sm:$0xf0]  ;;  %v8483_v42 = vld [vmem:[%s14471_s7 + $0x250] sm:$0xf] }
 0x207   : > { %3255 = vmatpush.bf16.msra.mxu3 %v8184_v56  ;;  %v8475_v56 = vld [vmem:[%s14471_s7 + $0x248] sm:$0xf] }
 0x208   : > { %v1996_v5 = vpack.c.bf16 %v1960_v33, %v1958_v0  ;;  %v8476_v6 = vor.u32 %v10340_v57, %v8475_v56  ;;  %v8451_v56 = vld [vmem:[%s14471_s7 + $0x210] sm:$0xf] }
 0x209   : > { %v1917_v9 = vpop.f32.mrf.mxu2  ;;  %3228 = vmatmul.bf16.vlgmr.msrb.gmra.mxu1 %v11796_v39  ;;  %v10333_v57 = vld [vmem:[%s14471_s7 + $0x22c] sm:$0xf0] }
 0x20a   : > { %3304 = vmatpush.bf16.msra.mxu1 %v8416_v54  ;;  %v1918_v10 = vadd.f32 %v1917_v9, %v1342_v51  ;;  %2659 = vmatmul.bf16.vlgmr.msrb.gmra.mxu3 %v1996_v5  ;;  %v8389_v51 = vld [vmem:[%s14471_s7 + $0x1b0] sm:$0xf0]  ;;  %v10261_v54 = vld [vmem:[#allocation2 + $0x4] sm:$0xf]  ;;  %v10332_v9 = vld [vmem:[%s14471_s7 + $0x224] sm:$0xf0] }
 0x20b   : > { %3324 = vmatpush.bf16.msrb.mxu3 %v8480_v3  ;;  %v8392_v33 = vor.u32 %v10313_v50, %v8389_v51  ;;  %v8485_v5 = vld [vmem:[%s14471_s7 + $0x270] sm:$0xf0]  ;;  %v12431_v13 = vor.u32 %v10261_v54, %v8173_v55 }
 0x20c   : > { %v1971_v14 = vpop.f32.mrf.mxu0  ;;  %v1932_v19 = vadd.f32 %v1931_v49, %v1918_v10  ;;  %v8221_v49 = vld [vmem:[%s14471_s7 + $0x68] sm:$0xf0]  ;;  %v8507_v10 = vld [vmem:[%s12008_s29] sm:$0xf]  ;;  %v8488_v20 = vor.u32 %v10337_v4, %v8485_v5  ;;  %v8388_v4 = vor.u32 %v10317_v62, %v8387_v61  ;;  %v8395_v5 = vld [vmem:[%s14471_s7 + $0x198] sm:$0xf] }
 0x20d   : > { %v1972_v46 = vadd.f32 %v1971_v14, %v1344_v35  ;;  %v8224_v0 = vor.u32 %v10272_v45, %v8221_v49  ;;  %v8251_v14 = vld [vmem:[%s14471_s7 + $0x88] sm:$0xf]  ;;  %v10325_v45 = vld [vmem:[%s14471_s7 + $0x1ec] sm:$0xf0]  ;;  %v8188_v49 = vor.u32 %v10268_v41, %v8187_v40 }
 0x20e   : > { %3305 = vmatpush.bf16.msra.mxu1 %v8384_v1  ;;  %v1995_v24 = vpack.c.bf16 %v1932_v19, %v1930_v18  ;;  %v10305_v1 = vld [vmem:[%s14471_s7 + $0x154] sm:$0xf]  ;;  %v8192_v18 = vor.u32 %v10264_v63, %v8189_v11  ;;  %v8452_v11 = vor.u32 %v10333_v57, %v8451_v56  ;;  %v8291_v41 = vld [vmem:[%s14471_s7 + $0xd0] sm:$0xf]  ;;  %v8267_v56 = vld [vmem:[%s14471_s7 + $0x98] sm:$0xf] }
 0x20f   : > { %3325 = vmatpush.bf16.msrb.mxu3 %v8448_v17  ;;  %v8508_v17 = vor.u32 %v10343_v12, %v8507_v10  ;;  %v8360_v19 = vor.u32 %v10305_v1, %v8357_v2  ;;  %v10298_v1 = vld [vmem:[%s14471_s7 + $0x11c] sm:$0xf]  ;;  %v10265_v12 = vld [vmem:[%s14471_s7 + $0x14] sm:$0xf]  ;;  %v10286_v57 = vld [vmem:[%s14471_s7 + $0xb4] sm:$0xf0] }
 0x210   : > { %2645 = vmatmul.bf16.vlgmr.msra.gmra.mxu2 %v1995_v24  ;;  %v8444_v24 = vor.u32 %v10332_v9, %v8443_v7  ;;  %v8333_v2 = vld [vmem:[%s14471_s7 + $0x138] sm:$0xf0]  ;;  %v10318_v7 = vld [vmem:[%s14471_s7 + $0x1b4] sm:$0xf0]  ;;  %v10309_v9 = vld [vmem:[%s14471_s7 + $0x16c] sm:$0xf0]  ;;  %v8268_v62 = vor.u32 %v10286_v57, %v8267_v56 }
 0x211   : > { %3276 = vmatpush.bf16.msra.mxu2 %v8412_v22  ;;  %v1985_v30 = vpop.f32.mrf.mxu2  ;;  %v8325_v22 = vld [vmem:[%s14471_s7 + $0x130] sm:$0xf0]  ;;  %3595 = vrot.lane.b32.xlu1 %v8508_v17, %s10740_s23  ;;  %v8336_v10 = vor.u32 %v10298_v1, %v8333_v2  ;;  %v8301_v17 = vld [vmem:[%s14471_s7 + $0xf8] sm:$0xf0]  ;;  %v10277_v61 = vld [vmem:[%s14471_s7 + $0x6c] sm:$0xf0] }
 0x212   : > { %3306 = vmatpush.bf16.msra.mxu1 %v8352_v16  ;;  %v1986_v59 = vadd.f32 %v1985_v30, %v1972_v46  ;;  %v10284_v16 = vld [vmem:[%s14471_s7 + $0xa4] sm:$0xf0]  ;;  %v10322_v30 = vld [vmem:[%s14471_s7 + $0x1dc] sm:$0xf]  ;;  %v8328_v32 = vor.u32 %v10297_v21, %v8325_v22  ;;  %v10281_v46 = vld [vmem:[%s14471_s7 + $0x94] sm:$0xf] }
 0x213   : > { %v8252_v25 = vor.u32 %v10284_v16, %v8251_v14  ;;  %v8197_v14 = vld [vmem:[%s14471_s7 + $0x30] sm:$0xf0]  ;;  %v10290_v16 = vld [vmem:[%s14471_s7 + $0xdc] sm:$0xf]  ;;  %v10269_v1 = vld [vmem:[%s14471_s7 + $0x2c] sm:$0xf0] }
 0x214   : > { %v1973_v15 = vpop.f32.mrf.mxu0  ;;  %v8200_v22 = vor.u32 %v10265_v12, %v8197_v14  ;;  %v8304_v27 = vor.u32 %v10290_v16, %v8301_v17  ;;  %v8491_v2 = vld [vmem:[%s14471_s7 + $0x258] sm:$0xf]  ;;  %v4154_v16 = vld [vmem:[%s11029_s18 + $0x4] sm:$0xf] }
 0x215   : > { %3277 = vmatpush.bf16.msra.mxu2 %v8380_v31  ;;  %v1974_v47 = vadd.f32 %v1973_v15, %v1344_v35  ;;  %v8429_v31 = vld [vmem:[%s14471_s7 + $0x1f8] sm:$0xf0]  ;;  %v10289_v35 = vld [vmem:[%s14471_s7 + $0xd4] sm:$0xf]  ;;  %4159 = vrot.lane.b32.xlu2 %v4154_v16, %s10740_s23  ;;  %v10352_v56 = vld [vmem:[%s14473_s9 + $0x40] sm:$0xff] }
 0x216   : > { %3307 = vmatpush.bf16.msra.mxu1 %v8320_v23  ;;  %v10329_v23 = vld [vmem:[%s14471_s7 + $0x214] sm:$0xf]  ;;  %v8432_v38 = vor.u32 %v10322_v30, %v8429_v31  ;;  %v10314_v15 = vld [vmem:[%s14471_s7 + $0x19c] sm:$0xf]  ;;  %v10364_v57 = vld [vmem:[%s14473_s9 + $0xa0] sm:$0xff] }
 0x217   : > { %v8456_v34 = vor.u32 %v10329_v23, %v8453_v28  ;;  %v8323_v23 = vld [vmem:[%s14471_s7 + $0x110] sm:$0xf]  ;;  %v8269_v31 = vld [vmem:[%s14471_s7 + $0xb8] sm:$0xf0] }
 0x218   : > { %v10301_v28 = vld [vmem:[%s14471_s7 + $0x12c] sm:$0xf0]  ;;  %v8272_v40 = vor.u32 %v10282_v29, %v8269_v31  ;;  %v10351_v17 = vld [vmem:[%s14473_s9 + $0x38] sm:$0xff]  ;;  %v10357_v29 = vld [vmem:[%s14473_s9 + $0x68] sm:$0xff] }
 0x219   : > { %3278 = vmatpush.bf16.msra.mxu2 %v8348_v48  ;;  %v1987_v52 = vpop.f32.mrf.mxu2  ;;  %v8397_v48 = vld [vmem:[%s14471_s7 + $0x1b8] sm:$0xf0]  ;;  %v10409_v31 = vld [vmem:[%s14474_s10 + $0x8] sm:$0xff] }
 0x21a   : > { %3308 = vmatpush.bf16.msra.mxu1 %v8288_v36  ;;  %v1988_v60 = vadd.f32 %v1987_v52, %v1974_v47  ;;  %3256 = vmatmul.bf16.vlgmr.msra.gmra.mxu3 %v11796_v39  ;;  %v8293_v36 = vld [vmem:[%s14471_s7 + $0xf0] sm:$0xf0]  ;;  %v8400_v50 = vor.u32 %v10314_v15, %v8397_v48  ;;  %v10306_v52 = vld [vmem:[%s14471_s7 + $0x15c] sm:$0xf]  ;;  %v10293_v15 = vld [vmem:[%s14471_s7 + $0xec] sm:$0xf0] }
 0x21b   : > { %3360 = vmatpush.bf16.msra.mxu3 %v8424_v44  ;;  %v8296_v26 = vor.u32 %v10289_v35, %v8293_v36  ;;  %v8419_v44 = vld [vmem:[%s14471_s7 + $0x1d0] sm:$0xf]  ;;  %v8261_v47 = vld [vmem:[%s14471_s7 + $0xb0] sm:$0xf0]  ;;  %v8324_v36 = vor.u32 %v10301_v28, %v8323_v23 }
 0x21c   : > { %v1997_v3 = vpack.c.bf16 %v1988_v60, %v1986_v59  ;;  %v8420_v54 = vor.u32 %v10325_v45, %v8419_v44  ;;  %v8264_v55 = vor.u32 %v10281_v46, %v8261_v47  ;;  %v8427_v59 = vld [vmem:[%s14471_s7 + $0x1d8] sm:$0xf]  ;;  %v8292_v44 = vor.u32 %v10293_v15, %v8291_v41  ;;  %v10410_v23 = vld [vmem:[%s14474_s10 + $0x10] sm:$0xff]  ;;  %v10344_v15 = vld [vmem:[%s14473_s9] sm:$0xff] }
 0x21d   : > { %3279 = vmatpush.bf16.msra.mxu2 %v8316_v53  ;;  %v8365_v53 = vld [vmem:[%s14471_s7 + $0x178] sm:$0xf0]  ;;  %v10326_v60 = vld [vmem:[%s14471_s7 + $0x1f4] sm:$0xf0] }
 0x21e   : > { %3309 = vmatpush.bf16.msra.mxu1 %v8256_v43  ;;  %2673 = vmatmul.bf16.vlgmr.msra.gmra.mxu0 %v1997_v3  ;;  %v10341_v43 = vld [vmem:[%s14471_s7 + $0x26c] sm:$0xf0]  ;;  %v8368_v63 = vor.u32 %v10306_v52, %v8365_v53  ;;  %v8428_v3 = vor.u32 %v10326_v60, %v8427_v59  ;;  %v8299_v45 = vld [vmem:[%s14471_s7 + $0xd8] sm:$0xf]  ;;  %v8205_v52 = vld [vmem:[%s14471_s7 + $0x38] sm:$0xf0] }
 0x21f   : > { %3361 = vmatpush.bf16.msra.mxu3 %v8392_v33  ;;  %3296 = vmatpush.bf16.msra.mxu0 %v8476_v6  ;;  %v8484_v51 = vor.u32 %v10341_v43, %v8483_v42  ;;  %v8229_v33 = vld [vmem:[%s14471_s7 + $0x70] sm:$0xf0]  ;;  %v8237_v42 = vld [vmem:[%s14471_s7 + $0x78] sm:$0xf0]  ;;  %v10294_v46 = vld [vmem:[%s14471_s7 + $0xf4] sm:$0xf0] }
 0x220   : > { %8497 = vmatmul.msk.bf16.vlgmr.msrb.gmra.mxu2 %vm1762_vm1, %v12431_v13  ;;  %v8300_v53 = vor.u32 %v10294_v46, %v8299_v45  ;;  %v8227_v60 = vld [vmem:[%s14471_s7 + $0x50] sm:$0xf]  ;;  %v10373_v45 = vld [vmem:[%s14473_s9 + $0xe8] sm:$0xff] }
 0x221   : > { %3280 = vmatpush.bf16.msra.mxu2 %v8284_v8  ;;  %v8355_v8 = vld [vmem:[%s14471_s7 + $0x150] sm:$0xf] }
 0x222   : > { %3310 = vmatpush.bf16.msra.mxu1 %v8224_v0  ;;  %v10273_v0 = vld [vmem:[%s14471_s7 + $0x54] sm:$0xf]  ;;  %v8356_v21 = vor.u32 %v10309_v9, %v8355_v8  ;;  %v8459_v9 = vld [vmem:[%s14471_s7 + $0x218] sm:$0xf] }
 0x223   : > { %3362 = vmatpush.bf16.msra.mxu3 %v8360_v19  ;;  %3297 = vmatpush.bf16.msra.mxu0 %v8444_v24  ;;  %v8232_v6 = vor.u32 %v10273_v0, %v8229_v33  ;;  %v8493_v19 = vld [vmem:[%s14471_s7 + $0x278] sm:$0xf0]  ;;  %v8363_v24 = vld [vmem:[%s14471_s7 + $0x158] sm:$0xf]  ;;  %v10382_v46 = vld [vmem:[%s14473_s9 + $0x130] sm:$0xff] }
 0x224   : > { %v8235_v0 = vld [vmem:[%s14471_s7 + $0x58] sm:$0xf] }
 0x225   : > { %3281 = vmatpush.bf16.msra.mxu2 %v8252_v25  ;;  %v10310_v25 = vld [vmem:[%s14471_s7 + $0x174] sm:$0xf0] }
 0x226   : > { %3311 = vmatpush.bf16.msra.mxu1 %v8192_v18  ;;  %v10338_v18 = vld [vmem:[%s14471_s7 + $0x25c] sm:$0xf]  ;;  %v8364_v35 = vor.u32 %v10310_v25, %v8363_v24  ;;  %v10278_v33 = vld [vmem:[%s14471_s7 + $0x74] sm:$0xf0]  ;;  %v10358_v24 = vld [vmem:[%s14473_s9 + $0x70] sm:$0xff] }
 0x227   : > { %3363 = vmatpush.bf16.msra.mxu3 %v8328_v32  ;;  %v8496_v30 = vor.u32 %v10338_v18, %v8493_v19  ;;  %v10330_v32 = vld [vmem:[%s14471_s7 + $0x21c] sm:$0xf]  ;;  %v10350_v18 = vld [vmem:[%s14473_s9 + $0x30] sm:$0xff]  ;;  %v2178_v19 = vpop.f32.mrf.mxu3 }
 0x229   : > { %3312 = vmatmul.bf16.vlgmr.msra.gmra.mxu1 %v11796_v39  ;;  %3282 = vmatpush.bf16.msra.mxu2 %v8220_v37  ;;  %v8331_v37 = vld [vmem:[%s14471_s7 + $0x118] sm:$0xf] }
 0x22a   : > { %3380 = vmatpush.bf16.msrb.mxu1 %v8488_v20  ;;  %8500 = vmatmul.msk.bf16.vlgmr.msrb.gmra.mxu3 %vm1762_vm1, %v12431_v13  ;;  %v8396_v20 = vor.u32 %v10318_v7, %v8395_v5  ;;  %v10270_v7 = vld [vmem:[%s14471_s7 + $0x34] sm:$0xf0] }
 0x22b   : > { %3364 = vmatpush.bf16.msra.mxu3 %v8296_v26  ;;  %v10274_v26 = vld [vmem:[%s14471_s7 + $0x5c] sm:$0xf] }
 0x22c   : > { %v8240_v47 = vor.u32 %v10274_v26, %v8237_v42  ;;  %v10383_v26 = vld [vmem:[%s14473_s9 + $0x138] sm:$0xff]  ;;  %v10354_v42 = vld [vmem:[%s14473_s9 + $0x50] sm:$0xff] }
 0x22d   : > { %3283 = vmatpush.bf16.msra.mxu2 %v8188_v49  ;;  %v8259_v49 = vld [vmem:[%s14471_s7 + $0x90] sm:$0xf] }
 0x22e   : > { %3381 = vmatpush.bf16.msrb.mxu1 %v8456_v34  ;;  %8498 = vmatmul.msk.bf16.vlgmr.msrb.gmra.mxu0 %vm1762_vm1, %v12431_v13  ;;  %v8461_v34 = vld [vmem:[%s14471_s7 + $0x238] sm:$0xf0] }
 0x22f   : > { %3332 = vmatpush.bf16.msrb.mxu0 %v8420_v54  ;;  %3365 = vmatpush.bf16.msra.mxu3 %v8264_v55  ;;  %v8464_v48 = vor.u32 %v10330_v32, %v8461_v34  ;;  %v4153_v54 = vld [vmem:[%s11029_s18] sm:$0xf]  ;;  %v12715_v25 = vpop.f32.mrf.mxu3  ;;  %v10345_v34 = vld [vmem:[%s14473_s9 + $0x8] sm:$0xff] }
 0x230   : > { %3284 = vmatmul.bf16.vlgmr.msra.gmra.mxu2 %v11796_v39  ;;  %4157 = vrot.lane.b32.xlu1 %v4153_v54, %s10740_s23  ;;  %v10356_v32 = vld [vmem:[%s14473_s9 + $0x60] sm:$0xff] }
 0x231   : > { %3352 = vmatpush.bf16.msrb.mxu2 %v8484_v51  ;;  %v10266_v51 = vld [vmem:[%s14471_s7 + $0x1c] sm:$0xf] }
 0x232   : > { %3416 = vmatpush.bf16.msra.mxu1 %v8432_v38  ;;  %v10302_v38 = vld [vmem:[%s14471_s7 + $0x134] sm:$0xf0]  ;;  %v8208_v59 = vor.u32 %v10266_v51, %v8205_v52  ;;  %v10372_v51 = vld [vmem:[%s14473_s9 + $0xe0] sm:$0xff]  ;;  %v10381_v52 = vld [vmem:[%s14473_s9 + $0x128] sm:$0xff] }
 0x233   : > { %3333 = vmatpush.bf16.msrb.mxu0 %v8388_v4  ;;  %3366 = vmatpush.bf16.msra.mxu3 %v8232_v6  ;;  %v8332_v43 = vor.u32 %v10302_v38, %v8331_v37  ;;  %v8236_v4 = vor.u32 %v10278_v33, %v8235_v0  ;;  %v8203_v6 = vld [vmem:[%s14471_s7 + $0x18] sm:$0xf]  ;;  %v10408_v37 = vld [vmem:[%s14474_s10] sm:$0xff] }
 0x234   : > { %v8204_v12 = vor.u32 %v10270_v7, %v8203_v6  ;;  %v10355_v38 = vld [vmem:[%s14473_s9 + $0x58] sm:$0xff]  ;;  %v10362_v6 = vld [vmem:[%s14473_s9 + $0x90] sm:$0xff]  ;;  %v10389_v7 = vld [vmem:[%s14473_s9 + $0x168] sm:$0xff] }
 0x235   : > { %3353 = vmatpush.bf16.msrb.mxu2 %v8452_v11  ;;  %v8195_v11 = vld [vmem:[%s14471_s7 + $0x10] sm:$0xf]  ;;  %v10363_v0 = vld [vmem:[%s14473_s9 + $0x98] sm:$0xff] }
 0x236   : > { %3417 = vmatpush.bf16.msra.mxu1 %v8400_v50  ;;  %v10285_v50 = vld [vmem:[%s14471_s7 + $0xac] sm:$0xf0]  ;;  %v8196_v5 = vor.u32 %v10269_v1, %v8195_v11 }
 0x237   : > { %3334 = vmatpush.bf16.msrb.mxu0 %v8356_v21  ;;  %3367 = vmatpush.bf16.msra.mxu3 %v8200_v22  ;;  %v8260_v55 = vor.u32 %v10285_v50, %v8259_v49  ;;  %v10348_v21 = vld [vmem:[%s14473_s9 + $0x20] sm:$0xff]  ;;  %v10411_v22 = vld [vmem:[%s14474_s10 + $0x18] sm:$0xff]  ;;  %v10365_v49 = vld [vmem:[%s14473_s9 + $0xa8] sm:$0xff] }
 0x238   : > { %v10390_v11 = vld [vmem:[%s14473_s9 + $0x170] sm:$0xff] }
 0x239   : > { %3388 = vmatpush.bf16.msra.mxu2 %v8428_v3  ;;  %8502 = vmatmul.msk.bf16.vlgmr.msrb.gmra.mxu1 %vm1762_vm1, %v12431_v13  ;;  %v10342_v3 = vld [vmem:[%s14471_s7 + $0x274] sm:$0xf0] }
 0x23a   : > { %3418 = vmatpush.bf16.msra.mxu1 %v8368_v63  ;;  %3368 = vmatmul.bf16.vlgmr.msra.gmra.mxu3 %v11796_v39  ;;  %v8228_v63 = vor.u32 %v10277_v61, %v8227_v60  ;;  %v8492_v8 = vor.u32 %v10342_v3, %v8491_v2  ;;  %v10371_v61 = vld [vmem:[%s14473_s9 + $0xd8] sm:$0xff]  ;;  %v10370_v2 = vld [vmem:[%s14473_s9 + $0xd0] sm:$0xff] }
 0x23b   : > { %3436 = vmatpush.bf16.msrb.mxu3 %v8496_v30  ;;  %3335 = vmatpush.bf16.msrb.mxu0 %v8324_v36  ;;  %v10346_v30 = vld [vmem:[%s14473_s9 + $0x10] sm:$0xff]  ;;  %v10379_v3 = vld [vmem:[%s14473_s9 + $0x118] sm:$0xff] }
 0x23d   : > { %3389 = vmatpush.bf16.msra.mxu2 %v8396_v20 }
 0x23e   : > { %3419 = vmatpush.bf16.msra.mxu1 %v8336_v10  ;;  %8499 = vmatmul.msk.bf16.vlgmr.msra.gmra.mxu0 %vm1762_vm1, %v12431_v13  ;;  %v10334_v10 = vld [vmem:[%s14471_s7 + $0x234] sm:$0xf0] }
 0x23f   : > { %3437 = vmatpush.bf16.msrb.mxu3 %v8464_v48  ;;  %3336 = vmatpush.bf16.msrb.mxu0 %v8292_v44  ;;  %v8460_v14 = vor.u32 %v10334_v10, %v8459_v9  ;;  %v10374_v48 = vld [vmem:[%s14473_s9 + $0xf0] sm:$0xff] }
 0x240   : > { %8501 = vmatmul.msk.bf16.vlgmr.msrb.gmra.mxu2 %vm1762_vm1, %v12431_v13 }
 0x241   : > { %3390 = vmatpush.bf16.msra.mxu2 %v8364_v35  ;;  %v10375_v35 = vld [vmem:[%s14473_s9 + $0xf8] sm:$0xff] }
 0x242   : > { %3420 = vmatpush.bf16.msra.mxu1 %v8304_v27  ;;  %v10347_v27 = vld [vmem:[%s14473_s9 + $0x18] sm:$0xff] }
 0x243   : > { %3337 = vmatpush.bf16.msrb.mxu0 %v8260_v55 }
 0x245   : > { %3391 = vmatpush.bf16.msra.mxu2 %v8332_v43  ;;  %v10366_v43 = vld [vmem:[%s14473_s9 + $0xb0] sm:$0xff] }
 0x246   : > { %3421 = vmatpush.bf16.msra.mxu1 %v8272_v40  ;;  %v10367_v40 = vld [vmem:[%s14473_s9 + $0xb8] sm:$0xff] }
 0x247   : > { %3338 = vmatpush.bf16.msrb.mxu0 %v8228_v63  ;;  %v10380_v63 = vld [vmem:[%s14473_s9 + $0x120] sm:$0xff] }
 0x249   : > { %3392 = vmatpush.bf16.msra.mxu2 %v8300_v53 }
 0x24a   : > { %3422 = vmatpush.bf16.msra.mxu1 %v8240_v47  ;;  %8504 = vmatmul.msk.bf16.vlgmr.msrb.gmra.mxu3 %vm1762_vm1, %v12431_v13  ;;  %v10353_v47 = vld [vmem:[%s14473_s9 + $0x48] sm:$0xff] }
 0x24b   : > { %3339 = vmatpush.bf16.msrb.mxu0 %v8196_v5 }
 0x24d   : > { %3393 = vmatpush.bf16.msra.mxu2 %v8268_v62 }
 0x24e   : > { %3423 = vmatpush.bf16.msra.mxu1 %v8208_v59  ;;  %3340 = vmatmul.bf16.vlgmr.msrb.gmra.mxu0 %v11796_v39  ;;  %v10391_v59 = vld [vmem:[%s14473_s9 + $0x178] sm:$0xff] }
 0x24f   : > { %3408 = vmatpush.bf16.msra.mxu0 %v8492_v8 }
 0x251   : > { %3424 = vmatmul.bf16.vlgmr.msra.gmra.mxu1 %v11796_v39  ;;  %3394 = vmatpush.bf16.msra.mxu2 %v8236_v4 }
 0x252   : > { %4064 = vmatpush.bf16.msrb.mxu1 %v10375_v35  ;;  %v10376_v35 = vld [vmem:[%s14473_s9 + $0x100] sm:$0xff] }
 0x253   : > { %3409 = vmatpush.bf16.msra.mxu0 %v8460_v14 }
 0x255   : > { %3395 = vmatpush.bf16.msra.mxu2 %v8204_v12  ;;  %v10369_v12 = vld [vmem:[%s14473_s9 + $0xc8] sm:$0xff] }
 0x256   : > { %4065 = vmatpush.bf16.msrb.mxu1 %v10374_v48 }
 0x257   : > { %3628 = vmatpush.bf16.msrb.mxu0 %v10411_v22  ;;  %v10368_v22 = vld [vmem:[%s14473_s9 + $0xc0] sm:$0xff] }
 0x258   : > { %3396 = vmatmul.bf16.vlgmr.msra.gmra.mxu2 %v11796_v39  ;;  %v10349_v39 = vld [vmem:[%s14473_s9 + $0x28] sm:$0xff] }
 0x259   : > { %4022 = vmatpush.bf16.msrb.mxu2 %v10351_v17  ;;  %v10378_v17 = vld [vmem:[%s14473_s9 + $0x110] sm:$0xff] }
 0x25a   : > { %4066 = vmatpush.bf16.msrb.mxu1 %v10373_v45 }
 0x25b   : > { %3629 = vmatpush.bf16.msrb.mxu0 %v10410_v23  ;;  %v10387_v23 = vld [vmem:[%s14473_s9 + $0x158] sm:$0xff] }
 0x25d   : > { %4023 = vmatpush.bf16.msrb.mxu2 %v10350_v18 }
 0x25e   : > { %8503 = vmatmul.msk.bf16.vlgmr.msra.gmra.mxu0 %vm1762_vm1, %v12431_v13  ;;  %v10359_v13 = vld [vmem:[%s14473_s9 + $0x78] sm:$0xff]  ;;  %4067 = vmatpush.bf16.msrb.mxu1 %v10372_v51 }
 0x25f   : > { %4036 = vmatpush.bf16.msra.mxu3 %v10359_v13  ;;  %3630 = vmatpush.bf16.msrb.mxu0 %v10409_v31  ;;  %v10407_v31 = vld [vmem:[%s14473_s9 + $0x1f8] sm:$0xff] }
 0x261   : > { %4024 = vmatpush.bf16.msrb.mxu2 %v10349_v39 }
 0x262   : > { %4068 = vmatpush.bf16.msrb.mxu1 %v10371_v61 }
 0x263   : > { %4037 = vmatpush.bf16.msra.mxu3 %v10358_v24  ;;  %3631 = vmatpush.bf16.msrb.mxu0 %v10408_v37  ;;  %v10377_v24 = vld [vmem:[%s14473_s9 + $0x108] sm:$0xff] }
 0x265   : > { %4025 = vmatpush.bf16.msrb.mxu2 %v10348_v21 }
 0x266   : > { %v2576_v20 = vpop.f32.mrf.mxu1  ;;  %4069 = vmatpush.bf16.msrb.mxu1 %v10370_v2 }
 0x267   : > { %4038 = vmatpush.bf16.msra.mxu3 %v10357_v29  ;;  %4050 = vmatpush.bf16.msra.mxu0 %v10367_v40  ;;  %v2577_v53 = vadd.f32 %v2576_v20, %v2178_v19  ;;  %v10361_v19 = vld [vmem:[%s14473_s9 + $0x88] sm:$0xff]  ;;  %v10388_v20 = vld [vmem:[%s14473_s9 + $0x160] sm:$0xff] }
 0x269   : > { %4026 = vmatpush.bf16.msrb.mxu2 %v10347_v27  ;;  %v10360_v27 = vld [vmem:[%s14473_s9 + $0x80] sm:$0xff] }
 0x26a   : > { %4070 = vmatpush.bf16.msrb.mxu1 %v10369_v12  ;;  %v10394_v12 = vld [vmem:[%s14473_s9 + $0x190] sm:$0xff] }
 0x26b   : > { %4039 = vmatpush.bf16.msra.mxu3 %v10356_v32  ;;  %4051 = vmatpush.bf16.msra.mxu0 %v10366_v43  ;;  %v10385_v43 = vld [vmem:[%s14473_s9 + $0x148] sm:$0xff] }
 0x26d   : > { %4027 = vmatpush.bf16.msrb.mxu2 %v10346_v30  ;;  %v2604_v36 = vpop.f32.mrf.mxu3  ;;  %v10727_v30 = vld [vmem:[%s14475_s11] ss:$0 sm:$0xff] }
 0x26e   : > { %v12723_v28 = vpop.f32.mrf.mxu1  ;;  %4071 = vmatpush.bf16.msrb.mxu1 %v10368_v22 }
 0x26f   : > { %4040 = vmatpush.bf16.msra.mxu3 %v10355_v38  ;;  %4052 = vmatpush.bf16.msra.mxu0 %v10365_v49  ;;  %v2579_v4 = vadd.f32 %v12723_v28, %v12715_v25  ;;  %v10399_v28 = vld [vmem:[%s14473_s9 + $0x1b8] sm:$0xff]  ;;  %v4160_v22 = vpop.permute.xlu2 %4159 }
 0x270   : > { %4164 = vst.msk [vmem:[#allocation2 + $0xc] sm:$0xf] %vm1250_vm0, %v4160_v22 }
 0x271   : > { %4028 = vmatpush.bf16.msrb.mxu2 %v10345_v34 }
 0x272   : > { %v2590_v44 = vpop.f32.mrf.mxu2  ;;  %4120 = vmatpush.bf16.msra.mxu1 %v10407_v31 }
 0x273   : > { %4041 = vmatpush.bf16.msra.mxu3 %v10354_v42  ;;  %v2591_v60 = vadd.f32 %v2590_v44, %v2577_v53  ;;  %4053 = vmatpush.bf16.msra.mxu0 %v10364_v57  ;;  %v10406_v42 = vld [vmem:[%s14473_s9 + $0x1f0] sm:$0xff]  ;;  %v10397_v44 = vld [vmem:[%s14473_s9 + $0x1a8] sm:$0xff] }
 0x275   : > { %4029 = vmatpush.bf16.msrb.mxu2 %v10344_v15  ;;  %v2606_v50 = vpop.f32.mrf.mxu3  ;;  %v2605_v1 = vadd.f32 %v2604_v36, %v2591_v60  ;;  %v10398_v15 = vld [vmem:[%s14473_s9 + $0x1b0] sm:$0xff]  ;;  %v10395_v60 = vld [vmem:[%s14473_s9 + $0x198] sm:$0xff] }
 0x276   : > { %v12752_v41 = vpop.f32.mrf.mxu1  ;;  %4121 = vmatpush.bf16.msra.mxu1 %v10406_v42  ;;  %v10482_v42 = vld [vmem:[%s14471_s7 + $0x21c] sm:$0xf0] }
 0x277   : > { %4042 = vmatpush.bf16.msra.mxu3 %v10353_v47  ;;  %4054 = vmatpush.bf16.msra.mxu0 %v10363_v0  ;;  %v12894_v47 = vld [vmem:[%s14472_s8] sm:$0xff] }
 0x278   : > { %v10474_v0 = vld [vmem:[%s14471_s7 + $0x1dc] sm:$0xf0] }
 0x279   : > { %4078 = vmatpush.bf16.msra.mxu2 %v10383_v26 }
 0x27a   : > { %v2618_v54 = vpop.f32.mrf.mxu0  ;;  %v2592_v62 = vpop.f32.mrf.mxu2 }
 0x27b   : > { %4043 = vmatpush.bf16.msra.mxu3 %v10352_v56  ;;  %v2619_v5 = vadd.f32 %v2618_v54, %v2605_v1  ;;  %v2593_v8 = vadd.f32 %v2592_v62, %v2579_v4  ;;  %4055 = vmatpush.bf16.msra.mxu0 %v10362_v6  ;;  %v10384_v54 = vld [vmem:[%s14473_s9 + $0x140] sm:$0xff]  ;;  %v2792_v56 = vperm.slane %v12894_v47, 0 }
 0x27d   : > { %4079 = vmatpush.bf16.msra.mxu2 %v10382_v46  ;;  %v2633_v18 = vadd.f32 %v12752_v41, %v2619_v5  ;;  %v2607_v13 = vadd.f32 %v2606_v50, %v2593_v8  ;;  %v10386_v41 = vld [vmem:[%s14473_s9 + $0x150] sm:$0xff]  ;;  %v10405_v46 = vld [vmem:[%s14473_s9 + $0x1e8] sm:$0xff] }
 0x27e   : > { %v12787_v55 = vpop.f32.mrf.mxu1  ;;  %4122 = vmatpush.bf16.msra.mxu1 %v10405_v46 }
 0x27f   : > { %4092 = vmatpush.bf16.msrb.mxu3 %v10391_v59  ;;  %4056 = vmatpush.bf16.msra.mxu0 %v10361_v19  ;;  %v10404_v59 = vld [vmem:[%s14473_s9 + $0x1e0] sm:$0xff] }
 0x280   : > { %v10458_v19 = vld [vmem:[%s14471_s7 + $0x15c] sm:$0xf0] }
 0x281   : > { %4080 = vmatpush.bf16.msra.mxu2 %v10381_v52 }
 0x282   : > { %v2620_v9 = vpop.f32.mrf.mxu0  ;;  %4123 = vmatpush.bf16.msra.mxu1 %v10404_v59  ;;  %v10434_v59 = vld [vmem:[%s14471_s7 + $0x9c] sm:$0xf0] }
 0x283   : > { %4093 = vmatpush.bf16.msrb.mxu3 %v10390_v11  ;;  %v3596_v16 = vpop.permute.xlu1 %3595  ;;  %v2621_v25 = vadd.f32 %v2620_v9, %v2607_v13  ;;  %4057 = vmatpush.bf16.msra.mxu0 %v10360_v27  ;;  %v8984_v9 = vld [vmem:[%s14471_s7 + $0x180] sm:$0xf] }
 0x284   : > { %8525 = vmatmul.msk.bf16.vlgmr.msrb.gmra.mxu0 %vm2165_vm2, %v3596_v16  ;;  %v2795_v16 = vperm.slane %v12894_v47, 3  ;;  %v9080_v13 = vld [vmem:[%s14471_s7 + $0x240] sm:$0xf] }
 0x285   : > { %4081 = vmatpush.bf16.msra.mxu2 %v10380_v63  ;;  %v2635_v37 = vadd.f32 %v12787_v55, %v2621_v25  ;;  %v10396_v55 = vld [vmem:[%s14473_s9 + $0x1a0] sm:$0xff] }
 0x286   : > { %v12824_v10 = vpop.f32.mrf.mxu1  ;;  %v9016_v63 = vld [vmem:[%s14471_s7 + $0x1c0] sm:$0xf] }
 0x287   : > { %4094 = vmatpush.bf16.msrb.mxu3 %v10389_v7  ;;  %4106 = vmatpush.bf16.msrb.mxu0 %v10399_v28  ;;  %v3230_v61 = vadd.f32 %v12824_v10, %v2792_v56  ;;  %v9017_v6 = vor.u32 %v10474_v0, %v9016_v63  ;;  %v2793_v7 = vperm.slane %v12894_v47, 1  ;;  %v10466_v10 = vld [vmem:[%s14471_s7 + $0x19c] sm:$0xf0]  ;;  %v2797_v63 = vperm.slane %v12894_v47, 5 }
 0x289   : > { %4082 = vmatpush.bf16.msra.mxu2 %v10379_v3 }
 0x28b   : > { %4095 = vmatpush.bf16.msrb.mxu3 %v10388_v20  ;;  %4107 = vmatpush.bf16.msrb.mxu0 %v10398_v15 }
 0x28d   : > { %v2660_v33 = vpop.f32.mrf.mxu3  ;;  %4083 = vmatpush.bf16.msra.mxu2 %v10378_v17  ;;  %v8985_v17 = vor.u32 %v10466_v10, %v8984_v9  ;;  %v10478_v10 = vld [vmem:[%s14471_s7 + $0x204] sm:$0xf] }
 0x28e   : > { %v3231_v36 = vpop.f32.mrf.mxu1 }
 0x28f   : > { %4096 = vmatpush.bf16.msrb.mxu3 %v10387_v23  ;;  %4108 = vmatpush.bf16.msrb.mxu0 %v10397_v44  ;;  %v3232_v62 = vadd.f32 %v3231_v36, %v2792_v56  ;;  %v10401_v23 = vld [vmem:[%s14473_s9 + $0x1c8] sm:$0xff]  ;;  %v10400_v44 = vld [vmem:[%s14473_s9 + $0x1c0] sm:$0xff] }
 0x291   : > { %4084 = vmatpush.bf16.msra.mxu2 %v10377_v24  ;;  %v10393_v24 = vld [vmem:[%s14473_s9 + $0x188] sm:$0xff] }
 0x293   : > { %v2646_v14 = vpop.f32.mrf.mxu2  ;;  %4097 = vmatpush.bf16.msrb.mxu3 %v10386_v41  ;;  %4109 = vmatpush.bf16.msrb.mxu0 %v10396_v55  ;;  %v2794_v55 = vperm.slane %v12894_v47, 2 }
 0x294   : > { %v2647_v21 = vadd.f32 %v2646_v14, %v2633_v18  ;;  %v10402_v14 = vld [vmem:[%s14473_s9 + $0x1d0] sm:$0xff]  ;;  %v8952_v18 = vld [vmem:[%s14471_s7 + $0x140] sm:$0xf] }
 0x295   : > { %v2662_v39 = vpop.f32.mrf.mxu3  ;;  %4085 = vmatpush.bf16.msra.mxu2 %v10376_v35  ;;  %v8953_v35 = vor.u32 %v10458_v19, %v8952_v18 }
 0x296   : > { %v2661_v29 = vadd.f32 %v2660_v33, %v2647_v21  ;;  %v10403_v33 = vld [vmem:[%s14473_s9 + $0x1d8] sm:$0xff]  ;;  %v10490_v21 = vld [vmem:[%s14471_s7 + $0x25c] sm:$0xf0] }
 0x297   : > { %4098 = vmatpush.bf16.msrb.mxu3 %v10385_v43  ;;  %4110 = vmatpush.bf16.msrb.mxu0 %v10395_v60  ;;  %v9081_v36 = vor.u32 %v10490_v21, %v9080_v13  ;;  %v10392_v43 = vld [vmem:[%s14473_s9 + $0x180] sm:$0xff] }
 0x298   : > { %4124 = vmatpush.bf16.msra.mxu1 %v10403_v33  ;;  %v8824_v33 = vld [vmem:[%s14471_s7 + $0x40] sm:$0xf] }
 0x299   : > { %v8792_v13 = vld [vmem:[%s14471_s7] sm:$0xf] }
 0x29a   : > { %v10418_v21 = vld [vmem:[%s14471_s7 + $0x1c] sm:$0xf0] }
 0x29b   : > { %v2648_v32 = vpop.f32.mrf.mxu2  ;;  %v2674_v34 = vpop.f32.mrf.mxu0  ;;  %4099 = vmatpush.bf16.msrb.mxu3 %v10384_v54  ;;  %4111 = vmatpush.bf16.msrb.mxu0 %v10394_v12  ;;  %v9050_v12 = vld [vmem:[%s14471_s7 + $0x220] sm:$0xf0] }
 0x29c   : > { %v2675_v38 = vadd.f32 %v2674_v34, %v2661_v29  ;;  %v2649_v48 = vadd.f32 %v2648_v32, %v2635_v37  ;;  %4125 = vmatpush.bf16.msra.mxu1 %v10402_v14  ;;  %v8920_v37 = vld [vmem:[%s14471_s7 + $0x100] sm:$0xf]  ;;  %v9053_v18 = vor.u32 %v10478_v10, %v9050_v12 }
 0x29d   : > { %v3257_v40 = vpop.f32.mrf.mxu3 }
 0x29e   : > { %v2683_v26 = vadd.f32 %v10727_v30, %v2675_v38  ;;  %v2663_v45 = vadd.f32 %v2662_v39, %v2649_v48  ;;  %v3258_v39 = vadd.f32 %v3257_v40, %v2793_v7  ;;  %v10450_v38 = vld [vmem:[%s14471_s7 + $0x11c] sm:$0xf0] }
 0x29f   : > { %4112 = vmatpush.bf16.msrb.mxu0 %v10393_v24  ;;  %v8921_v46 = vor.u32 %v10450_v38, %v8920_v37  ;;  %v10475_v24 = vld [vmem:[%s14471_s7 + $0x1e4] sm:$0xf0]  ;;  %v10454_v37 = vld [vmem:[%s14471_s7 + $0x144] sm:$0xf] }
 0x2a0   : > { %2686 = vst.msk [vmem:[%s12869_s24] sm:$0xff] %vm2685_vm3, %v2683_v26  ;;  %4126 = vmatpush.bf16.msra.mxu1 %v10401_v23  ;;  %v9048_v26 = vld [vmem:[%s14471_s7 + $0x200] sm:$0xf]  ;;  %v8954_v38 = vld [vmem:[%s14471_s7 + $0x160] sm:$0xf0] }
 0x2a2   : > { %v4158_v32 = vpop.permute.xlu1 %4157 }
 0x2a3   : > { %v2676_v49 = vpop.f32.mrf.mxu0  ;;  %v3243_v50 = vpop.f32.mrf.mxu2  ;;  %4163 = vst.msk [vmem:[#allocation2 + $0x4] sm:$0xf] %vm1250_vm0, %v4158_v32  ;;  %4113 = vmatpush.bf16.msrb.mxu0 %v10392_v43  ;;  %v8992_v32 = vld [vmem:[%s14471_s7 + $0x188] sm:$0xf]  ;;  %v8957_v43 = vor.u32 %v10454_v37, %v8954_v38  ;;  %v8962_v37 = vld [vmem:[%s14471_s7 + $0x168] sm:$0xf0] }
 0x2a4   : > { %v2677_v51 = vadd.f32 %v2676_v49, %v2663_v45  ;;  %v3244_v2 = vadd.f32 %v3243_v50, %v3230_v61  ;;  %v9049_v49 = vor.u32 %v10482_v42, %v9048_v26  ;;  %v8888_v50 = vld [vmem:[%s14471_s7 + $0xc0] sm:$0xf]  ;;  %4127 = vmatpush.bf16.msra.mxu1 %v10400_v44  ;;  %v10486_v61 = vld [vmem:[%s14471_s7 + $0x244] sm:$0xf]  ;;  %v8960_v42 = vld [vmem:[%s14471_s7 + $0x148] sm:$0xf] }
 0x2a5   : > { %v3259_v53 = vpop.f32.mrf.mxu3  ;;  %v10459_v44 = vld [vmem:[%s14471_s7 + $0x164] sm:$0xf0]  ;;  %v2798_v38 = vperm.slane %v12894_v47, 6 }
 0x2a6   : > { %v3313_v52 = vpop.f32.mrf.mxu1  ;;  %v2684_v57 = vadd.f32 %v10727_v30, %v2677_v51  ;;  %v3260_v20 = vadd.f32 %v3259_v53, %v2793_v7  ;;  %v10442_v51 = vld [vmem:[%s14471_s7 + $0xdc] sm:$0xf0] }
 0x2a7   : > { %v3314_v28 = vadd.f32 %v3313_v52, %v2795_v16  ;;  %v8889_v54 = vor.u32 %v10442_v51, %v8888_v50  ;;  %v8961_v51 = vor.u32 %v10459_v44, %v8960_v42  ;;  %v10447_v44 = vld [vmem:[%s14471_s7 + $0x10c] sm:$0xf] }
 0x2a8   : > { %2687 = vst.msk [vmem:[%s12869_s24 + $0x8] sm:$0xff] %vm2685_vm3, %v2684_v57  ;;  %v8856_v57 = vld [vmem:[%s14471_s7 + $0x80] sm:$0xf] }
 0x2a9   : > { %v8857_v0 = vor.u32 %v10434_v59, %v8856_v57  ;;  %v8890_v57 = vld [vmem:[%s14471_s7 + $0xe0] sm:$0xf0] }
 0x2ab   : > { %v3245_v11 = vpop.f32.mrf.mxu2  ;;  %v3271_v1 = vpop.f32.mrf.mxu0 }
 0x2ac   : > { %v3246_v3 = vadd.f32 %v3245_v11, %v3232_v62  ;;  %v3272_v29 = vadd.f32 %v3271_v1, %v3258_v39  ;;  %v9082_v62 = vld [vmem:[%s14471_s7 + $0x260] sm:$0xf0] }
 0x2ad   : > { %v3327_v5 = vpop.f32.mrf.mxu3  ;;  %v9085_v11 = vor.u32 %v10486_v61, %v9082_v62 }
 0x2ae   : > { %v3315_v4 = vpop.f32.mrf.mxu1  ;;  %v3444_v8 = vpack.c.bf16 %v3246_v3, %v3244_v2  ;;  %v3328_v40 = vadd.f32 %v3327_v5, %v3314_v28  ;;  %v10426_v3 = vld [vmem:[%s14471_s7 + $0x5c] sm:$0xf0]  ;;  %v9018_v5 = vld [vmem:[%s14471_s7 + $0x1e0] sm:$0xf0] }
 0x2af   : > { %v3316_v30 = vadd.f32 %v3315_v4, %v2795_v16  ;;  %v10470_v4 = vld [vmem:[%s14471_s7 + $0x1c4] sm:$0xf]  ;;  %v8825_v16 = vor.u32 %v10426_v3, %v8824_v33  ;;  %v9088_v33 = vld [vmem:[%s14471_s7 + $0x248] sm:$0xf] }
 0x2b0   : > { %4030 = vmatmul.bf16.vlgmr.msrb.gmra.mxu2 %v3444_v8 }
 0x2b1   : > { %4677 = vmatpush.bf16.msrb.mxu2 %v9017_v6 }
 0x2b3   : > { %v3273_v25 = vpop.f32.mrf.mxu0  ;;  %v3285_v27 = vpop.f32.mrf.mxu2 }
 0x2b4   : > { %v3274_v31 = vadd.f32 %v3273_v25, %v3260_v20  ;;  %v3286_v1 = vadd.f32 %v3285_v27, %v2794_v55  ;;  %v9024_v20 = vld [vmem:[%s14471_s7 + $0x1c8] sm:$0xf]  ;;  %v10462_v25 = vld [vmem:[%s14471_s7 + $0x184] sm:$0xf] }
 0x2b5   : > { %v3329_v34 = vpop.f32.mrf.mxu3  ;;  %4678 = vmatpush.bf16.msrb.mxu2 %v8985_v17  ;;  %v9021_v17 = vor.u32 %v10470_v4, %v9018_v5  ;;  %v8986_v27 = vld [vmem:[%s14471_s7 + $0x1a0] sm:$0xf0]  ;;  %v8786_v5 = vld [vmem:[#allocation2 + $0x8] sm:$0xf0] }
 0x2b6   : > { %v3445_v41 = vpack.c.bf16 %v3274_v31, %v3272_v29  ;;  %v12961_v15 = vpop.f32.mrf.mxu1  ;;  %v3330_v48 = vadd.f32 %v3329_v34, %v3316_v30  ;;  %v8793_v30 = vor.u32 %v10418_v21, %v8792_v13  ;;  %v9025_v31 = vor.u32 %v10475_v24, %v9024_v20  ;;  %v10412_v4 = vld [vmem:[#allocation2 + $0x4] sm:$0xf]  ;;  %v9056_v24 = vld [vmem:[%s14471_s7 + $0x208] sm:$0xf] }
 0x2b7   : > { %v8989_v34 = vor.u32 %v10462_v25, %v8986_v27  ;;  %v13102_v21 = vor.u32 %v10412_v4, %v8786_v5  ;;  %v10483_v25 = vld [vmem:[%s14471_s7 + $0x224] sm:$0xf0]  ;;  %v10479_v5 = vld [vmem:[%s14471_s7 + $0x20c] sm:$0xf] }
 0x2b8   : > { %v3447_v45 = vpack.c.bf16 %v3330_v48, %v3328_v40  ;;  %4044 = vmatmul.bf16.vlgmr.msra.gmra.mxu3 %v3445_v41 }
 0x2b9   : > { %4679 = vmatpush.bf16.msrb.mxu2 %v8953_v35  ;;  %4697 = vmatpush.bf16.msra.mxu3 %v9081_v36  ;;  %v10467_v36 = vld [vmem:[%s14471_s7 + $0x1a4] sm:$0xf0] }
 0x2ba   : > { %4072 = vmatmul.bf16.vlgmr.msrb.gmra.mxu1 %v3447_v45  ;;  %v8993_v26 = vor.u32 %v10467_v36, %v8992_v32  ;;  %v10446_v45 = vld [vmem:[%s14471_s7 + $0x104] sm:$0xf]  ;;  %v10455_v36 = vld [vmem:[%s14471_s7 + $0x14c] sm:$0xf] }
 0x2bb   : > { %v3287_v52 = vpop.f32.mrf.mxu2  ;;  %v3299_v53 = vpop.f32.mrf.mxu0  ;;  %4725 = vmatpush.bf16.msrb.mxu1 %v9085_v11  ;;  %v10491_v11 = vld [vmem:[%s14471_s7 + $0x264] sm:$0xf0] }
 0x2bc   : > { %v3288_v2 = vadd.f32 %v3287_v52, %v2794_v55  ;;  %v3300_v8 = vadd.f32 %v3299_v53, %v3286_v1  ;;  %v8928_v52 = vld [vmem:[%s14471_s7 + $0x108] sm:$0xf] }
 0x2bd   : > { %4680 = vmatpush.bf16.msrb.mxu2 %v8921_v46  ;;  %4698 = vmatpush.bf16.msra.mxu3 %v9049_v49  ;;  %v3369_v56 = vpop.f32.mrf.mxu3  ;;  %v8922_v46 = vld [vmem:[%s14471_s7 + $0x120] sm:$0xf0]  ;;  %v2799_v49 = vperm.slane %v12894_v47, 7  ;;  %v10451_v55 = vld [vmem:[%s14471_s7 + $0x124] sm:$0xf0] }
 0x2be   : > { %v3385_v60 = vpop.f32.mrf.mxu1  ;;  %v3370_v14 = vadd.f32 %v3369_v56, %v2797_v63  ;;  %v8925_v53 = vor.u32 %v10446_v45, %v8922_v46  ;;  %v10438_v56 = vld [vmem:[%s14471_s7 + $0xc4] sm:$0xf]  ;;  %v8929_v3 = vor.u32 %v10451_v55, %v8928_v52  ;;  %v8930_v45 = vld [vmem:[%s14471_s7 + $0x128] sm:$0xf0] }
 0x2bf   : > { %4726 = vmatpush.bf16.msrb.mxu1 %v9053_v18  ;;  %v8858_v18 = vld [vmem:[%s14471_s7 + $0xa0] sm:$0xf0]  ;;  %v9090_v55 = vld [vmem:[%s14471_s7 + $0x268] sm:$0xf0] }
 0x2c0   : > { %v3384_v28 = vadd.f32 %v12961_v15, %v3370_v14  ;;  %v2796_v15 = vperm.slane %v12894_v47, 4  ;;  %v8794_v47 = vld [vmem:[%s14471_s7 + $0x20] sm:$0xf0] }
 0x2c1   : > { %4681 = vmatpush.bf16.msrb.mxu2 %v8889_v54 }
 0x2c3   : > { %v3301_v6 = vpop.f32.mrf.mxu0  ;;  %v13007_v7 = vpop.f32.mrf.mxu2 }
 0x2c4   : > { %v3302_v9 = vadd.f32 %v3301_v6, %v3288_v2  ;;  %v8896_v6 = vld [vmem:[%s14471_s7 + $0xc8] sm:$0xf] }
 0x2c5   : > { %4682 = vmatpush.bf16.msrb.mxu2 %v8857_v0  ;;  %v3371_v39 = vpop.f32.mrf.mxu3  ;;  %v9026_v0 = vld [vmem:[%s14471_s7 + $0x1e8] sm:$0xf0] }
 0x2c6   : > { %v3446_v19 = vpack.c.bf16 %v3302_v9, %v3300_v8  ;;  %v3372_v22 = vadd.f32 %v3371_v39, %v2797_v63  ;;  %v8893_v8 = vor.u32 %v10438_v56, %v8890_v57  ;;  %v9089_v39 = vor.u32 %v10491_v11, %v9088_v33  ;;  %v9032_v11 = vld [vmem:[%s14471_s7 + $0x1d0] sm:$0xf] }
 0x2c7   : > { %v8933_v57 = vor.u32 %v10447_v44, %v8930_v45 }
 0x2c8   : > { %4058 = vmatmul.bf16.vlgmr.msra.gmra.mxu0 %v3446_v19  ;;  %v3386_v29 = vadd.f32 %v3385_v60, %v3372_v22  ;;  %v10471_v60 = vld [vmem:[%s14471_s7 + $0x1cc] sm:$0xf] }
 0x2c9   : > { %4683 = vmatpush.bf16.msrb.mxu2 %v8825_v16  ;;  %4705 = vmatpush.bf16.msra.mxu0 %v9021_v17  ;;  %v10443_v16 = vld [vmem:[%s14471_s7 + $0xe4] sm:$0xf0]  ;;  %v10430_v17 = vld [vmem:[%s14471_s7 + $0x84] sm:$0xf]  ;;  %v9029_v19 = vor.u32 %v10471_v60, %v9026_v0  ;;  %v8994_v22 = vld [vmem:[%s14471_s7 + $0x1a8] sm:$0xf0] }
 0x2ca   : > { %v3449_v35 = vpack.c.bf16 %v3386_v29, %v3384_v28  ;;  %v8897_v27 = vor.u32 %v10443_v16, %v8896_v6  ;;  %v8861_v28 = vor.u32 %v10430_v17, %v8858_v18  ;;  %v10435_v29 = vld [vmem:[%s14471_s7 + $0xa4] sm:$0xf0]  ;;  %v10492_v60 = vld [vmem:[%s14471_s7 + $0x26c] sm:$0xf0]  ;;  %v8898_v0 = vld [vmem:[%s14471_s7 + $0xe8] sm:$0xf0] }
 0x2cb   : > { %v3341_v40 = vpop.f32.mrf.mxu0  ;;  %v3357_v41 = vpop.f32.mrf.mxu2  ;;  %v9058_v6 = vld [vmem:[%s14471_s7 + $0x228] sm:$0xf0]  ;;  %v9040_v17 = vld [vmem:[%s14471_s7 + $0x1d8] sm:$0xf] }
 0x2cc   : > { %4100 = vmatmul.bf16.vlgmr.msrb.gmra.mxu3 %v3449_v35  ;;  %v3342_v54 = vadd.f32 %v3341_v40, %v2796_v15  ;;  %v9057_v35 = vor.u32 %v10483_v25, %v9056_v24  ;;  %v8866_v16 = vld [vmem:[%s14471_s7 + $0xa8] sm:$0xf0]  ;;  %v10477_v18 = vld [vmem:[%s14471_s7 + $0x1f4] sm:$0xf0] }
 0x2cd   : > { %4684 = vmatpush.bf16.msrb.mxu2 %v8793_v30  ;;  %4733 = vmatpush.bf16.msrb.mxu3 %v9025_v31  ;;  %v3439_v48 = vpop.f32.mrf.mxu3  ;;  %v10422_v30 = vld [vmem:[%s14471_s7 + $0x44] sm:$0xf]  ;;  %v10423_v24 = vld [vmem:[%s14471_s7 + $0x4c] sm:$0xf] }
 0x2ce   : > { %v3425_v23 = vpop.f32.mrf.mxu1  ;;  %4706 = vmatpush.bf16.msra.mxu0 %v8989_v34  ;;  %v3356_v9 = vadd.f32 %v13007_v7, %v3342_v54  ;;  %v10463_v7 = vld [vmem:[%s14471_s7 + $0x18c] sm:$0xf]  ;;  %v8826_v31 = vld [vmem:[%s14471_s7 + $0x60] sm:$0xf0] }
 0x2cf   : > { %v3426_v61 = vadd.f32 %v3425_v23, %v2799_v49  ;;  %v8864_v23 = vld [vmem:[%s14471_s7 + $0x88] sm:$0xf]  ;;  %v8997_v34 = vor.u32 %v10463_v7, %v8994_v22  ;;  %v10487_v54 = vld [vmem:[%s14471_s7 + $0x24c] sm:$0xf]  ;;  %v10468_v7 = vld [vmem:[%s14471_s7 + $0x1ac] sm:$0xf0]  ;;  %v9041_v22 = vor.u32 %v10477_v18, %v9040_v17 }
 0x2d0   : > { %v8865_v40 = vor.u32 %v10435_v29, %v8864_v23  ;;  %v9008_v23 = vld [vmem:[%s14471_s7 + $0x198] sm:$0xf]  ;;  %v8968_v29 = vld [vmem:[%s14471_s7 + $0x150] sm:$0xf] }
 0x2d1   : > { %4734 = vmatpush.bf16.msrb.mxu3 %v8993_v26  ;;  %v3440_v10 = vadd.f32 %v3439_v48, %v3426_v61  ;;  %v10427_v48 = vld [vmem:[%s14471_s7 + $0x64] sm:$0xf0]  ;;  %v10414_v26 = vld [vmem:[%s14471_s7 + $0x4] sm:$0xf]  ;;  %v10428_v17 = vld [vmem:[%s14471_s7 + $0x6c] sm:$0xf0] }
 0x2d2   : > { %4707 = vmatpush.bf16.msra.mxu0 %v8957_v43  ;;  %v8965_v43 = vor.u32 %v10455_v36, %v8962_v37  ;;  %v8976_v37 = vld [vmem:[%s14471_s7 + $0x158] sm:$0xf] }
 0x2d3   : > { %v3343_v59 = vpop.f32.mrf.mxu0 }
 0x2d4   : > { %v3344_v63 = vadd.f32 %v3343_v59, %v2796_v15  ;;  %v8829_v15 = vor.u32 %v10422_v30, %v8826_v31  ;;  %v9096_v59 = vld [vmem:[%s14471_s7 + $0x250] sm:$0xf] }
 0x2d5   : > { %4735 = vmatpush.bf16.msrb.mxu3 %v8961_v51  ;;  %v3441_v2 = vpop.f32.mrf.mxu3  ;;  %v9097_v4 = vor.u32 %v10492_v60, %v9096_v59  ;;  %v10460_v30 = vld [vmem:[%s14471_s7 + $0x16c] sm:$0xf0]  ;;  %v10464_v59 = vld [vmem:[%s14471_s7 + $0x194] sm:$0xf] }
 0x2d6   : > { %v3427_v50 = vpop.f32.mrf.mxu1  ;;  %4708 = vmatpush.bf16.msra.mxu0 %v8925_v53  ;;  %v3358_v12 = vadd.f32 %v3357_v41, %v3344_v63  ;;  %v8832_v41 = vld [vmem:[%s14471_s7 + $0x48] sm:$0xf]  ;;  %v10439_v63 = vld [vmem:[%s14471_s7 + $0xcc] sm:$0xf]  ;;  %v8969_v36 = vor.u32 %v10460_v30, %v8968_v29  ;;  %v9002_v60 = vld [vmem:[%s14471_s7 + $0x1b0] sm:$0xf0] }
 0x2d7   : > { %v3428_v62 = vadd.f32 %v3427_v50, %v2799_v49  ;;  %v8833_v46 = vor.u32 %v10427_v48, %v8832_v41  ;;  %v8800_v49 = vld [vmem:[%s14471_s7 + $0x8] sm:$0xf]  ;;  %v8797_v50 = vor.u32 %v10414_v26, %v8794_v47  ;;  %v10452_v41 = vld [vmem:[%s14471_s7 + $0x12c] sm:$0xf0]  ;;  %v9098_v48 = vld [vmem:[%s14471_s7 + $0x270] sm:$0xf0] }
 0x2d8   : > { %v3448_v20 = vpack.c.bf16 %v3358_v12, %v3356_v9  ;;  %v10419_v53 = vld [vmem:[%s14471_s7 + $0x24] sm:$0xf0]  ;;  %v9064_v9 = vld [vmem:[%s14471_s7 + $0x210] sm:$0xf]  ;;  %v10431_v12 = vld [vmem:[%s14471_s7 + $0x8c] sm:$0xf] }
 0x2d9   : > { %v3442_v14 = vadd.f32 %v3441_v2, %v3428_v62  ;;  %4736 = vmatpush.bf16.msrb.mxu3 %v8929_v3  ;;  %v8801_v33 = vor.u32 %v10419_v53, %v8800_v49  ;;  %v9093_v2 = vor.u32 %v10487_v54, %v9090_v55  ;;  %v10453_v49 = vld [vmem:[%s14471_s7 + $0x134] sm:$0xf0]  ;;  %v9066_v53 = vld [vmem:[%s14471_s7 + $0x230] sm:$0xf0]  ;;  %v10473_v55 = vld [vmem:[%s14471_s7 + $0x1dc] sm:$0xf] }
 0x2da   : > { %4709 = vmatpush.bf16.msra.mxu0 %v8893_v8  ;;  %4086 = vmatmul.bf16.vlgmr.msra.gmra.mxu2 %v3448_v20  ;;  %v8901_v8 = vor.u32 %v10439_v63, %v8898_v0  ;;  %v8912_v63 = vld [vmem:[%s14471_s7 + $0xd8] sm:$0xf]  ;;  %v10449_v30 = vld [vmem:[%s14471_s7 + $0x11c] sm:$0xf] }
 0x2db   : > { %v13084_v1 = vpop.f32.mrf.mxu2  ;;  %v3451_v13 = vpack.c.bf16 %v3442_v14, %v3440_v10  ;;  %4761 = vmatpush.bf16.msra.mxu2 %v9029_v19  ;;  %v3411_v32 = vpop.f32.mrf.mxu0  ;;  %v10484_v10 = vld [vmem:[%s14471_s7 + $0x22c] sm:$0xf0]  ;;  %v10445_v0 = vld [vmem:[%s14471_s7 + $0xf4] sm:$0xf0] }
 0x2dc   : > { %9110 = vmatmul.msk.bf16.vlgmr.msra.gmra.mxu3 %vm1762_vm1, %v13102_v21  ;;  %v3398_v51 = vadd.f32 %v13084_v1, %v2798_v38  ;;  %v10476_v1 = vld [vmem:[%s14471_s7 + $0x1ec] sm:$0xf0]  ;;  %v9065_v20 = vor.u32 %v10484_v10, %v9064_v9  ;;  %v8880_v10 = vld [vmem:[%s14471_s7 + $0x98] sm:$0xf] }
 0x2dd   : > { %4128 = vmatmul.bf16.vlgmr.msra.gmra.mxu1 %v3451_v13  ;;  %4737 = vmatpush.bf16.msrb.mxu3 %v8897_v27  ;;  %v9033_v14 = vor.u32 %v10476_v1, %v9032_v11  ;;  %v9000_v19 = vld [vmem:[%s14471_s7 + $0x190] sm:$0xf]  ;;  %v8869_v13 = vor.u32 %v10431_v12, %v8866_v16  ;;  %v8834_v27 = vld [vmem:[%s14471_s7 + $0x68] sm:$0xf0]  ;;  %v10437_v12 = vld [vmem:[%s14471_s7 + $0xb4] sm:$0xf0] }
 0x2de   : > { %4753 = vmatpush.bf16.msra.mxu1 %v9089_v39  ;;  %4710 = vmatpush.bf16.msra.mxu0 %v8861_v28  ;;  %v3412_v61 = vadd.f32 %v3411_v32, %v3398_v51  ;;  %v9061_v39 = vor.u32 %v10479_v5, %v9058_v6  ;;  %v9001_v25 = vor.u32 %v10468_v7, %v9000_v19  ;;  %v10469_v28 = vld [vmem:[%s14471_s7 + $0x1b4] sm:$0xf0]  ;;  %v10444_v51 = vld [vmem:[%s14471_s7 + $0xec] sm:$0xf0]  ;;  %v10456_v6 = vld [vmem:[%s14471_s7 + $0x154] sm:$0xf] }
 0x2df   : > { %4762 = vmatpush.bf16.msra.mxu2 %v8997_v34  ;;  %v8837_v31 = vor.u32 %v10423_v24, %v8834_v27  ;;  %v9009_v32 = vor.u32 %v10469_v28, %v9008_v23  ;;  %v10415_v34 = vld [vmem:[%s14471_s7 + $0xc] sm:$0xf]  ;;  %v8872_v11 = vld [vmem:[%s14471_s7 + $0x90] sm:$0xf]  ;;  %v8913_v5 = vor.u32 %v10445_v0, %v8912_v63  ;;  %v10457_v19 = vld [vmem:[%s14471_s7 + $0x15c] sm:$0xf] }
 0x2e0   : > { %v10436_v1 = vld [vmem:[%s14471_s7 + $0xac] sm:$0xf0]  ;;  %v8978_v7 = vld [vmem:[%s14471_s7 + $0x178] sm:$0xf0]  ;;  %v8848_v24 = vld [vmem:[%s14471_s7 + $0x58] sm:$0xf] }
 0x2e1   : > { %4738 = vmatpush.bf16.msrb.mxu3 %v8865_v40  ;;  %v8936_v40 = vld [vmem:[%s14471_s7 + $0x110] sm:$0xf]  ;;  %v8873_v9 = vor.u32 %v10436_v1, %v8872_v11  ;;  %v8981_v27 = vor.u32 %v10457_v19, %v8978_v7  ;;  %v8810_v63 = vld [vmem:[%s14471_s7 + $0x30] sm:$0xf0]  ;;  %v10489_v0 = vld [vmem:[%s14471_s7 + $0x25c] sm:$0xf] }
 0x2e2   : > { %4754 = vmatpush.bf16.msra.mxu1 %v9057_v35  ;;  %4711 = vmatpush.bf16.msra.mxu0 %v8829_v15  ;;  %v8802_v35 = vld [vmem:[%s14471_s7 + $0x28] sm:$0xf0]  ;;  %v10488_v15 = vld [vmem:[%s14471_s7 + $0x254] sm:$0xf]  ;;  %v8937_v44 = vor.u32 %v10452_v41, %v8936_v40  ;;  %v8840_v16 = vld [vmem:[%s14471_s7 + $0x50] sm:$0xf] }
 0x2e3   : > { %v3399_v42 = vpop.f32.mrf.mxu2  ;;  %4763 = vmatpush.bf16.msra.mxu2 %v8965_v43  ;;  %v3413_v56 = vpop.f32.mrf.mxu0  ;;  %v8805_v26 = vor.u32 %v10415_v34, %v8802_v35  ;;  %v9034_v43 = vld [vmem:[%s14471_s7 + $0x1f0] sm:$0xf0]  ;;  %v9101_v45 = vor.u32 %v10488_v15, %v9098_v48  ;;  %v8808_v23 = vld [vmem:[%s14471_s7 + $0x10] sm:$0xf]  ;;  %v9104_v41 = vld [vmem:[%s14471_s7 + $0x258] sm:$0xf] }
 0x2e4   : > { %v3400_v52 = vadd.f32 %v3399_v42, %v2798_v38  ;;  %v10461_v38 = vld [vmem:[%s14471_s7 + $0x174] sm:$0xf0]  ;;  %v10472_v42 = vld [vmem:[%s14471_s7 + $0x1d4] sm:$0xf]  ;;  %v10420_v28 = vld [vmem:[%s14471_s7 + $0x2c] sm:$0xf0] }
 0x2e5   : > { %4739 = vmatpush.bf16.msrb.mxu3 %v8833_v46  ;;  %v8977_v47 = vor.u32 %v10461_v38, %v8976_v37  ;;  %v8944_v46 = vld [vmem:[%s14471_s7 + $0x118] sm:$0xf]  ;;  %v9037_v54 = vor.u32 %v10472_v42, %v9034_v43  ;;  %v10440_v34 = vld [vmem:[%s14471_s7 + $0xd4] sm:$0xf] }
 0x2e6   : > { %v3414_v62 = vadd.f32 %v3413_v56, %v3400_v52  ;;  %4712 = vmatpush.bf16.msra.mxu0 %v8797_v50  ;;  %v8904_v50 = vld [vmem:[%s14471_s7 + $0xd0] sm:$0xf]  ;;  %v10480_v52 = vld [vmem:[%s14471_s7 + $0x214] sm:$0xf]  ;;  %v9042_v56 = vld [vmem:[%s14471_s7 + $0x1f8] sm:$0xf0] }
 0x2e7   : > { %4764 = vmatpush.bf16.msra.mxu2 %v8933_v57  ;;  %v8945_v57 = vor.u32 %v10453_v49, %v8944_v46  ;;  %v8906_v35 = vld [vmem:[%s14471_s7 + $0xf0] sm:$0xf0]  ;;  %v8816_v37 = vld [vmem:[%s14471_s7 + $0x18] sm:$0xf] }
 0x2e8   : > { %v3450_v3 = vpack.c.bf16 %v3414_v62, %v3412_v61  ;;  %v8905_v61 = vor.u32 %v10444_v51, %v8904_v50  ;;  %v9069_v62 = vor.u32 %v10480_v52, %v9066_v53  ;;  %v10421_v38 = vld [vmem:[%s14471_s7 + $0x34] sm:$0xf0]  ;;  %v8909_v48 = vor.u32 %v10440_v34, %v8906_v35  ;;  %v10432_v43 = vld [vmem:[%s14471_s7 + $0x94] sm:$0xf]  ;;  %v10433_v52 = vld [vmem:[%s14471_s7 + $0x9c] sm:$0xf] }
 0x2e9   : > { %4740 = vmatpush.bf16.msrb.mxu3 %v8801_v33  ;;  %v9045_v33 = vor.u32 %v10473_v55, %v9042_v56  ;;  %v10493_v15 = vld [vmem:[%s14471_s7 + $0x274] sm:$0xf0]  ;;  %v8817_v42 = vor.u32 %v10421_v38, %v8816_v37  ;;  %v8882_v53 = vld [vmem:[%s14471_s7 + $0xb8] sm:$0xf0]  ;;  %v8842_v55 = vld [vmem:[%s14471_s7 + $0x70] sm:$0xf0] }
 0x2ea   : > { %4114 = vmatmul.bf16.vlgmr.msrb.gmra.mxu0 %v3450_v3  ;;  %4685 = vmatmul.bf16.vlgmr.msrb.gmra.mxu2 %v11831_v58  ;;  %v10465_v3 = vld [vmem:[%s14471_s7 + $0x19c] sm:$0xf]  ;;  %v9072_v49 = vld [vmem:[%s14471_s7 + $0x218] sm:$0xf]  ;;  %v10561_v19 = vld [vmem:[%s14474_s10 + $0x10] sm:$0xff] }
 0x2eb   : > { %4781 = vmatpush.bf16.msrb.mxu0 %v9093_v2  ;;  %4765 = vmatpush.bf16.msra.mxu2 %v8901_v8  ;;  %v9005_v2 = vor.u32 %v10464_v59, %v9002_v60  ;;  %v8970_v8 = vld [vmem:[%s14471_s7 + $0x170] sm:$0xf0]  ;;  %v10485_v50 = vld [vmem:[%s14471_s7 + $0x234] sm:$0xf0]  ;;  %v10425_v60 = vld [vmem:[%s14471_s7 + $0x5c] sm:$0xf] }
 0x2ec   : > { %4741 = vmatmul.bf16.vlgmr.msrb.gmra.mxu3 %v11831_v58  ;;  %v8973_v18 = vor.u32 %v10456_v6, %v8970_v8  ;;  %v9073_v56 = vor.u32 %v10485_v50, %v9072_v49  ;;  %v10481_v6 = vld [vmem:[%s14471_s7 + $0x21c] sm:$0xf]  ;;  %v10532_v35 = vld [vmem:[%s14473_s9 + $0x128] sm:$0xff]  ;;  %v10509_v37 = vld [vmem:[%s14473_s9 + $0x70] sm:$0xff] }
 0x2ed   : > { %4809 = vmatpush.bf16.msra.mxu3 %v9097_v4  ;;  %9111 = vmatmul.msk.bf16.vlgmr.msrb.gmra.mxu1 %vm1762_vm1, %v13102_v21  ;;  %v9010_v4 = vld [vmem:[%s14471_s7 + $0x1b8] sm:$0xf0]  ;;  %v10529_v49 = vld [vmem:[%s14473_s9 + $0x110] sm:$0xff]  ;;  %v9120_v50 = vld [vmem:[%s12008_s29 + $0x4] sm:$0xf] }
 0x2ee   : > { %4789 = vmatpush.bf16.msrb.mxu1 %v9033_v14  ;;  %v9013_v14 = vor.u32 %v10465_v3, %v9010_v4  ;;  %v8818_v3 = vld [vmem:[%s14471_s7 + $0x38] sm:$0xf0] }
 0x2ef   : > { %4782 = vmatpush.bf16.msrb.mxu0 %v9061_v39  ;;  %4766 = vmatpush.bf16.msra.mxu2 %v8869_v13  ;;  %v8881_v39 = vor.u32 %v10437_v12, %v8880_v10  ;;  %v8938_v13 = vld [vmem:[%s14471_s7 + $0x130] sm:$0xf0]  ;;  %v9074_v8 = vld [vmem:[%s14471_s7 + $0x238] sm:$0xf0] }
 0x2f0   : > { %v9077_v10 = vor.u32 %v10481_v6, %v9074_v8  ;;  %v10502_v12 = vld [vmem:[%s14473_s9 + $0x38] sm:$0xff]  ;;  %v10548_v8 = vld [vmem:[%s14473_s9 + $0x1a8] sm:$0xff] }
 0x2f1   : > { %4810 = vmatpush.bf16.msra.mxu3 %v9065_v20  ;;  %v10448_v20 = vld [vmem:[%s14471_s7 + $0x114] sm:$0xf]  ;;  %v10498_v7 = vld [vmem:[%s14473_s9 + $0x18] sm:$0xff] }
 0x2f2   : > { %4790 = vmatpush.bf16.msrb.mxu1 %v9001_v25  ;;  %v10429_v25 = vld [vmem:[%s14471_s7 + $0x74] sm:$0xf0]  ;;  %v8941_v29 = vor.u32 %v10448_v20, %v8938_v13  ;;  %v10559_v20 = vld [vmem:[%s14474_s10] sm:$0xff] }
 0x2f3   : > { %4767 = vmatpush.bf16.msra.mxu2 %v8837_v31  ;;  %v8946_v31 = vld [vmem:[%s14471_s7 + $0x138] sm:$0xf0] }
 0x2f4   : > { %v8949_v40 = vor.u32 %v10449_v30, %v8946_v31  ;;  %v10518_v13 = vld [vmem:[%s14473_s9 + $0xb8] sm:$0xff] }
 0x2f5   : > { %4845 = vmatpush.bf16.msrb.mxu3 %v9041_v22  ;;  %v8841_v22 = vor.u32 %v10428_v17, %v8840_v16  ;;  %v10562_v16 = vld [vmem:[%s14474_s10 + $0x18] sm:$0xff]  ;;  %v10500_v17 = vld [vmem:[%s14473_s9 + $0x28] sm:$0xff] }
 0x2f6   : > { %4791 = vmatpush.bf16.msrb.mxu1 %v8969_v36  ;;  %v8809_v36 = vor.u32 %v10420_v28, %v8808_v23  ;;  %v10534_v23 = vld [vmem:[%s14473_s9 + $0x138] sm:$0xff]  ;;  %v10516_v28 = vld [vmem:[%s14473_s9 + $0xa8] sm:$0xff] }
 0x2f7   : > { %4768 = vmatpush.bf16.msra.mxu2 %v8805_v26  ;;  %v10441_v26 = vld [vmem:[%s14471_s7 + $0xdc] sm:$0xf] }
 0x2f8   : > { %v10510_v31 = vld [vmem:[%s14473_s9 + $0x78] sm:$0xff] }
 0x2f9   : > { %4846 = vmatpush.bf16.msrb.mxu3 %v9009_v32  ;;  %v8849_v32 = vor.u32 %v10429_v25, %v8848_v24  ;;  %v10517_v24 = vld [vmem:[%s14473_s9 + $0xb0] sm:$0xff]  ;;  %v10514_v38 = vld [vmem:[%s14473_s9 + $0x98] sm:$0xff] }
 0x2fa   : > { %4792 = vmatpush.bf16.msrb.mxu1 %v8937_v44  ;;  %4713 = vmatmul.bf16.vlgmr.msra.gmra.mxu0 %v11831_v58  ;;  %v8874_v44 = vld [vmem:[%s14471_s7 + $0xb0] sm:$0xf0] }
 0x2fb   : > { %4837 = vmatpush.bf16.msrb.mxu2 %v9101_v45  ;;  %4817 = vmatpush.bf16.msra.mxu0 %v9037_v54  ;;  %v9105_v45 = vor.u32 %v10493_v15, %v9104_v41  ;;  %v8877_v51 = vor.u32 %v10432_v43, %v8874_v44  ;;  %v10424_v54 = vld [vmem:[%s14471_s7 + $0x54] sm:$0xf]  ;;  %v10507_v44 = vld [vmem:[%s14473_s9 + $0x60] sm:$0xff] }
 0x2fc   : > { %4769 = vmatmul.bf16.vlgmr.msra.gmra.mxu2 %v11831_v58  ;;  %9114 = vmatmul.msk.bf16.vlgmr.msra.gmra.mxu3 %vm1762_vm1, %v13102_v21  ;;  %v8845_v59 = vor.u32 %v10424_v54, %v8842_v55  ;;  %v10506_v54 = vld [vmem:[%s14473_s9 + $0x58] sm:$0xff]  ;;  %v10511_v55 = vld [vmem:[%s14473_s9 + $0x80] sm:$0xff] }
 0x2fd   : > { %4847 = vmatpush.bf16.msrb.mxu3 %v8977_v47  ;;  %9112 = vmatmul.msk.bf16.vlgmr.msra.gmra.mxu1 %vm1762_vm1, %v13102_v21  ;;  %v8914_v47 = vld [vmem:[%s14471_s7 + $0xf8] sm:$0xf0] }
 0x2fe   : > { %4793 = vmatpush.bf16.msrb.mxu1 %v8905_v61  ;;  %v8917_v46 = vor.u32 %v10441_v26, %v8914_v47  ;;  %v8850_v61 = vld [vmem:[%s14471_s7 + $0x78] sm:$0xf0]  ;;  %v10513_v26 = vld [vmem:[%s14473_s9 + $0x90] sm:$0xff] }
 0x2ff   : > { %4838 = vmatpush.bf16.msrb.mxu2 %v9069_v62  ;;  %4818 = vmatpush.bf16.msra.mxu0 %v9005_v2  ;;  %v10416_v62 = vld [vmem:[%s14471_s7 + $0x14] sm:$0xf]  ;;  %v8853_v11 = vor.u32 %v10425_v60, %v8850_v61  ;;  %v10417_v2 = vld [vmem:[%s14471_s7 + $0x1c] sm:$0xf]  ;;  %v10528_v61 = vld [vmem:[%s14473_s9 + $0x108] sm:$0xff] }
 0x300   : > { %v8813_v1 = vor.u32 %v10416_v62, %v8810_v63  ;;  %v10530_v47 = vld [vmem:[%s14473_s9 + $0x118] sm:$0xff]  ;;  %v10525_v60 = vld [vmem:[%s14473_s9 + $0xf0] sm:$0xff] }
 0x301   : > { %4848 = vmatpush.bf16.msrb.mxu3 %v8945_v57  ;;  %v8885_v57 = vor.u32 %v10433_v52, %v8882_v53  ;;  %v3633_v30 = vpop.f32.mrf.mxu0 }
 0x302   : > { %4794 = vmatpush.bf16.msrb.mxu1 %v8873_v9  ;;  %v8821_v9 = vor.u32 %v10417_v2, %v8818_v3  ;;  %v10524_v2 = vld [vmem:[%s14473_s9 + $0xe8] sm:$0xff]  ;;  %v10527_v3 = vld [vmem:[%s14473_s9 + $0x100] sm:$0xff] }
 0x303   : > { %4873 = vmatpush.bf16.msra.mxu2 %v9045_v33  ;;  %4819 = vmatpush.bf16.msra.mxu0 %v8973_v18  ;;  %v9106_v33 = vld [vmem:[%s14471_s7 + $0x278] sm:$0xf0]  ;;  %v5614_v18 = vld [vmem:[%s11029_s18] sm:$0xf] }
 0x304   : > { %v9109_v4 = vor.u32 %v10489_v0, %v9106_v33  ;;  %5618 = vrot.lane.b32.xlu2 %v5614_v18, %s10741_s30  ;;  %v10505_v33 = vld [vmem:[%s14473_s9 + $0x50] sm:$0xff]  ;;  %v10503_v18 = vld [vmem:[%s14473_s9 + $0x40] sm:$0xff] }
 0x305   : > { %4849 = vmatpush.bf16.msrb.mxu3 %v8913_v5  ;;  %v5615_v5 = vld [vmem:[%s11029_s18 + $0x4] sm:$0xf] }
 0x306   : > { %4795 = vmatpush.bf16.msrb.mxu1 %v8841_v22  ;;  %5620 = vrot.lane.b32.xlu0 %v5615_v5, %s10741_s30  ;;  %v10496_v22 = vld [vmem:[%s14473_s9 + $0x8] sm:$0xff] }
 0x307   : > { %4874 = vmatpush.bf16.msra.mxu2 %v9013_v14  ;;  %4820 = vmatpush.bf16.msra.mxu0 %v8941_v29  ;;  %v10501_v14 = vld [vmem:[%s14473_s9 + $0x30] sm:$0xff] }
 0x308   : > { %v10533_v29 = vld [vmem:[%s14473_s9 + $0x130] sm:$0xff] }
 0x309   : > { %4850 = vmatpush.bf16.msrb.mxu3 %v8881_v39  ;;  %v10497_v39 = vld [vmem:[%s14473_s9 + $0x10] sm:$0xff]  ;;  %v3635_v15 = vpop.f32.mrf.mxu0 }
 0x30a   : > { %4796 = vmatpush.bf16.msrb.mxu1 %v8809_v36  ;;  %9113 = vmatmul.msk.bf16.vlgmr.msrb.gmra.mxu0 %vm1762_vm1, %v13102_v21 }
 0x30b   : > { %4875 = vmatpush.bf16.msra.mxu2 %v8981_v27  ;;  %4821 = vmatpush.bf16.msra.mxu0 %v8909_v48  ;;  %v10495_v27 = vld [vmem:[%s14473_s9] sm:$0xff]  ;;  %v10508_v48 = vld [vmem:[%s14473_s9 + $0x68] sm:$0xff] }
 0x30c   : > { %9115 = vmatmul.msk.bf16.vlgmr.msrb.gmra.mxu2 %vm1762_vm1, %v13102_v21 }
 0x30d   : > { %4851 = vmatpush.bf16.msrb.mxu3 %v8849_v32  ;;  %4797 = vmatmul.bf16.vlgmr.msrb.gmra.mxu1 %v11831_v58  ;;  %v10515_v32 = vld [vmem:[%s14473_s9 + $0xa0] sm:$0xff] }
 0x30e   : > { %4865 = vmatpush.bf16.msra.mxu1 %v9105_v45  ;;  %v10512_v45 = vld [vmem:[%s14473_s9 + $0x88] sm:$0xff] }
 0x30f   : > { %4876 = vmatpush.bf16.msra.mxu2 %v8949_v40  ;;  %4822 = vmatpush.bf16.msra.mxu0 %v8877_v51  ;;  %v10531_v40 = vld [vmem:[%s14473_s9 + $0x120] sm:$0xff]  ;;  %v10494_v51 = vld [vmem:[%s12008_s29 + $0x8] sm:$0xf0] }
 0x310   : > { %v9121_v52 = vor.u32 %v10494_v51, %v9120_v50  ;;  %v10538_v51 = vld [vmem:[%s14473_s9 + $0x158] sm:$0xff] }
 0x311   : > { %4852 = vmatpush.bf16.msrb.mxu3 %v8817_v42 }
 0x312   : > { %4866 = vmatpush.bf16.msra.mxu1 %v9073_v56 }
 0x313   : > { %4877 = vmatpush.bf16.msra.mxu2 %v8917_v46  ;;  %4823 = vmatpush.bf16.msra.mxu0 %v8845_v59  ;;  %v10526_v46 = vld [vmem:[%s14473_s9 + $0xf8] sm:$0xff] }
 0x314   : > { %4853 = vmatmul.bf16.vlgmr.msrb.gmra.mxu3 %v11831_v58 }
 0x315   : > { %5477 = vmatpush.bf16.msra.mxu3 %v10502_v12  ;;  %v10523_v12 = vld [vmem:[%s14473_s9 + $0xe0] sm:$0xff] }
 0x316   : > { %5083 = vmatpush.bf16.msrb.mxu1 %v10562_v16 }
 0x317   : > { %4878 = vmatpush.bf16.msra.mxu2 %v8885_v57  ;;  %4824 = vmatpush.bf16.msra.mxu0 %v8813_v1  ;;  %v10550_v57 = vld [vmem:[%s14473_s9 + $0x1b8] sm:$0xff] }
 0x319   : > { %5478 = vmatpush.bf16.msra.mxu3 %v10501_v14 }
 0x31a   : > { %4825 = vmatmul.bf16.vlgmr.msra.gmra.mxu0 %v11831_v58  ;;  %5084 = vmatpush.bf16.msrb.mxu1 %v10561_v19  ;;  %v10542_v19 = vld [vmem:[%s14473_s9 + $0x178] sm:$0xff] }
 0x31b   : > { %4879 = vmatpush.bf16.msra.mxu2 %v8853_v11  ;;  %4893 = vmatpush.bf16.msrb.mxu0 %v9109_v4  ;;  %v10549_v11 = vld [vmem:[%s14473_s9 + $0x1b0] sm:$0xff]  ;;  %v10504_v4 = vld [vmem:[%s14473_s9 + $0x48] sm:$0xff] }
 0x31d   : > { %9116 = vmatmul.msk.bf16.vlgmr.msra.gmra.mxu1 %vm1762_vm1, %v13102_v21  ;;  %5479 = vmatpush.bf16.msra.mxu3 %v10500_v17 }
 0x31f   : > { %4880 = vmatpush.bf16.msra.mxu2 %v8821_v9  ;;  %4894 = vmatpush.bf16.msrb.mxu0 %v9077_v10 }
 0x322   : > { %4881 = vmatmul.bf16.vlgmr.msra.gmra.mxu2 %v11831_v58  ;;  %v10499_v58 = vld [vmem:[%s14473_s9 + $0x20] sm:$0xff] }
 0x323   : > { %5480 = vmatpush.bf16.msra.mxu3 %v10499_v58  ;;  %5491 = vmatpush.bf16.msra.mxu0 %v10510_v31 }
 0x324   : > { %5519 = vmatpush.bf16.msrb.mxu2 %v10526_v46 }
 0x327   : > { %5481 = vmatpush.bf16.msra.mxu3 %v10498_v7  ;;  %5492 = vmatpush.bf16.msra.mxu0 %v10509_v37  ;;  %v10547_v7 = vld [vmem:[%s14473_s9 + $0x1a0] sm:$0xff]  ;;  %v10545_v37 = vld [vmem:[%s14473_s9 + $0x190] sm:$0xff] }
 0x328   : > { %5520 = vmatpush.bf16.msrb.mxu2 %v10525_v60  ;;  %v10625_v60 = vld [vmem:[%s14471_s7 + $0x1dc] sm:$0xf0] }
 0x32a   : > { %9117 = vmatmul.msk.bf16.vlgmr.msrb.gmra.mxu0 %vm1762_vm1, %v13102_v21  ;;  %v10560_v21 = vld [vmem:[%s14474_s10 + $0x8] sm:$0xff] }
 0x32b   : > { %5085 = vmatpush.bf16.msrb.mxu1 %v10560_v21  ;;  %5482 = vmatpush.bf16.msra.mxu3 %v10497_v39  ;;  %v10522_v39 = vld [vmem:[%s14473_s9 + $0xd8] sm:$0xff] }
 0x32c   : > { %5493 = vmatpush.bf16.msra.mxu0 %v10508_v48  ;;  %5521 = vmatpush.bf16.msrb.mxu2 %v10524_v2 }
 0x32f   : > { %5086 = vmatpush.bf16.msrb.mxu1 %v10559_v20  ;;  %5483 = vmatpush.bf16.msra.mxu3 %v10496_v22 }
 0x330   : > { %5494 = vmatpush.bf16.msra.mxu0 %v10507_v44  ;;  %5522 = vmatpush.bf16.msrb.mxu2 %v10523_v12  ;;  %v10519_v44 = vld [vmem:[%s14473_s9 + $0xc0] sm:$0xff] }
 0x332   : > { %9138 = vmatmul.msk.bf16.vlgmr.msrb.gmra.mxu1 %vm2165_vm2, %v9121_v52  ;;  %v10543_v52 = vld [vmem:[%s14473_s9 + $0x180] sm:$0xff] }
 0x333   : > { %5505 = vmatpush.bf16.msra.mxu1 %v10518_v13  ;;  %5484 = vmatpush.bf16.msra.mxu3 %v10495_v27  ;;  %v4031_v41 = vpop.f32.mrf.mxu2  ;;  %v10728_v27 = vld [vmem:[%s14475_s11] ss:$0 sm:$0xff] }
 0x334   : > { %v4032_v59 = vadd.f32 %v4031_v41, %v3633_v30  ;;  %5495 = vmatpush.bf16.msra.mxu0 %v10506_v54  ;;  %5523 = vmatpush.bf16.msrb.mxu2 %v10522_v39  ;;  %v10521_v30 = vld [vmem:[%s14473_s9 + $0xd0] sm:$0xff]  ;;  %v10621_v39 = vld [vmem:[%s14471_s7 + $0x1c4] sm:$0xf] }
 0x337   : > { %5506 = vmatpush.bf16.msra.mxu1 %v10517_v24  ;;  %5533 = vmatpush.bf16.msrb.mxu3 %v10534_v23  ;;  %v13518_v34 = vpop.f32.mrf.mxu1  ;;  %v10541_v23 = vld [vmem:[%s14473_s9 + $0x170] sm:$0xff] }
 0x338   : > { %5496 = vmatpush.bf16.msra.mxu0 %v10505_v33  ;;  %5524 = vmatpush.bf16.msrb.mxu2 %v10521_v30 }
 0x33b   : > { %v4045_v25 = vpop.f32.mrf.mxu3  ;;  %5507 = vmatpush.bf16.msra.mxu1 %v10516_v28  ;;  %5534 = vmatpush.bf16.msrb.mxu3 %v10533_v29  ;;  %v4033_v56 = vpop.f32.mrf.mxu2  ;;  %v10546_v28 = vld [vmem:[%s14473_s9 + $0x198] sm:$0xff] }
 0x33c   : > { %v4046_v0 = vadd.f32 %v4045_v25, %v4032_v59  ;;  %v4034_v9 = vadd.f32 %v4033_v56, %v3635_v15  ;;  %5497 = vmatpush.bf16.msra.mxu0 %v10504_v4  ;;  %v13639_v15 = vld [vmem:[%s14472_s8] sm:$0xff] }
 0x33d   : > { %v4249_v46 = vperm.slane %v13639_v15, 0  ;;  %v9629_v59 = vld [vmem:[%s14471_s7 + $0x1c0] sm:$0xf] }
 0x33e   : > { %v9630_v2 = vor.u32 %v10625_v60, %v9629_v59  ;;  %v9597_v4 = vld [vmem:[%s14471_s7 + $0x180] sm:$0xf] }
 0x33f   : > { %5508 = vmatpush.bf16.msra.mxu1 %v10515_v32  ;;  %5535 = vmatpush.bf16.msrb.mxu3 %v10532_v35  ;;  %v13543_v42 = vpop.f32.mrf.mxu1  ;;  %v9469_v59 = vld [vmem:[%s14471_s7 + $0x80] sm:$0xf] }
 0x340   : > { %5498 = vmatpush.bf16.msra.mxu0 %v10503_v18  ;;  %v10535_v18 = vld [vmem:[%s14473_s9 + $0x140] sm:$0xff] }
 0x341   : > { %v10585_v60 = vld [vmem:[%s14471_s7 + $0x9c] sm:$0xf0] }
 0x343   : > { %v13523_v36 = vpop.f32.mrf.mxu3  ;;  %5509 = vmatpush.bf16.msra.mxu1 %v10514_v38  ;;  %5536 = vmatpush.bf16.msrb.mxu3 %v10531_v40  ;;  %v10520_v38 = vld [vmem:[%s14473_s9 + $0xc8] sm:$0xff] }
 0x344   : > { %v4048_v17 = vadd.f32 %v13523_v36, %v4034_v9  ;;  %5547 = vmatpush.bf16.msrb.mxu0 %v10542_v19  ;;  %v10540_v36 = vld [vmem:[%s14473_s9 + $0x168] sm:$0xff]  ;;  %5525 = vmatpush.bf16.msrb.mxu2 %v10520_v38  ;;  %v10613_v38 = vld [vmem:[%s14471_s7 + $0x184] sm:$0xf] }
 0x345   : > { %v4059_v53 = vpop.f32.mrf.mxu0  ;;  %v10556_v9 = vld [vmem:[%s14473_s9 + $0x1e8] sm:$0xff] }
 0x346   : > { %v4060_v1 = vadd.f32 %v4059_v53, %v4046_v0  ;;  %v10558_v53 = vld [vmem:[%s14473_s9 + $0x1f8] sm:$0xff] }
 0x347   : > { %5510 = vmatpush.bf16.msra.mxu1 %v10513_v26  ;;  %5537 = vmatpush.bf16.msrb.mxu3 %v10530_v47  ;;  %v10539_v47 = vld [vmem:[%s14473_s9 + $0x160] sm:$0xff] }
 0x348   : > { %v4074_v10 = vadd.f32 %v13518_v34, %v4060_v1  ;;  %5548 = vmatpush.bf16.msrb.mxu0 %v10541_v23  ;;  %5526 = vmatpush.bf16.msrb.mxu2 %v10519_v44  ;;  %v10641_v23 = vld [vmem:[%s14471_s7 + $0x25c] sm:$0xf0] }
 0x34b   : > { %5511 = vmatpush.bf16.msra.mxu1 %v10512_v45  ;;  %5538 = vmatpush.bf16.msrb.mxu3 %v10529_v49 }
 0x34c   : > { %5549 = vmatpush.bf16.msrb.mxu0 %v10540_v36  ;;  %5575 = vmatpush.bf16.msra.mxu2 %v10558_v53  ;;  %v10553_v53 = vld [vmem:[%s14473_s9 + $0x1d0] sm:$0xff] }
 0x34d   : > { %v4061_v5 = vpop.f32.mrf.mxu0 }
 0x34e   : > { %v4062_v21 = vadd.f32 %v4061_v5, %v4048_v17  ;;  %v10617_v5 = vld [vmem:[%s14471_s7 + $0x19c] sm:$0xf0] }
 0x34f   : > { %v4101_v43 = vpop.f32.mrf.mxu3  ;;  %5512 = vmatpush.bf16.msra.mxu1 %v10511_v55  ;;  %5539 = vmatpush.bf16.msrb.mxu3 %v10528_v61  ;;  %v10537_v61 = vld [vmem:[%s14473_s9 + $0x150] sm:$0xff]  ;;  %v9565_v17 = vld [vmem:[%s14471_s7 + $0x140] sm:$0xf] }
 0x350   : > { %v4076_v24 = vadd.f32 %v13543_v42, %v4062_v21  ;;  %v10544_v42 = vld [vmem:[%s14473_s9 + $0x188] sm:$0xff]  ;;  %5550 = vmatpush.bf16.msrb.mxu0 %v10539_v47  ;;  %v10633_v47 = vld [vmem:[%s14471_s7 + $0x21c] sm:$0xf0] }
 0x353   : > { %5561 = vmatpush.bf16.msrb.mxu1 %v10550_v57  ;;  %5540 = vmatpush.bf16.msrb.mxu3 %v10527_v3 }
 0x354   : > { %5551 = vmatpush.bf16.msrb.mxu0 %v10538_v51  ;;  %v9567_v51 = vld [vmem:[%s14471_s7 + $0x160] sm:$0xf0] }
 0x357   : > { %v4103_v62 = vpop.f32.mrf.mxu3  ;;  %5562 = vmatpush.bf16.msrb.mxu1 %v10549_v11  ;;  %v4250_v11 = vperm.slane %v13639_v15, 1 }
 0x358   : > { %5552 = vmatpush.bf16.msrb.mxu0 %v10537_v61 }
 0x35a   : > { %v4129_v63 = vpop.f32.mrf.mxu1 }
 0x35b   : > { %5563 = vmatpush.bf16.msrb.mxu1 %v10548_v8  ;;  %v4251_v8 = vperm.slane %v13639_v15, 2 }
 0x35d   : > { %v4087_v6 = vpop.f32.mrf.mxu2 }
 0x35e   : > { %v4088_v58 = vadd.f32 %v4087_v6, %v4074_v10  ;;  %v10536_v6 = vld [vmem:[%s14473_s9 + $0x148] sm:$0xff] }
 0x35f   : > { %v13597_v16 = vpop.f32.mrf.mxu3  ;;  %5564 = vmatpush.bf16.msrb.mxu1 %v10547_v7  ;;  %5553 = vmatpush.bf16.msrb.mxu0 %v10536_v6  ;;  %v9470_v6 = vor.u32 %v10585_v60, %v9469_v59 }
 0x360   : > { %v4102_v20 = vadd.f32 %v4101_v43, %v4088_v58  ;;  %v10609_v58 = vld [vmem:[%s14471_s7 + $0x15c] sm:$0xf0] }
 0x362   : > { %v4131_v14 = vpop.f32.mrf.mxu1 }
 0x363   : > { %5565 = vmatpush.bf16.msrb.mxu1 %v10546_v28  ;;  %5554 = vmatpush.bf16.msrb.mxu0 %v10535_v18 }
 0x365   : > { %v4089_v13 = vpop.f32.mrf.mxu2 }
 0x366   : > { %v4090_v31 = vadd.f32 %v4089_v13, %v4076_v24  ;;  %v10555_v13 = vld [vmem:[%s14473_s9 + $0x1e0] sm:$0xff] }
 0x367   : > { %v4115_v22 = vpop.f32.mrf.mxu0  ;;  %v4702_v29 = vpop.f32.mrf.mxu3  ;;  %5566 = vmatpush.bf16.msrb.mxu1 %v10545_v37 }
 0x368   : > { %v4116_v25 = vadd.f32 %v4115_v22, %v4102_v20  ;;  %v4104_v40 = vadd.f32 %v4103_v62, %v4090_v31  ;;  %v9631_v20 = vld [vmem:[%s14471_s7 + $0x1e0] sm:$0xf0]  ;;  %v9566_v31 = vor.u32 %v10609_v58, %v9565_v17  ;;  %v10577_v17 = vld [vmem:[%s14471_s7 + $0x5c] sm:$0xf0] }
 0x369   : > { %v9503_v58 = vld [vmem:[%s14471_s7 + $0xe0] sm:$0xf0] }
 0x36a   : > { %v4130_v32 = vadd.f32 %v4129_v63, %v4116_v25  ;;  %v13625_v34 = vpop.f32.mrf.mxu1  ;;  %v10557_v63 = vld [vmem:[%s14473_s9 + $0x1f0] sm:$0xff] }
 0x36b   : > { %5567 = vmatpush.bf16.msrb.mxu1 %v10544_v42  ;;  %5576 = vmatpush.bf16.msra.mxu2 %v10557_v63  ;;  %v5619_v63 = vpop.permute.xlu2 %5618 }
 0x36c   : > { %v4138_v35 = vadd.f32 %v10728_v27, %v4130_v32  ;;  %v9533_v32 = vld [vmem:[%s14471_s7 + $0x100] sm:$0xf]  ;;  %5624 = vst.msk [vmem:[#allocation2 + $0x4] sm:$0xf] %vm1250_vm0, %v5619_v63 }
 0x36d   : > { %v4686_v48 = vpop.f32.mrf.mxu2 }
 0x36e   : > { %4142 = vrot.lane.b32.xlu2 %v4138_v35, %s10742_s14  ;;  %v4687_v54 = vadd.f32 %v4686_v48, %v4249_v46  ;;  %v9634_v35 = vor.u32 %v10621_v39, %v9631_v20  ;;  %v10554_v48 = vld [vmem:[%s14473_s9 + $0x1d8] sm:$0xff] }
 0x36f   : > { %v4117_v41 = vpop.f32.mrf.mxu0  ;;  %v4742_v43 = vpop.f32.mrf.mxu3  ;;  %5568 = vmatpush.bf16.msrb.mxu1 %v10543_v52  ;;  %5577 = vmatpush.bf16.msra.mxu2 %v10556_v9 }
 0x370   : > { %v4118_v26 = vadd.f32 %v4117_v41, %v4104_v40  ;;  %v4701_v0 = vadd.f32 %v13597_v16, %v4687_v54  ;;  %v4743_v19 = vadd.f32 %v4742_v43, %v4251_v8  ;;  %v9599_v40 = vld [vmem:[%s14471_s7 + $0x1a0] sm:$0xf0] }
 0x372   : > { %v4132_v45 = vadd.f32 %v4131_v14, %v4118_v26  ;;  %v4730_v49 = vpop.f32.mrf.mxu1  ;;  %v9598_v14 = vor.u32 %v10617_v5, %v9597_v4  ;;  %v9661_v26 = vld [vmem:[%s14471_s7 + $0x200] sm:$0xf] }
 0x373   : > { %5578 = vmatpush.bf16.msra.mxu2 %v10555_v13  ;;  %v9662_v52 = vor.u32 %v10633_v47, %v9661_v26  ;;  %v9405_v13 = vld [vmem:[%s14471_s7] sm:$0xf]  ;;  %v9439_v26 = vld [vmem:[%s14471_s7 + $0x60] sm:$0xf0] }
 0x374   : > { %v4139_v50 = vadd.f32 %v10728_v27, %v4132_v45  ;;  %v9693_v27 = vld [vmem:[%s14471_s7 + $0x240] sm:$0xf] }
 0x375   : > { %v4688_v55 = vpop.f32.mrf.mxu2  ;;  %v9694_v41 = vor.u32 %v10641_v23, %v9693_v27  ;;  %v9501_v45 = vld [vmem:[%s14471_s7 + $0xc0] sm:$0xf]  ;;  %v10581_v27 = vld [vmem:[%s14471_s7 + $0x84] sm:$0xf] }
 0x376   : > { %4144 = vrot.lane.b32.xlu0 %v4139_v50, %s10742_s14  ;;  %v4689_v56 = vadd.f32 %v4688_v55, %v4249_v46  ;;  %v10593_v46 = vld [vmem:[%s14471_s7 + $0xdc] sm:$0xf0]  ;;  %v10605_v50 = vld [vmem:[%s14471_s7 + $0x144] sm:$0xf] }
 0x377   : > { %v4714_v57 = vpop.f32.mrf.mxu0  ;;  %v4744_v62 = vpop.f32.mrf.mxu3  ;;  %5579 = vmatpush.bf16.msra.mxu2 %v10554_v48  ;;  %v9570_v61 = vor.u32 %v10605_v50, %v9567_v51  ;;  %v10573_v48 = vld [vmem:[%s14471_s7 + $0x44] sm:$0xf] }
 0x378   : > { %v4703_v33 = vadd.f32 %v4702_v29, %v4689_v56  ;;  %v4715_v10 = vadd.f32 %v4714_v57, %v4250_v11  ;;  %v4745_v7 = vadd.f32 %v4744_v62, %v4251_v8  ;;  %v4252_v56 = vperm.slane %v13639_v15, 3  ;;  %v10597_v62 = vld [vmem:[%s14471_s7 + $0x104] sm:$0xf]  ;;  %v9437_v8 = vld [vmem:[%s14471_s7 + $0x40] sm:$0xf] }
 0x379   : > { %v9502_v57 = vor.u32 %v10593_v46, %v9501_v45  ;;  %v9438_v20 = vor.u32 %v10577_v17, %v9437_v8  ;;  %v4255_v45 = vperm.slane %v13639_v15, 6  ;;  %v9442_v46 = vor.u32 %v10573_v48, %v9439_v26  ;;  %v9407_v51 = vld [vmem:[%s14471_s7 + $0x20] sm:$0xf0]  ;;  %v10598_v8 = vld [vmem:[%s14471_s7 + $0x10c] sm:$0xf] }
 0x37a   : > { %v4756_v1 = vpop.f32.mrf.mxu1  ;;  %v4901_v3 = vpack.c.bf16 %v4703_v33, %v4701_v0  ;;  %v4729_v22 = vadd.f32 %v13625_v34, %v4715_v10  ;;  %v10601_v34 = vld [vmem:[%s14471_s7 + $0x11c] sm:$0xf0]  ;;  %v5621_v0 = vpop.permute.xlu0 %5620  ;;  %v4253_v33 = vperm.slane %v13639_v15, 4 }
 0x37b   : > { %v4757_v28 = vadd.f32 %v4756_v1, %v4743_v19  ;;  %v9534_v44 = vor.u32 %v10601_v34, %v9533_v32  ;;  %5580 = vmatpush.bf16.msra.mxu2 %v10553_v53  ;;  %v10552_v1 = vld [vmem:[%s14473_s9 + $0x1c8] sm:$0xff]  ;;  %5625 = vst.msk [vmem:[#allocation2 + $0xc] sm:$0xf] %vm1250_vm0, %v5621_v0  ;;  %v10551_v19 = vld [vmem:[%s14473_s9 + $0x1c0] sm:$0xff] }
 0x37c   : > { %5485 = vmatmul.bf16.vlgmr.msra.gmra.mxu3 %v4901_v3  ;;  %v10622_v32 = vld [vmem:[%s14471_s7 + $0x1cc] sm:$0xf]  ;;  %v9663_v53 = vld [vmem:[%s14471_s7 + $0x220] sm:$0xf0] }
 0x37d   : > { %6138 = vmatpush.bf16.msra.mxu3 %v9630_v2 }
 0x37f   : > { %v13687_v12 = vpop.f32.mrf.mxu2  ;;  %v4716_v16 = vpop.f32.mrf.mxu0  ;;  %5581 = vmatpush.bf16.msra.mxu2 %v10552_v1  ;;  %v10626_v1 = vld [vmem:[%s14471_s7 + $0x1e4] sm:$0xf0] }
 0x380   : > { %v4717_v21 = vadd.f32 %v4716_v16, %v4250_v11  ;;  %v13708_v25 = vpop.f32.mrf.mxu3  ;;  %v9535_v11 = vld [vmem:[%s14471_s7 + $0x120] sm:$0xf0]  ;;  %v4771_v2 = vadd.f32 %v13687_v12, %v4252_v56 }
 0x381   : > { %6139 = vmatpush.bf16.msra.mxu3 %v9598_v14  ;;  %v9538_v9 = vor.u32 %v10597_v62, %v9535_v11  ;;  %v10589_v12 = vld [vmem:[%s14471_s7 + $0xc4] sm:$0xf] }
 0x382   : > { %v4758_v24 = vpop.f32.mrf.mxu1  ;;  %v4731_v29 = vadd.f32 %v4730_v49, %v4717_v21  ;;  %v9602_v49 = vor.u32 %v10613_v38, %v9599_v40 }
 0x383   : > { %v4759_v30 = vadd.f32 %v4758_v24, %v4745_v7  ;;  %v9506_v24 = vor.u32 %v10589_v12, %v9503_v58  ;;  %5582 = vmatpush.bf16.msra.mxu2 %v10551_v19  ;;  %v10564_v58 = vld [vmem:[#allocation2 + $0x4] sm:$0xf0] }
 0x384   : > { %v4902_v36 = vpack.c.bf16 %v4731_v29, %v4729_v22  ;;  %v10569_v22 = vld [vmem:[%s14471_s7 + $0x1c] sm:$0xf0]  ;;  %v9471_v29 = vld [vmem:[%s14471_s7 + $0xa0] sm:$0xf0]  ;;  %v10618_v19 = vld [vmem:[%s14471_s7 + $0x1a4] sm:$0xf0] }
 0x385   : > { %v4903_v37 = vpack.c.bf16 %v4759_v30, %v4757_v28  ;;  %6140 = vmatpush.bf16.msra.mxu3 %v9566_v31  ;;  %v10637_v30 = vld [vmem:[%s14471_s7 + $0x244] sm:$0xf]  ;;  %v9406_v38 = vor.u32 %v10569_v22, %v9405_v13  ;;  %v9474_v40 = vor.u32 %v10581_v27, %v9471_v29  ;;  %v10630_v13 = vld [vmem:[%s14471_s7 + $0x20c] sm:$0xf] }
 0x386   : > { %5499 = vmatmul.bf16.vlgmr.msra.gmra.mxu0 %v4902_v36  ;;  %v9695_v31 = vld [vmem:[%s14471_s7 + $0x260] sm:$0xf0]  ;;  %v9671_v22 = vld [vmem:[%s14471_s7 + $0x228] sm:$0xf0] }
 0x387   : > { %5513 = vmatmul.bf16.vlgmr.msra.gmra.mxu1 %v4903_v37  ;;  %v4772_v42 = vpop.f32.mrf.mxu2  ;;  %v4784_v43 = vpop.f32.mrf.mxu0  ;;  %6158 = vmatpush.bf16.msra.mxu0 %v9694_v41  ;;  %v9698_v34 = vor.u32 %v10637_v30, %v9695_v31  ;;  %v9733_v27 = vld [vmem:[%s12008_s29 + $0x4] sm:$0xf] }
 0x388   : > { %6166 = vmatpush.bf16.msra.mxu1 %v9634_v35  ;;  %v4814_v55 = vpop.f32.mrf.mxu3  ;;  %v4773_v3 = vadd.f32 %v4772_v42, %v4252_v56  ;;  %v4785_v10 = vadd.f32 %v4784_v43, %v4771_v2  ;;  %v10614_v42 = vld [vmem:[%s14471_s7 + $0x18c] sm:$0xf] }
 0x389   : > { %6141 = vmatpush.bf16.msra.mxu3 %v9534_v44  ;;  %v9607_v43 = vld [vmem:[%s14471_s7 + $0x1a8] sm:$0xf0]  ;;  %v4254_v44 = vperm.slane %v13639_v15, 5 }
 0x38a   : > { %v4798_v54 = vpop.f32.mrf.mxu1  ;;  %v9610_v50 = vor.u32 %v10614_v42, %v9607_v43  ;;  %v9575_v56 = vld [vmem:[%s14471_s7 + $0x168] sm:$0xf0]  ;;  %v10602_v42 = vld [vmem:[%s14471_s7 + $0x124] sm:$0xf0] }
 0x38b   : > { %6159 = vmatpush.bf16.msra.mxu0 %v9662_v52  ;;  %v4799_v14 = vadd.f32 %v4798_v54, %v4253_v33  ;;  %v10629_v52 = vld [vmem:[%s14471_s7 + $0x204] sm:$0xf]  ;;  %v10638_v2 = vld [vmem:[%s14471_s7 + $0x24c] sm:$0xf] }
 0x38c   : > { %6167 = vmatpush.bf16.msra.mxu1 %v9602_v49  ;;  %v10565_v49 = vld [vmem:[%s14471_s7 + $0x4] sm:$0xf]  ;;  %v10574_v43 = vld [vmem:[%s14471_s7 + $0x4c] sm:$0xf] }
 0x38d   : > { %6142 = vmatpush.bf16.msra.mxu3 %v9502_v57  ;;  %v4813_v23 = vadd.f32 %v13708_v25, %v4799_v14  ;;  %v9639_v25 = vld [vmem:[%s14471_s7 + $0x1e8] sm:$0xf0]  ;;  %v9666_v57 = vor.u32 %v10629_v52, %v9663_v53  ;;  %v9410_v62 = vor.u32 %v10565_v49, %v9407_v51  ;;  %v10642_v49 = vld [vmem:[%s14471_s7 + $0x264] sm:$0xf0]  ;;  %v10563_v52 = vld [vmem:[#allocation2 + $0x4] sm:$0xf] }
 0x38e   : > { %v9642_v41 = vor.u32 %v10622_v32, %v9639_v25  ;;  %v9674_v25 = vor.u32 %v10630_v13, %v9671_v22  ;;  %v9399_v53 = vld [vmem:[#allocation2 + $0x8] sm:$0xf0]  ;;  %v10578_v13 = vld [vmem:[%s14471_s7 + $0x64] sm:$0xf0] }
 0x38f   : > { %v13772_v4 = vpop.f32.mrf.mxu2  ;;  %v4786_v5 = vpop.f32.mrf.mxu0 }
 0x390   : > { %6168 = vmatpush.bf16.msra.mxu1 %v9570_v61  ;;  %v4787_v16 = vadd.f32 %v4786_v5, %v4773_v3  ;;  %v9637_v61 = vld [vmem:[%s14471_s7 + $0x1c8] sm:$0xf]  ;;  %v9703_v3 = vld [vmem:[%s14471_s7 + $0x268] sm:$0xf0] }
 0x391   : > { %6143 = vmatpush.bf16.msra.mxu3 %v9470_v6  ;;  %v9638_v12 = vor.u32 %v10626_v1, %v9637_v61  ;;  %v9647_v61 = vld [vmem:[%s14471_s7 + $0x1f0] sm:$0xf0]  ;;  %v13941_v1 = vor.u32 %v10563_v52, %v9399_v53  ;;  %v9653_v52 = vld [vmem:[%s14471_s7 + $0x1d8] sm:$0xf] }
 0x392   : > { %v4800_v18 = vpop.f32.mrf.mxu1  ;;  %v4904_v7 = vpack.c.bf16 %v4787_v16, %v4785_v10  ;;  %v10628_v53 = vld [vmem:[%s14471_s7 + $0x1f4] sm:$0xf0] }
 0x393   : > { %v4801_v21 = vadd.f32 %v4800_v18, %v4253_v33  ;;  %v9605_v18 = vld [vmem:[%s14471_s7 + $0x188] sm:$0xf] }
 0x394   : > { %6169 = vmatpush.bf16.msra.mxu1 %v9538_v9  ;;  %5527 = vmatmul.bf16.vlgmr.msrb.gmra.mxu2 %v4904_v7  ;;  %v9543_v9 = vld [vmem:[%s14471_s7 + $0x128] sm:$0xf0]  ;;  %v9706_v7 = vor.u32 %v10638_v2, %v9703_v3  ;;  %v9606_v32 = vor.u32 %v10618_v19, %v9605_v18  ;;  %v9711_v2 = vld [vmem:[%s14471_s7 + $0x270] sm:$0xf0]  ;;  %v9669_v3 = vld [vmem:[%s14471_s7 + $0x208] sm:$0xf] }
 0x395   : > { %v4815_v28 = vadd.f32 %v4814_v55, %v4801_v21  ;;  %6144 = vmatpush.bf16.msra.mxu3 %v9438_v20  ;;  %6186 = vmatpush.bf16.msrb.mxu2 %v9698_v34  ;;  %v10606_v55 = vld [vmem:[%s14471_s7 + $0x14c] sm:$0xf]  ;;  %v10631_v18 = vld [vmem:[%s14471_s7 + $0x214] sm:$0xf] }
 0x396   : > { %v9578_v11 = vor.u32 %v10606_v55, %v9575_v56  ;;  %v10590_v20 = vld [vmem:[%s14471_s7 + $0xcc] sm:$0xf]  ;;  %v9679_v19 = vld [vmem:[%s14471_s7 + $0x230] sm:$0xf0] }
 0x397   : > { %v4854_v39 = vpop.f32.mrf.mxu3  ;;  %v4905_v35 = vpack.c.bf16 %v4815_v28, %v4813_v23  ;;  %v4826_v36 = vpop.f32.mrf.mxu0  ;;  %v10645_v23 = vld [vmem:[%s12008_s29 + $0x8] sm:$0xf0]  ;;  %v9397_v28 = vld [vmem:[#allocation2] sm:$0xf]  ;;  %v9682_v22 = vor.u32 %v10631_v18, %v9679_v19  ;;  %v9589_v18 = vld [vmem:[%s14471_s7 + $0x158] sm:$0xf] }
 0x398   : > { %v4842_v37 = vpop.f32.mrf.mxu2  ;;  %6170 = vmatpush.bf16.msra.mxu1 %v9506_v24  ;;  %v4827_v59 = vadd.f32 %v4826_v36, %v4254_v44  ;;  %v4855_v63 = vadd.f32 %v4854_v39, %v4255_v45  ;;  %v9511_v24 = vld [vmem:[%s14471_s7 + $0xe8] sm:$0xf0]  ;;  %v9734_v29 = vor.u32 %v10645_v23, %v9733_v27  ;;  %v13885_v31 = vor.u32 %v10564_v58, %v9397_v28  ;;  %v10610_v36 = vld [vmem:[%s14471_s7 + $0x164] sm:$0xf0]  ;;  %v9583_v27 = vld [vmem:[%s14471_s7 + $0x170] sm:$0xf0] }
 0x399   : > { %5541 = vmatmul.bf16.vlgmr.msrb.gmra.mxu3 %v4905_v35  ;;  %6187 = vmatpush.bf16.msrb.mxu2 %v9666_v57  ;;  %v9514_v34 = vor.u32 %v10590_v20, %v9511_v24  ;;  %v9573_v35 = vld [vmem:[%s14471_s7 + $0x148] sm:$0xf]  ;;  %v10607_v24 = vld [vmem:[%s14471_s7 + $0x154] sm:$0xf]  ;;  %v10612_v19 = vld [vmem:[%s14471_s7 + $0x174] sm:$0xf0] }
 0x39a   : > { %v4868_v47 = vpop.f32.mrf.mxu1  ;;  %6145 = vmatpush.bf16.msra.mxu3 %v9406_v38  ;;  %v4841_v10 = vadd.f32 %v13772_v4, %v4827_v59  ;;  %v9546_v4 = vor.u32 %v10598_v8, %v9543_v9  ;;  %6513 = vrot.lane.b32.xlu1 %v9734_v29, %s10740_s23  ;;  %v9479_v38 = vld [vmem:[%s14471_s7 + $0xa8] sm:$0xf0]  ;;  %v9574_v48 = vor.u32 %v10610_v36, %v9573_v35  ;;  %v10594_v59 = vld [vmem:[%s14471_s7 + $0xe4] sm:$0xf0]  ;;  %v10616_v29 = vld [vmem:[%s14471_s7 + $0x19c] sm:$0xf] }
 0x39b   : > { %v4869_v14 = vadd.f32 %v4868_v47, %v4855_v63  ;;  %v9541_v47 = vld [vmem:[%s14471_s7 + $0x108] sm:$0xf]  ;;  %v9415_v63 = vld [vmem:[%s14471_s7 + $0x28] sm:$0xf0]  ;;  %v9709_v35 = vld [vmem:[%s14471_s7 + $0x250] sm:$0xf] }
 0x39c   : > { %6171 = vmatpush.bf16.msra.mxu1 %v9474_v40  ;;  %v4256_v40 = vperm.slane %v13639_v15, 7  ;;  %v9447_v15 = vld [vmem:[%s14471_s7 + $0x68] sm:$0xf0]  ;;  %v9542_v51 = vor.u32 %v10602_v42, %v9541_v47  ;;  %v9445_v20 = vld [vmem:[%s14471_s7 + $0x48] sm:$0xf] }
 0x39d   : > { %v9450_v57 = vor.u32 %v10574_v43, %v9447_v15  ;;  %v9446_v28 = vor.u32 %v10578_v13, %v9445_v20  ;;  %v10643_v36 = vld [vmem:[%s14471_s7 + $0x26c] sm:$0xf0]  ;;  %v10608_v47 = vld [vmem:[%s14471_s7 + $0x15c] sm:$0xf]  ;;  %v9590_v13 = vor.u32 %v10612_v19, %v9589_v18  ;;  %v10651_v18 = vld [vmem:[%s14473_s9 + $0x28] sm:$0xff] }
 0x39e   : > { %6222 = vmatpush.bf16.msrb.mxu3 %v9642_v41  ;;  %v9591_v42 = vld [vmem:[%s14471_s7 + $0x178] sm:$0xf0]  ;;  %v9710_v43 = vor.u32 %v10643_v36, %v9709_v35 }
 0x39f   : > { %v4856_v54 = vpop.f32.mrf.mxu3  ;;  %v4828_v60 = vpop.f32.mrf.mxu0 }
 0x3a0   : > { %6172 = vmatpush.bf16.msra.mxu1 %v9442_v46  ;;  %v4857_v0 = vadd.f32 %v4856_v54, %v4255_v45  ;;  %v4829_v33 = vadd.f32 %v4828_v60, %v4254_v44  ;;  %v9701_v46 = vld [vmem:[%s14471_s7 + $0x248] sm:$0xf]  ;;  %v10623_v60 = vld [vmem:[%s14471_s7 + $0x1d4] sm:$0xf] }
 0x3a1   : > { %v9509_v54 = vld [vmem:[%s14471_s7 + $0xc8] sm:$0xf]  ;;  %v9650_v8 = vor.u32 %v10623_v60, %v9647_v61  ;;  %v9654_v61 = vor.u32 %v10628_v53, %v9653_v52  ;;  %v9493_v52 = vld [vmem:[%s14471_s7 + $0x98] sm:$0xf] }
 0x3a2   : > { %6223 = vmatpush.bf16.msrb.mxu3 %v9610_v50  ;;  %v4870_v6 = vpop.f32.mrf.mxu1  ;;  %v4843_v16 = vadd.f32 %v4842_v37, %v4829_v33  ;;  %v10582_v37 = vld [vmem:[%s14471_s7 + $0x8c] sm:$0xf]  ;;  %v9702_v33 = vor.u32 %v10642_v49, %v9701_v46  ;;  %v10591_v46 = vld [vmem:[%s14471_s7 + $0xd4] sm:$0xf]  ;;  %v10588_v53 = vld [vmem:[%s14471_s7 + $0xb4] sm:$0xf0] }
 0x3a3   : > { %v4871_v17 = vadd.f32 %v4870_v6, %v4857_v0  ;;  %v9482_v26 = vor.u32 %v10582_v37, %v9479_v38  ;;  %v10639_v0 = vld [vmem:[%s14471_s7 + $0x254] sm:$0xf]  ;;  %v9510_v6 = vor.u32 %v10594_v59, %v9509_v54  ;;  %v9613_v54 = vld [vmem:[%s14471_s7 + $0x190] sm:$0xf] }
 0x3a4   : > { %6173 = vmatpush.bf16.msra.mxu1 %v9410_v62  ;;  %v4906_v21 = vpack.c.bf16 %v4843_v16, %v4841_v10  ;;  %v10566_v62 = vld [vmem:[%s14471_s7 + $0xc] sm:$0xf]  ;;  %v9477_v10 = vld [vmem:[%s14471_s7 + $0x88] sm:$0xf]  ;;  %v9714_v16 = vor.u32 %v10639_v0, %v9711_v2  ;;  %v10599_v37 = vld [vmem:[%s14471_s7 + $0x114] sm:$0xf] }
 0x3a5   : > { %v4882_v5 = vpop.f32.mrf.mxu2  ;;  %v4907_v39 = vpack.c.bf16 %v4871_v17, %v4869_v14  ;;  %v9418_v9 = vor.u32 %v10566_v62, %v9415_v63  ;;  %v10586_v14 = vld [vmem:[%s14471_s7 + $0xa4] sm:$0xf0]  ;;  %v10615_v17 = vld [vmem:[%s14471_s7 + $0x194] sm:$0xf]  ;;  %v10620_v2 = vld [vmem:[%s14471_s7 + $0x1b4] sm:$0xf0] }
 0x3a6   : > { %6224 = vmatpush.bf16.msrb.mxu3 %v9578_v11  ;;  %5555 = vmatmul.bf16.vlgmr.msrb.gmra.mxu0 %v4906_v21  ;;  %v4883_v44 = vadd.f32 %v4882_v5, %v4256_v40  ;;  %v10634_v5 = vld [vmem:[%s14471_s7 + $0x224] sm:$0xf0]  ;;  %v10624_v21 = vld [vmem:[%s14471_s7 + $0x1dc] sm:$0xf]  ;;  %v9551_v38 = vld [vmem:[%s14471_s7 + $0x130] sm:$0xf0] }
 0x3a7   : > { %5569 = vmatmul.bf16.vlgmr.msrb.gmra.mxu1 %v4907_v39  ;;  %6194 = vmatpush.bf16.msrb.mxu0 %v9638_v12  ;;  %v4896_v30 = vpop.f32.mrf.mxu0  ;;  %v9615_v12 = vld [vmem:[%s14471_s7 + $0x1b0] sm:$0xf0]  ;;  %v9670_v58 = vor.u32 %v10634_v5, %v9669_v3  ;;  %v9655_v39 = vld [vmem:[%s14471_s7 + $0x1f8] sm:$0xf0]  ;;  %v9554_v15 = vor.u32 %v10599_v37, %v9551_v38  ;;  %v9581_v3 = vld [vmem:[%s14471_s7 + $0x150] sm:$0xf] }
 0x3a8   : > { %6242 = vmatpush.bf16.msrb.mxu1 %v9706_v7  ;;  %v4897_v55 = vadd.f32 %v4896_v30, %v4883_v44  ;;  %v9478_v7 = vor.u32 %v10586_v14, %v9477_v10  ;;  %v9658_v23 = vor.u32 %v10624_v21, %v9655_v39  ;;  %v9623_v30 = vld [vmem:[%s14471_s7 + $0x1b8] sm:$0xf0]  ;;  %v9677_v44 = vld [vmem:[%s14471_s7 + $0x210] sm:$0xf]  ;;  %v9519_v49 = vld [vmem:[%s14471_s7 + $0xf0] sm:$0xf0] }
 0x3a9   : > { %6146 = vmatmul.bf16.vlgmr.msra.gmra.mxu3 %v13885_v31  ;;  %v9522_v60 = vor.u32 %v10591_v46, %v9519_v49  ;;  %v10583_v62 = vld [vmem:[%s14471_s7 + $0x94] sm:$0xf]  ;;  %v10603_v21 = vld [vmem:[%s14471_s7 + $0x12c] sm:$0xf0]  ;;  %v10584_v39 = vld [vmem:[%s14471_s7 + $0x9c] sm:$0xf] }
 0x3aa   : > { %6225 = vmatpush.bf16.msrb.mxu3 %v9546_v4  ;;  %v9618_v4 = vor.u32 %v10615_v17, %v9615_v12  ;;  %v9487_v63 = vld [vmem:[%s14471_s7 + $0xb0] sm:$0xf0]  ;;  %v10640_v37 = vld [vmem:[%s14471_s7 + $0x25c] sm:$0xf] }
 0x3ab   : > { %6195 = vmatpush.bf16.msrb.mxu0 %v9606_v32  ;;  %v9586_v32 = vor.u32 %v10607_v24, %v9583_v27  ;;  %v9490_v10 = vor.u32 %v10583_v62, %v9487_v63  ;;  %v9455_v17 = vld [vmem:[%s14471_s7 + $0x70] sm:$0xf0]  ;;  %v9719_v38 = vld [vmem:[%s14471_s7 + $0x278] sm:$0xf0]  ;;  %v9421_v62 = vld [vmem:[%s14471_s7 + $0x10] sm:$0xf] }
 0x3ac   : > { %6243 = vmatpush.bf16.msrb.mxu1 %v9674_v25  ;;  %v9413_v25 = vld [vmem:[%s14471_s7 + $0x8] sm:$0xf]  ;;  %v9423_v24 = vld [vmem:[%s14471_s7 + $0x30] sm:$0xf0]  ;;  %v10632_v46 = vld [vmem:[%s14471_s7 + $0x21c] sm:$0xf] }
 0x3ad   : > { %v4884_v41 = vpop.f32.mrf.mxu2  ;;  %v9687_v49 = vld [vmem:[%s14471_s7 + $0x238] sm:$0xf0]  ;;  %v10571_v63 = vld [vmem:[%s14471_s7 + $0x2c] sm:$0xf0] }
 0x3ae   : > { %6226 = vmatpush.bf16.msrb.mxu3 %v9514_v34  ;;  %v4885_v45 = vadd.f32 %v4884_v41, %v4256_v40  ;;  %v10570_v34 = vld [vmem:[%s14471_s7 + $0x24] sm:$0xf0]  ;;  %v9626_v40 = vor.u32 %v10616_v29, %v9623_v30  ;;  %v9645_v41 = vld [vmem:[%s14471_s7 + $0x1d0] sm:$0xf]  ;;  %v10604_v29 = vld [vmem:[%s14471_s7 + $0x134] sm:$0xf0] }
 0x3af   : > { %6196 = vmatpush.bf16.msrb.mxu0 %v9574_v48  ;;  %v4898_v50 = vpop.f32.mrf.mxu0  ;;  %v9414_v48 = vor.u32 %v10570_v34, %v9413_v25  ;;  %v9517_v30 = vld [vmem:[%s14471_s7 + $0xd0] sm:$0xf]  ;;  %v10576_v25 = vld [vmem:[%s14471_s7 + $0x5c] sm:$0xf] }
 0x3b0   : > { %v4899_v56 = vadd.f32 %v4898_v50, %v4885_v45  ;;  %v10635_v45 = vld [vmem:[%s14471_s7 + $0x22c] sm:$0xf0]  ;;  %v9463_v34 = vld [vmem:[%s14471_s7 + $0x78] sm:$0xf0] }
 0x3b1   : > { %v9678_v59 = vor.u32 %v10635_v45, %v9677_v44  ;;  %v9722_v44 = vor.u32 %v10640_v37, %v9719_v38 }
 0x3b2   : > { %6227 = vmatpush.bf16.msrb.mxu3 %v9482_v26  ;;  %v4908_v11 = vpack.c.bf16 %v4899_v56, %v4897_v55  ;;  %v10627_v26 = vld [vmem:[%s14471_s7 + $0x1ec] sm:$0xf0]  ;;  %v10600_v56 = vld [vmem:[%s14471_s7 + $0x11c] sm:$0xf] }
 0x3b3   : > { %6197 = vmatpush.bf16.msrb.mxu0 %v9542_v51  ;;  %v9646_v50 = vor.u32 %v10627_v26, %v9645_v41  ;;  %v9594_v51 = vor.u32 %v10608_v47, %v9591_v42  ;;  %v10619_v55 = vld [vmem:[%s14471_s7 + $0x1ac] sm:$0xf0]  ;;  %v9466_v41 = vor.u32 %v10576_v25, %v9463_v34  ;;  %v10596_v26 = vld [vmem:[%s14471_s7 + $0xf4] sm:$0xf0]  ;;  %v10710_v25 = vld [vmem:[%s14474_s10] sm:$0xff] }
 0x3b4   : > { %5583 = vmatmul.bf16.vlgmr.msra.gmra.mxu2 %v4908_v11  ;;  %v9614_v0 = vor.u32 %v10619_v55, %v9613_v54  ;;  %v9621_v11 = vld [vmem:[%s14471_s7 + $0x198] sm:$0xf]  ;;  %v9485_v47 = vld [vmem:[%s14471_s7 + $0x90] sm:$0xf] }
 0x3b5   : > { %6214 = vmatpush.bf16.msra.mxu2 %v9702_v33  ;;  %v9622_v14 = vor.u32 %v10620_v2, %v9621_v11  ;;  %v10587_v42 = vld [vmem:[%s14471_s7 + $0xac] sm:$0xf0]  ;;  %v9422_v2 = vor.u32 %v10571_v63, %v9421_v62  ;;  %v10657_v34 = vld [vmem:[%s14473_s9 + $0x58] sm:$0xff] }
 0x3b6   : > { %6228 = vmatpush.bf16.msrb.mxu3 %v9450_v57  ;;  %9723 = vmatmul.msk.bf16.vlgmr.msra.gmra.mxu0 %vm1762_vm1, %v13941_v1  ;;  %v9559_v57 = vld [vmem:[%s14471_s7 + $0x138] sm:$0xf0]  ;;  %v9453_v54 = vld [vmem:[%s14471_s7 + $0x50] sm:$0xf] }
 0x3b7   : > { %6174 = vmatmul.bf16.vlgmr.msra.gmra.mxu1 %v13885_v31  ;;  %6198 = vmatpush.bf16.msrb.mxu0 %v9510_v6  ;;  %v9562_v33 = vor.u32 %v10600_v56, %v9559_v57  ;;  %v10611_v6 = vld [vmem:[%s14471_s7 + $0x16c] sm:$0xf0]  ;;  %v9690_v56 = vor.u32 %v10632_v46, %v9687_v49  ;;  %v9494_v57 = vor.u32 %v10588_v53, %v9493_v52  ;;  %v10693_v52 = vld [vmem:[%s14473_s9 + $0x178] sm:$0xff] }
 0x3b8   : > { %6278 = vmatpush.bf16.msra.mxu1 %v9650_v8  ;;  %v10592_v8 = vld [vmem:[%s14471_s7 + $0xdc] sm:$0xf]  ;;  %v9582_v12 = vor.u32 %v10611_v6, %v9581_v3  ;;  %v10579_v55 = vld [vmem:[%s14471_s7 + $0x6c] sm:$0xf0]  ;;  %v9429_v3 = vld [vmem:[%s14471_s7 + $0x18] sm:$0xf] }
 0x3b9   : > { %6215 = vmatpush.bf16.msra.mxu2 %v9670_v58 }
 0x3ba   : > { %6229 = vmatpush.bf16.msrb.mxu3 %v9418_v9  ;;  %v9527_v9 = vld [vmem:[%s14471_s7 + $0xf8] sm:$0xf0] }
 0x3bb   : > { %6199 = vmatpush.bf16.msrb.mxu0 %v9478_v7  ;;  %v9530_v58 = vor.u32 %v10592_v8, %v9527_v9  ;;  %v9549_v7 = vld [vmem:[%s14471_s7 + $0x110] sm:$0xf]  ;;  %v9685_v8 = vld [vmem:[%s14471_s7 + $0x218] sm:$0xf] }
 0x3bc   : > { %6279 = vmatpush.bf16.msra.mxu1 %v9618_v4  ;;  %v9495_v4 = vld [vmem:[%s14471_s7 + $0xb8] sm:$0xf0]  ;;  %v9550_v27 = vor.u32 %v10603_v21, %v9549_v7  ;;  %v10636_v9 = vld [vmem:[%s14471_s7 + $0x234] sm:$0xf0]  ;;  %v10660_v21 = vld [vmem:[%s14473_s9 + $0x70] sm:$0xff] }
 0x3bd   : > { %6230 = vmatmul.bf16.vlgmr.msrb.gmra.mxu3 %v13885_v31  ;;  %v10713_v7 = vld [vmem:[%s14474_s10 + $0x18] sm:$0xff] }
 0x3be   : > { %6298 = vmatpush.bf16.msra.mxu3 %v9714_v16  ;;  %v10575_v16 = vld [vmem:[%s14471_s7 + $0x54] sm:$0xf] }
 0x3bf   : > { %6200 = vmatpush.bf16.msrb.mxu0 %v9446_v28  ;;  %v9458_v20 = vor.u32 %v10575_v16, %v9455_v17  ;;  %v9557_v28 = vld [vmem:[%s14471_s7 + $0x118] sm:$0xf]  ;;  %v5088_v17 = vpop.f32.mrf.mxu1 }
 0x3c0   : > { %6280 = vmatpush.bf16.msra.mxu1 %v9586_v32  ;;  %v10595_v32 = vld [vmem:[%s14471_s7 + $0xec] sm:$0xf0]  ;;  %v9558_v36 = vor.u32 %v10604_v29, %v9557_v28  ;;  %v10658_v29 = vld [vmem:[%s14473_s9 + $0x60] sm:$0xff] }
 0x3c2   : > { %6299 = vmatpush.bf16.msra.mxu3 %v9682_v22  ;;  %v10567_v22 = vld [vmem:[%s14471_s7 + $0x14] sm:$0xf] }
 0x3c3   : > { %6201 = vmatpush.bf16.msrb.mxu0 %v9414_v48  ;;  %v9426_v35 = vor.u32 %v10567_v22, %v9423_v24  ;;  %v9525_v48 = vld [vmem:[%s14471_s7 + $0xd8] sm:$0xf] }
 0x3c4   : > { %6281 = vmatpush.bf16.msra.mxu1 %v9554_v15  ;;  %9724 = vmatmul.msk.bf16.vlgmr.msrb.gmra.mxu2 %vm1762_vm1, %v13941_v1  ;;  %v9431_v15 = vld [vmem:[%s14471_s7 + $0x38] sm:$0xf0]  ;;  %v9526_v45 = vor.u32 %v10596_v26, %v9525_v48  ;;  %v10646_v26 = vld [vmem:[%s14473_s9] sm:$0xff] }
 0x3c5   : > { %6250 = vmatpush.bf16.msrb.mxu2 %v9646_v50  ;;  %v9486_v50 = vor.u32 %v10587_v42, %v9485_v47  ;;  %v10677_v22 = vld [vmem:[%s14473_s9 + $0xf8] sm:$0xff]  ;;  %v10674_v47 = vld [vmem:[%s14473_s9 + $0xe0] sm:$0xff]  ;;  %v10655_v42 = vld [vmem:[%s14473_s9 + $0x48] sm:$0xff] }
 0x3c6   : > { %6334 = vmatpush.bf16.msrb.mxu3 %v9658_v23  ;;  %6202 = vmatmul.bf16.vlgmr.msrb.gmra.mxu0 %v13885_v31  ;;  %v9498_v23 = vor.u32 %v10584_v39, %v9495_v4  ;;  %v10650_v39 = vld [vmem:[%s14473_s9 + $0x20] sm:$0xff]  ;;  %v10712_v4 = vld [vmem:[%s14474_s10 + $0x10] sm:$0xff] }
 0x3c7   : > { %6270 = vmatpush.bf16.msra.mxu0 %v9710_v43  ;;  %9726 = vmatmul.msk.bf16.vlgmr.msrb.gmra.mxu1 %vm1762_vm1, %v13941_v1  ;;  %v10568_v43 = vld [vmem:[%s14471_s7 + $0x1c] sm:$0xf] }
 0x3c8   : > { %v4143_v5 = vpop.permute.xlu2 %4142  ;;  %6282 = vmatpush.bf16.msra.mxu1 %v9522_v60  ;;  %v9461_v60 = vld [vmem:[%s14471_s7 + $0x58] sm:$0xf] }
 0x3c9   : > { %4149 = vst.msk [vmem:[%s12869_s24] sm:$0xff] %vm4148_vm4, %v4143_v5  ;;  %6251 = vmatpush.bf16.msrb.mxu2 %v9614_v0  ;;  %v9717_v0 = vld [vmem:[%s14471_s7 + $0x258] sm:$0xf] }
 0x3ca   : > { %6335 = vmatpush.bf16.msrb.mxu3 %v9626_v40  ;;  %v9518_v40 = vor.u32 %v10595_v32, %v9517_v30  ;;  %v10572_v5 = vld [vmem:[%s14471_s7 + $0x34] sm:$0xf0]  ;;  %v10648_v30 = vld [vmem:[%s14473_s9 + $0x10] sm:$0xff] }
 0x3cb   : > { %6271 = vmatpush.bf16.msra.mxu0 %v9678_v59  ;;  %v9454_v59 = vor.u32 %v10579_v55, %v9453_v54  ;;  %v10676_v32 = vld [vmem:[%s14473_s9 + $0xf0] sm:$0xff] }
 0x3cc   : > { %6283 = vmatpush.bf16.msra.mxu1 %v9490_v10  ;;  %v9430_v10 = vor.u32 %v10572_v5, %v9429_v3  ;;  %v10668_v55 = vld [vmem:[%s14473_s9 + $0xb0] sm:$0xff] }
 0x3cd   : > { %9728 = vmatmul.msk.bf16.vlgmr.msra.gmra.mxu3 %vm1762_vm1, %v13941_v1  ;;  %6252 = vmatpush.bf16.msrb.mxu2 %v9582_v12  ;;  %v10653_v12 = vld [vmem:[%s14473_s9 + $0x38] sm:$0xff] }
 0x3ce   : > { %6336 = vmatpush.bf16.msrb.mxu3 %v9594_v51  ;;  %v9434_v51 = vor.u32 %v10568_v43, %v9431_v15  ;;  %v10673_v43 = vld [vmem:[%s14473_s9 + $0xd8] sm:$0xff] }
 0x3cf   : > { %6306 = vmatpush.bf16.msrb.mxu0 %v9654_v61  ;;  %v10580_v61 = vld [vmem:[%s14471_s7 + $0x74] sm:$0xf0] }
 0x3d0   : > { %6284 = vmatpush.bf16.msra.mxu1 %v9458_v20  ;;  %v9462_v11 = vor.u32 %v10580_v61, %v9461_v60  ;;  %v10659_v20 = vld [vmem:[%s14473_s9 + $0x68] sm:$0xff] }
 0x3d1   : > { %6253 = vmatpush.bf16.msrb.mxu2 %v9550_v27 }
 0x3d2   : > { %6337 = vmatpush.bf16.msrb.mxu3 %v9562_v33  ;;  %v10644_v33 = vld [vmem:[%s14471_s7 + $0x274] sm:$0xf0] }
 0x3d3   : > { %6307 = vmatpush.bf16.msrb.mxu0 %v9622_v14  ;;  %v9718_v6 = vor.u32 %v10644_v33, %v9717_v0  ;;  %v9686_v14 = vor.u32 %v10636_v9, %v9685_v8  ;;  %v10667_v0 = vld [vmem:[%s14473_s9 + $0xa8] sm:$0xff]  ;;  %v10670_v33 = vld [vmem:[%s14473_s9 + $0xc0] sm:$0xff] }
 0x3d4   : > { %6285 = vmatpush.bf16.msra.mxu1 %v9426_v35  ;;  %9725 = vmatmul.msk.bf16.vlgmr.msra.gmra.mxu2 %vm1762_vm1, %v13941_v1  ;;  %v10647_v35 = vld [vmem:[%s14473_s9 + $0x8] sm:$0xff]  ;;  %v10666_v8 = vld [vmem:[%s14473_s9 + $0xa0] sm:$0xff] }
 0x3d5   : > { %6254 = vmatpush.bf16.msrb.mxu2 %v9518_v40  ;;  %v10690_v9 = vld [vmem:[%s14473_s9 + $0x160] sm:$0xff] }
 0x3d6   : > { %6338 = vmatpush.bf16.msrb.mxu3 %v9530_v58  ;;  %9727 = vmatmul.msk.bf16.vlgmr.msra.gmra.mxu0 %vm1762_vm1, %v13941_v1  ;;  %v10652_v58 = vld [vmem:[%s14473_s9 + $0x30] sm:$0xff] }
 0x3d7   : > { %6308 = vmatpush.bf16.msrb.mxu0 %v9590_v13  ;;  %6286 = vmatmul.bf16.vlgmr.msra.gmra.mxu1 %v13885_v31  ;;  %v10649_v13 = vld [vmem:[%s14473_s9 + $0x18] sm:$0xff] }
 0x3d8   : > { %6354 = vmatpush.bf16.msrb.mxu1 %v9722_v44 }
 0x3d9   : > { %6255 = vmatpush.bf16.msrb.mxu2 %v9486_v50  ;;  %v10669_v50 = vld [vmem:[%s14473_s9 + $0xb8] sm:$0xff] }
 0x3da   : > { %6339 = vmatpush.bf16.msrb.mxu3 %v9498_v23  ;;  %v10711_v23 = vld [vmem:[%s14474_s10 + $0x8] sm:$0xff] }
 0x3db   : > { %6309 = vmatpush.bf16.msrb.mxu0 %v9558_v36  ;;  %v10675_v36 = vld [vmem:[%s14473_s9 + $0xe8] sm:$0xff] }
 0x3dc   : > { %6355 = vmatpush.bf16.msrb.mxu1 %v9690_v56  ;;  %v10671_v56 = vld [vmem:[%s14473_s9 + $0xc8] sm:$0xff] }
 0x3dd   : > { %6256 = vmatpush.bf16.msrb.mxu2 %v9454_v59 }
 0x3de   : > { %6340 = vmatpush.bf16.msrb.mxu3 %v9466_v41  ;;  %v10656_v41 = vld [vmem:[%s14473_s9 + $0x50] sm:$0xff] }
 0x3df   : > { %6310 = vmatpush.bf16.msrb.mxu0 %v9526_v45  ;;  %v10654_v45 = vld [vmem:[%s14473_s9 + $0x40] sm:$0xff] }
 0x3e1   : > { %6257 = vmatpush.bf16.msrb.mxu2 %v9422_v2 }
 0x3e2   : > { %6341 = vmatpush.bf16.msrb.mxu3 %v9434_v51  ;;  %v10672_v51 = vld [vmem:[%s14473_s9 + $0xd0] sm:$0xff] }
 0x3e3   : > { %6311 = vmatpush.bf16.msrb.mxu0 %v9494_v57  ;;  %v10692_v57 = vld [vmem:[%s14473_s9 + $0x170] sm:$0xff] }
 0x3e4   : > { %6258 = vmatmul.bf16.vlgmr.msrb.gmra.mxu2 %v13885_v31 }
 0x3e5   : > { %6342 = vmatmul.bf16.vlgmr.msrb.gmra.mxu3 %v13885_v31  ;;  %6326 = vmatpush.bf16.msra.mxu2 %v9718_v6 }
 0x3e6   : > { %6982 = vmatpush.bf16.msra.mxu3 %v10677_v22 }
 0x3e7   : > { %6312 = vmatpush.bf16.msrb.mxu0 %v9462_v11  ;;  %9730 = vmatmul.msk.bf16.vlgmr.msrb.gmra.mxu1 %vm1762_vm1, %v13941_v1  ;;  %v10691_v11 = vld [vmem:[%s14473_s9 + $0x168] sm:$0xff] }
 0x3e8   : > { %v4145_v16 = vpop.permute.xlu0 %4144 }
 0x3e9   : > { %6327 = vmatpush.bf16.msra.mxu2 %v9686_v14  ;;  %4150 = vst.msk [vmem:[%s12869_s24 + $0x8] sm:$0xff] %vm4148_vm4, %v4145_v16 }
 0x3ea   : > { %6983 = vmatpush.bf16.msra.mxu3 %v10676_v32 }
 0x3eb   : > { %6313 = vmatpush.bf16.msrb.mxu0 %v9430_v10  ;;  %v10709_v10 = vld [vmem:[%s14473_s9 + $0x1f8] sm:$0xff] }
 0x3ed   : > { %6546 = vmatpush.bf16.msrb.mxu2 %v10713_v7 }
 0x3ee   : > { %6314 = vmatmul.bf16.vlgmr.msrb.gmra.mxu0 %v13885_v31  ;;  %v10661_v31 = vld [vmem:[%s14473_s9 + $0x78] sm:$0xff]  ;;  %6984 = vmatpush.bf16.msra.mxu3 %v10675_v36 }
 0x3ef   : > { %6940 = vmatpush.bf16.msra.mxu0 %v10653_v12  ;;  %6954 = vmatpush.bf16.msra.mxu1 %v10661_v31  ;;  %v10665_v31 = vld [vmem:[%s14473_s9 + $0x98] sm:$0xff] }
 0x3f1   : > { %6547 = vmatpush.bf16.msrb.mxu2 %v10712_v4  ;;  %v10729_v4 = vld [vmem:[%s14475_s11] ss:$0 sm:$0xff] }
 0x3f2   : > { %6985 = vmatpush.bf16.msra.mxu3 %v10674_v47 }
 0x3f3   : > { %6941 = vmatpush.bf16.msra.mxu0 %v10652_v58  ;;  %6955 = vmatpush.bf16.msra.mxu1 %v10660_v21 }
 0x3f4   : > { %9729 = vmatmul.msk.bf16.vlgmr.msra.gmra.mxu2 %vm1762_vm1, %v13941_v1  ;;  %v14237_v1 = vpop.f32.mrf.mxu1 }
 0x3f5   : > { %6548 = vmatpush.bf16.msrb.mxu2 %v10711_v23  ;;  %v10688_v23 = vld [vmem:[%s14473_s9 + $0x150] sm:$0xff] }
 0x3f6   : > { %6986 = vmatpush.bf16.msra.mxu3 %v10673_v43  ;;  %v10683_v43 = vld [vmem:[%s14473_s9 + $0x128] sm:$0xff] }
 0x3f7   : > { %6942 = vmatpush.bf16.msra.mxu0 %v10651_v18  ;;  %6956 = vmatpush.bf16.msra.mxu1 %v10659_v20  ;;  %v10689_v18 = vld [vmem:[%s14473_s9 + $0x158] sm:$0xff] }
 0x3f8   : > { %v10685_v20 = vld [vmem:[%s14473_s9 + $0x138] sm:$0xff] }
 0x3f9   : > { %6549 = vmatpush.bf16.msrb.mxu2 %v10710_v25 }
 0x3fa   : > { %6987 = vmatpush.bf16.msra.mxu3 %v10672_v51  ;;  %v10682_v51 = vld [vmem:[%s14473_s9 + $0x120] sm:$0xff] }
 0x3fb   : > { %6943 = vmatpush.bf16.msra.mxu0 %v10650_v39  ;;  %6957 = vmatpush.bf16.msra.mxu1 %v10658_v29 }
 0x3fd   : > { %6968 = vmatpush.bf16.msra.mxu2 %v10669_v50 }
 0x3fe   : > { %6988 = vmatpush.bf16.msra.mxu3 %v10671_v56  ;;  %v10681_v56 = vld [vmem:[%s14473_s9 + $0x118] sm:$0xff] }
 0x3ff   : > { %v5486_v19 = vpop.f32.mrf.mxu3  ;;  %6944 = vmatpush.bf16.msra.mxu0 %v10649_v13  ;;  %6958 = vmatpush.bf16.msra.mxu1 %v10657_v34  ;;  %v10684_v34 = vld [vmem:[%s14473_s9 + $0x130] sm:$0xff] }
 0x400   : > { %v5487_v46 = vadd.f32 %v5486_v19, %v5088_v17  ;;  %v14343_v17 = vld [vmem:[%s14472_s8] sm:$0xff] }
 0x401   : > { %6969 = vmatpush.bf16.msra.mxu2 %v10668_v55  ;;  %v5710_v21 = vperm.slane %v14343_v17, 0 }
 0x402   : > { %6989 = vmatpush.bf16.msra.mxu3 %v10670_v33 }
 0x403   : > { %v5500_v24 = vpop.f32.mrf.mxu0  ;;  %6945 = vmatpush.bf16.msra.mxu0 %v10648_v30  ;;  %6959 = vmatpush.bf16.msra.mxu1 %v10656_v41  ;;  %v10687_v41 = vld [vmem:[%s14473_s9 + $0x148] sm:$0xff] }
 0x404   : > { %v5514_v27 = vpop.f32.mrf.mxu1  ;;  %v5501_v54 = vadd.f32 %v5500_v24, %v5487_v46  ;;  %v10686_v46 = vld [vmem:[%s14473_s9 + $0x140] sm:$0xff] }
 0x405   : > { %6970 = vmatpush.bf16.msra.mxu2 %v10667_v0  ;;  %v5711_v0 = vperm.slane %v14343_v17, 1 }
 0x406   : > { %v5515_v61 = vadd.f32 %v5514_v27, %v5501_v54  ;;  %7038 = vmatpush.bf16.msrb.mxu3 %v10709_v10  ;;  %v10664_v27 = vld [vmem:[%s14473_s9 + $0x90] sm:$0xff]  ;;  %v10679_v10 = vld [vmem:[%s14473_s9 + $0x108] sm:$0xff] }
 0x407   : > { %v5488_v28 = vpop.f32.mrf.mxu3  ;;  %6946 = vmatpush.bf16.msra.mxu0 %v10647_v35  ;;  %6960 = vmatpush.bf16.msra.mxu1 %v10655_v42  ;;  %v10704_v54 = vld [vmem:[%s14473_s9 + $0x1d0] sm:$0xff] }
 0x408   : > { %v5489_v59 = vadd.f32 %v5488_v28, %v14237_v1  ;;  %v10708_v1 = vld [vmem:[%s14473_s9 + $0x1f0] sm:$0xff]  ;;  %v10707_v28 = vld [vmem:[%s14473_s9 + $0x1e8] sm:$0xff] }
 0x409   : > { %6971 = vmatpush.bf16.msra.mxu2 %v10666_v8 }
 0x40a   : > { %7039 = vmatpush.bf16.msrb.mxu3 %v10708_v1 }
 0x40b   : > { %v5502_v38 = vpop.f32.mrf.mxu0  ;;  %6947 = vmatpush.bf16.msra.mxu0 %v10646_v26  ;;  %6961 = vmatpush.bf16.msra.mxu1 %v10654_v45  ;;  %v10662_v45 = vld [vmem:[%s14473_s9 + $0x80] sm:$0xff] }
 0x40c   : > { %v6514_v37 = vpop.permute.xlu1 %6513  ;;  %v5516_v48 = vpop.f32.mrf.mxu1  ;;  %v5503_v3 = vadd.f32 %v5502_v38, %v5489_v59 }
 0x40d   : > { %9751 = vmatmul.msk.bf16.vlgmr.msrb.gmra.mxu2 %vm2165_vm2, %v6514_v37 }
 0x40e   : > { %v5517_v16 = vadd.f32 %v5516_v48, %v5503_v3  ;;  %6972 = vmatpush.bf16.msra.mxu2 %v10665_v31  ;;  %7040 = vmatpush.bf16.msrb.mxu3 %v10707_v28  ;;  %v10706_v48 = vld [vmem:[%s14473_s9 + $0x1e0] sm:$0xff]  ;;  %v10699_v3 = vld [vmem:[%s14473_s9 + $0x1a8] sm:$0xff] }
 0x40f   : > { %7010 = vmatpush.bf16.msrb.mxu1 %v10693_v52  ;;  %6996 = vmatpush.bf16.msrb.mxu0 %v10685_v20 }
 0x412   : > { %6973 = vmatpush.bf16.msra.mxu2 %v10664_v27  ;;  %7041 = vmatpush.bf16.msrb.mxu3 %v10706_v48  ;;  %v10695_v27 = vld [vmem:[%s14473_s9 + $0x188] sm:$0xff] }
 0x413   : > { %7011 = vmatpush.bf16.msrb.mxu1 %v10692_v57  ;;  %6997 = vmatpush.bf16.msrb.mxu0 %v10684_v34  ;;  %v5713_v57 = vperm.slane %v14343_v17, 3 }
 0x417   : > { %v5528_v53 = vpop.f32.mrf.mxu2  ;;  %7012 = vmatpush.bf16.msrb.mxu1 %v10691_v11  ;;  %6998 = vmatpush.bf16.msrb.mxu0 %v10683_v43 }
 0x418   : > { %v5529_v2 = vadd.f32 %v5528_v53, %v5515_v61  ;;  %v10701_v53 = vld [vmem:[%s14473_s9 + $0x1b8] sm:$0xff]  ;;  %v10703_v61 = vld [vmem:[%s14473_s9 + $0x1c8] sm:$0xff] }
 0x41b   : > { %7013 = vmatpush.bf16.msrb.mxu1 %v10690_v9  ;;  %6999 = vmatpush.bf16.msrb.mxu0 %v10682_v51 }
 0x41c   : > { %v5542_v40 = vpop.f32.mrf.mxu3 }
 0x41d   : > { %v5543_v6 = vadd.f32 %v5542_v40, %v5529_v2  ;;  %v10663_v40 = vld [vmem:[%s14473_s9 + $0x88] sm:$0xff] }
 0x41e   : > { %6974 = vmatpush.bf16.msra.mxu2 %v10663_v40 }
 0x41f   : > { %v5530_v5 = vpop.f32.mrf.mxu2  ;;  %7014 = vmatpush.bf16.msrb.mxu1 %v10689_v18  ;;  %7000 = vmatpush.bf16.msrb.mxu0 %v10681_v56  ;;  %v10698_v18 = vld [vmem:[%s14473_s9 + $0x1a0] sm:$0xff] }
 0x420   : > { %v5531_v19 = vadd.f32 %v5530_v5, %v5517_v16  ;;  %v10702_v5 = vld [vmem:[%s14473_s9 + $0x1c0] sm:$0xff] }
 0x422   : > { %6975 = vmatpush.bf16.msra.mxu2 %v10662_v45 }
 0x423   : > { %v5556_v44 = vpop.f32.mrf.mxu0  ;;  %7015 = vmatpush.bf16.msrb.mxu1 %v10688_v23  ;;  %v5712_v23 = vperm.slane %v14343_v17, 2 }
 0x424   : > { %v5544_v15 = vpop.f32.mrf.mxu3  ;;  %v5570_v49 = vpop.f32.mrf.mxu1  ;;  %v5557_v14 = vadd.f32 %v5556_v44, %v5543_v6 }
 0x425   : > { %v5545_v13 = vadd.f32 %v5544_v15, %v5531_v19 }
 0x426   : > { %v5571_v7 = vadd.f32 %v5570_v49, %v5557_v14  ;;  %v10705_v49 = vld [vmem:[%s14473_s9 + $0x1d8] sm:$0xff]  ;;  %7024 = vmatpush.bf16.msrb.mxu2 %v10701_v53 }
 0x427   : > { %7016 = vmatpush.bf16.msrb.mxu1 %v10687_v41  ;;  %7042 = vmatpush.bf16.msrb.mxu3 %v10705_v49  ;;  %v5714_v49 = vperm.slane %v14343_v17, 4 }
 0x42b   : > { %v5558_v60 = vpop.f32.mrf.mxu0  ;;  %7017 = vmatpush.bf16.msrb.mxu1 %v10686_v46  ;;  %7043 = vmatpush.bf16.msrb.mxu3 %v10704_v54 }
 0x42c   : > { %v5572_v62 = vpop.f32.mrf.mxu1  ;;  %v6147_v63 = vpop.f32.mrf.mxu3  ;;  %v5559_v29 = vadd.f32 %v5558_v60, %v5545_v13  ;;  %v10700_v60 = vld [vmem:[%s14473_s9 + $0x1b0] sm:$0xff] }
 0x42d   : > { %v6148_v30 = vadd.f32 %v6147_v63, %v5710_v21  ;;  %7025 = vmatpush.bf16.msrb.mxu2 %v10700_v60  ;;  %v10680_v63 = vld [vmem:[%s14473_s9 + $0x110] sm:$0xff] }
 0x42e   : > { %v5573_v26 = vadd.f32 %v5572_v62, %v5559_v29  ;;  %7001 = vmatpush.bf16.msrb.mxu0 %v10680_v63 }
 0x42f   : > { %7044 = vmatpush.bf16.msrb.mxu3 %v10703_v61 }
 0x431   : > { %7026 = vmatpush.bf16.msrb.mxu2 %v10699_v3 }
 0x432   : > { %7002 = vmatpush.bf16.msrb.mxu0 %v10679_v10 }
 0x433   : > { %v6161_v12 = vpop.f32.mrf.mxu0  ;;  %7045 = vmatpush.bf16.msrb.mxu3 %v10702_v5 }
 0x434   : > { %v14345_v58 = vpop.f32.mrf.mxu1  ;;  %v6149_v39 = vpop.f32.mrf.mxu3  ;;  %v6162_v36 = vadd.f32 %v6161_v12, %v6148_v30 }
 0x435   : > { %v6150_v32 = vadd.f32 %v6149_v39, %v5710_v21  ;;  %v6176_v14 = vadd.f32 %v14345_v58, %v5711_v0  ;;  %7027 = vmatpush.bf16.msrb.mxu2 %v10698_v18  ;;  %v10697_v58 = vld [vmem:[%s14473_s9 + $0x198] sm:$0xff] }
 0x437   : > { %v5584_v22 = vpop.f32.mrf.mxu2 }
 0x438   : > { %v5585_v24 = vadd.f32 %v5584_v22, %v5571_v7  ;;  %v10678_v7 = vld [vmem:[%s14473_s9 + $0x100] sm:$0xff]  ;;  %v10696_v22 = vld [vmem:[%s14473_s9 + $0x190] sm:$0xff] }
 0x439   : > { %7003 = vmatpush.bf16.msrb.mxu0 %v10678_v7  ;;  %7028 = vmatpush.bf16.msrb.mxu2 %v10697_v58 }
 0x43a   : > { %v5593_v25 = vadd.f32 %v10729_v4, %v5585_v24  ;;  %v5715_v24 = vperm.slane %v14343_v17, 5 }
 0x43b   : > { %v6163_v35 = vpop.f32.mrf.mxu0 }
 0x43c   : > { %v6164_v37 = vadd.f32 %v6163_v35, %v6150_v32  ;;  %v6177_v38 = vpop.f32.mrf.mxu1  ;;  %5597 = vrot.lane.b32.xlu1 %v5593_v25, %s10741_s30 }
 0x43d   : > { %v6178_v16 = vadd.f32 %v6177_v38, %v5711_v0  ;;  %7029 = vmatpush.bf16.msrb.mxu2 %v10696_v22  ;;  %v10694_v38 = vld [vmem:[%s14473_s9 + $0x180] sm:$0xff]  ;;  %v5716_v0 = vperm.slane %v14343_v17, 6 }
 0x43e   : > { %v6362_v47 = vpack.c.bf16 %v6164_v37, %v6162_v36 }
 0x43f   : > { %v5586_v15 = vpop.f32.mrf.mxu2 }
 0x440   : > { %v6231_v42 = vpop.f32.mrf.mxu3  ;;  %v5587_v44 = vadd.f32 %v5586_v15, %v5573_v26  ;;  %6948 = vmatmul.bf16.vlgmr.msra.gmra.mxu0 %v6362_v47  ;;  %v5717_v15 = vperm.slane %v14343_v17, 7 }
 0x441   : > { %v6232_v33 = vadd.f32 %v6231_v42, %v5713_v57  ;;  %7030 = vmatpush.bf16.msrb.mxu2 %v10695_v27 }
 0x442   : > { %v5594_v50 = vadd.f32 %v10729_v4, %v5587_v44 }
 0x443   : > { %v6203_v62 = vpop.f32.mrf.mxu0 }
 0x444   : > { %v6245_v52 = vpop.f32.mrf.mxu1  ;;  %5599 = vrot.lane.b32.xlu2 %v5594_v50, %s10741_s30  ;;  %v6204_v25 = vadd.f32 %v6203_v62, %v5712_v23 }
 0x445   : > { %v6246_v6 = vadd.f32 %v6245_v52, %v6232_v33  ;;  %7031 = vmatpush.bf16.msrb.mxu2 %v10694_v38 }
 0x447   : > { %v6189_v59 = vpop.f32.mrf.mxu2 }
 0x448   : > { %v6233_v55 = vpop.f32.mrf.mxu3  ;;  %v6190_v1 = vadd.f32 %v6189_v59, %v6176_v14 }
 0x449   : > { %v6234_v11 = vadd.f32 %v6233_v55, %v5713_v57 }
 0x44b   : > { %v6205_v21 = vpop.f32.mrf.mxu0 }
 0x44c   : > { %v6247_v2 = vpop.f32.mrf.mxu1  ;;  %v6206_v34 = vadd.f32 %v6205_v21, %v5712_v23 }
 0x44d   : > { %v6248_v8 = vadd.f32 %v6247_v2, %v6234_v11 }
 0x44f   : > { %v6365_v12 = vpack.c.bf16 %v6248_v8, %v6246_v6  ;;  %v6191_v31 = vpop.f32.mrf.mxu2 }
 0x450   : > { %v6301_v9 = vpop.f32.mrf.mxu3  ;;  %v6192_v19 = vadd.f32 %v6191_v31, %v6178_v16 }
 0x451   : > { %6990 = vmatmul.bf16.vlgmr.msra.gmra.mxu3 %v6365_v12 }
 0x452   : > { %v6363_v39 = vpack.c.bf16 %v6192_v19, %v6190_v1 }
 0x453   : > { %v6273_v29 = vpop.f32.mrf.mxu0 }
 0x454   : > { %v6287_v4 = vpop.f32.mrf.mxu1  ;;  %6962 = vmatmul.bf16.vlgmr.msra.gmra.mxu1 %v6363_v39 }
 0x455   : > { %v6288_v30 = vadd.f32 %v6287_v4, %v5715_v24 }
 0x457   : > { %v6217_v13 = vpop.f32.mrf.mxu2  ;;  %v6302_v40 = vadd.f32 %v6301_v9, %v6288_v30 }
 0x458   : > { %v6303_v20 = vpop.f32.mrf.mxu3  ;;  %v6218_v41 = vadd.f32 %v6217_v13, %v6204_v25 }
 0x45b   : > { %v6275_v43 = vpop.f32.mrf.mxu0 }
 0x45c   : > { %v6289_v28 = vpop.f32.mrf.mxu1 }
 0x45d   : > { %v6290_v32 = vadd.f32 %v6289_v28, %v5715_v24 }
 0x45f   : > { %v6304_v35 = vadd.f32 %v6303_v20, %v6290_v32  ;;  %v6219_v36 = vpop.f32.mrf.mxu2 }
 0x460   : > { %v6220_v48 = vadd.f32 %v6219_v36, %v6206_v34  ;;  %v10730_v36 = vld [vmem:[%s14475_s11] ss:$0 sm:$0xff] }
 0x461   : > { %v6367_v26 = vpack.c.bf16 %v6304_v35, %v6302_v40 }
 0x462   : > { %v6364_v47 = vpack.c.bf16 %v6220_v48, %v6218_v41 }
 0x464   : > { %v6357_v42 = vpop.f32.mrf.mxu1  ;;  %6976 = vmatmul.bf16.vlgmr.msra.gmra.mxu2 %v6364_v47  ;;  %7018 = vmatmul.bf16.vlgmr.msrb.gmra.mxu1 %v6367_v26 }
 0x467   : > { %v6259_v44 = vpop.f32.mrf.mxu2 }
 0x468   : > { %v6343_v37 = vpop.f32.mrf.mxu3  ;;  %v6260_v54 = vadd.f32 %v6259_v44, %v5714_v49 }
 0x469   : > { %v6344_v46 = vadd.f32 %v6343_v37, %v5717_v15 }
 0x46a   : > { %v6274_v60 = vadd.f32 %v6273_v29, %v6260_v54 }
 0x46b   : > { %v6358_v52 = vadd.f32 %v6357_v42, %v6344_v46  ;;  %v6315_v59 = vpop.f32.mrf.mxu0 }
 0x46c   : > { %v6359_v51 = vpop.f32.mrf.mxu1  ;;  %v6316_v11 = vadd.f32 %v6315_v59, %v5716_v0 }
 0x46f   : > { %v6261_v56 = vpop.f32.mrf.mxu2 }
 0x470   : > { %v6345_v45 = vpop.f32.mrf.mxu3  ;;  %v6262_v57 = vadd.f32 %v6261_v56, %v5714_v49 }
 0x471   : > { %v6346_v50 = vadd.f32 %v6345_v45, %v5717_v15 }
 0x472   : > { %v6276_v61 = vadd.f32 %v6275_v43, %v6262_v57 }
 0x473   : > { %v6360_v53 = vadd.f32 %v6359_v51, %v6346_v50  ;;  %v6317_v33 = vpop.f32.mrf.mxu0 }
 0x474   : > { %v6366_v62 = vpack.c.bf16 %v6276_v61, %v6274_v60  ;;  %v6318_v2 = vadd.f32 %v6317_v33, %v5716_v0 }
 0x475   : > { %v6369_v55 = vpack.c.bf16 %v6360_v53, %v6358_v52 }
 0x476   : > { %7004 = vmatmul.bf16.vlgmr.msrb.gmra.mxu0 %v6366_v62 }
 0x477   : > { %7046 = vmatmul.bf16.vlgmr.msrb.gmra.mxu3 %v6369_v55  ;;  %v6329_v63 = vpop.f32.mrf.mxu2 }
 0x478   : > { %v6330_v5 = vadd.f32 %v6329_v63, %v6316_v11 }
 0x47f   : > { %v6331_v3 = vpop.f32.mrf.mxu2 }
 0x480   : > { %v6332_v6 = vadd.f32 %v6331_v3, %v6318_v2 }
 0x482   : > { %v6368_v8 = vpack.c.bf16 %v6332_v6, %v6330_v5 }
 0x484   : > { %7032 = vmatmul.bf16.vlgmr.msrb.gmra.mxu2 %v6368_v8 }
 0x490   : > { %v6551_v14 = vpop.f32.mrf.mxu2 }
 0x498   : > { %v6553_v12 = vpop.f32.mrf.mxu2 }
 0x49e   : > { %v5600_v10 = vpop.permute.xlu2 %5599 }
 0x49f   : > { %5605 = vst.msk [vmem:[%s12869_s24 + $0x8] sm:$0xff] %vm5603_vm5, %v5600_v10 }
 0x4ae   : > { %v5598_v9 = vpop.permute.xlu1 %5597 }
 0x4af   : > { %5604 = vst.msk [vmem:[%s12869_s24] sm:$0xff] %vm5603_vm5, %v5598_v9 }
 0x4bd   : > { %v6949_v16 = vpop.f32.mrf.mxu0 }
 0x4be   : > { %v6950_v19 = vadd.f32 %v6949_v16, %v6551_v14 }
 0x4c5   : > { %v6951_v1 = vpop.f32.mrf.mxu0 }
 0x4c6   : > { %v6952_v13 = vadd.f32 %v6951_v1, %v6553_v12 }
 0x4d1   : > { %v6963_v31 = vpop.f32.mrf.mxu1 }
 0x4d2   : > { %v6964_v21 = vadd.f32 %v6963_v31, %v6950_v19 }
 0x4d4   : > { %v6991_v18 = vpop.f32.mrf.mxu3 }
 0x4d9   : > { %v6965_v7 = vpop.f32.mrf.mxu1 }
 0x4da   : > { %v6966_v24 = vadd.f32 %v6965_v7, %v6952_v13 }
 0x4dc   : > { %v6993_v58 = vpop.f32.mrf.mxu3 }
 0x4e1   : > { %v7019_v23 = vpop.f32.mrf.mxu1 }
 0x4e7   : > { %v6977_v17 = vpop.f32.mrf.mxu2 }
 0x4e8   : > { %v6978_v39 = vadd.f32 %v6977_v17, %v6964_v21 }
 0x4e9   : > { %v7021_v41 = vpop.f32.mrf.mxu1 }
 0x4ea   : > { %v6992_v22 = vadd.f32 %v6991_v18, %v6978_v39 }
 0x4ef   : > { %v6979_v20 = vpop.f32.mrf.mxu2 }
 0x4f0   : > { %v6980_v28 = vadd.f32 %v6979_v20, %v6966_v24 }
 0x4f2   : > { %v6994_v34 = vadd.f32 %v6993_v58, %v6980_v28 }
 0x4f3   : > { %v7005_v4 = vpop.f32.mrf.mxu0 }
 0x4f4   : > { %v7006_v27 = vadd.f32 %v7005_v4, %v6992_v22 }
 0x4f6   : > { %v7020_v30 = vadd.f32 %v7019_v23, %v7006_v27 }
 0x4fa   : > { %v7047_v29 = vpop.f32.mrf.mxu3 }
 0x4fb   : > { %v7007_v32 = vpop.f32.mrf.mxu0 }
 0x4fc   : > { %v7008_v37 = vadd.f32 %v7007_v32, %v6994_v34 }
 0x4fe   : > { %v7022_v48 = vadd.f32 %v7021_v41, %v7008_v37 }
 0x502   : > { %v7049_v42 = vpop.f32.mrf.mxu3 }
 0x507   : > { %v7033_v25 = vpop.f32.mrf.mxu2 }
 0x508   : > { %v7034_v35 = vadd.f32 %v7033_v25, %v7020_v30 }
 0x50a   : > { %v7048_v38 = vadd.f32 %v7047_v29, %v7034_v35 }
 0x50c   : > { %v7056_v40 = vadd.f32 %v10730_v36, %v7048_v38 }
 0x50e   : > { %7060 = vrot.lane.b32.xlu0 %v7056_v40, %s10743_s28 }
 0x50f   : > { %v7035_v26 = vpop.f32.mrf.mxu2 }
 0x510   : > { %v7036_v47 = vadd.f32 %v7035_v26, %v7022_v48 }
 0x512   : > { %v7050_v43 = vadd.f32 %v7049_v42, %v7036_v47 }
 0x514   : > { %v7057_v15 = vadd.f32 %v10730_v36, %v7050_v43 }
 0x516   : > { %7062 = vrot.lane.b32.xlu1 %v7057_v15, %s10743_s28 }
 0x580   : > { %v7061_v44 = vpop.permute.xlu0 %7060 }
 0x581   : > { %7067 = vst.msk [vmem:[%s12869_s24] sm:$0xff] %vm7066_vm6, %v7061_v44 }
 0x588   : > { %v7063_v45 = vpop.permute.xlu1 %7062 }
 0x589   : > { %7068 = vst.msk [vmem:[%s12869_s24 + $0x8] sm:$0xff] %vm7066_vm6, %v7063_v45 }
 0x58a PF: > { %s22_s21 = sadd.s32 1, %s10737_s21  }
 0x58b   : > { %p19_p4 = scmp.ge.s32.totalorder %s22_s21, 4  }
 0x58d   :  { %21 = sbr.rel (!%p19_p4) target bundleno = 1 (0x1), region = 104 }

</bundles_post_ra>
